<compile_context>
chip_gen: v7x
topology: tpu7x:2x2x1
jax: 0.10.0
libtpu: 0.0.40
codegen_flags: <defaults>
</compile_context>

<pallas_src>
import functools

import jax
import jax.numpy as jnp
from jax import lax
from jax.experimental import pallas as pl
from jax.experimental.pallas import tpu as pltpu


# ----------------------------------------------------------------------------
# Fused Pallas kernels (one per branch type)
# ----------------------------------------------------------------------------
def _zero_halo(pad_ref, NB, H, W, C):
    """Refresh only the 1-px halo border of the scratch slab (interior is fully
    overwritten each step) -> no full (H+2)(W+2)C zero-store pass per image."""
    pad_ref[:, pl.ds(0, 1), :, :] = jnp.zeros((NB, 1, W + 2, C), jnp.float32)
    pad_ref[:, pl.ds(H + 1, 1), :, :] = jnp.zeros((NB, 1, W + 2, C), jnp.float32)
    pad_ref[:, :, pl.ds(0, 1), :] = jnp.zeros((NB, H + 2, 1, C), jnp.float32)
    pad_ref[:, :, pl.ds(W + 1, 1), :] = jnp.zeros((NB, H + 2, 1, C), jnp.float32)


def _dw3x3_from_slab(pad_ref, w9_ref, NB, H, W, Ho, Wo, stride):
    """Depthwise 3x3 (BN scale folded into w9) on the zero-padded VMEM slab.
    Accumulates at stride 1 in f32, then decimates ONCE for stride>1 (single strided
    read re-staged through the slab instead of 9 dual-axis strided tap reads)."""
    acc = pad_ref[:, pl.ds(0, H), pl.ds(0, W), :] * w9_ref[0, :]
    for t in range(1, 9):
        dy, dx = divmod(t, 3)
        acc = acc + pad_ref[:, pl.ds(dy, H), pl.ds(dx, W), :] * w9_ref[t, :]
    if stride > 1:
        pad_ref[:, pl.ds(1, H), pl.ds(1, W), :] = acc
        acc = pad_ref[:, pl.ds(1, Ho, stride=stride), pl.ds(1, Wo, stride=stride), :]
    return acc  # (NB, Ho, Wo, C) f32


def _pw_dw_pw_kernel(x_ref, w1_ref, b1_ref, w9_ref, bd_ref, w2_ref, b2_ref,
                     o_ref, pad_ref, *, NB, H, W, Ho, Wo, stride, compute_dtype):
    """second_half: 1x1(+BN)+ReLU -> dw3x3(stride)(+BN) -> 1x1(+BN)+ReLU.

    x_ref : (1, NB, H, W, Cin)  NB images, NHWC
    w1    : (Cin, Cmid)   compute_dtype, BN scale folded (zero rows select the branch
                          channels in the non-downsampling case)
    w9    : (9, Cmid)     f32 depthwise taps dy*3+dx, BN scale folded
    w2    : (Cmid, Cmid)  compute_dtype, BN scale folded
    b*    : (1, C)        f32 BN biases
    pad_ref: VMEM scratch (NB, H+2, W+2, Cmid) -- halo lives here, not in HBM.
    """
    Cin = x_ref.shape[-1]
    Cmid = w1_ref.shape[-1]

    # --- 1x1 conv as one MXU matmul over channels (M = NB*H*W), f32 accumulation ----
    x = x_ref[0].reshape(NB * H * W, Cin).astype(compute_dtype)
    y1 = jnp.dot(x, w1_ref[...], preferred_element_type=jnp.float32)
    y1 = jnp.maximum(y1 + b1_ref[...], 0.0)

    # --- stage into zero-padded VMEM slab (halo border only is re-zeroed) -----------
    _zero_halo(pad_ref, NB, H, W, Cmid)
    pad_ref[:, pl.ds(1, H), pl.ds(1, W), :] = y1.reshape(NB, H, W, Cmid)

    # --- depthwise 3x3 (+bias) -------------------------------------------------------
    y2 = _dw3x3_from_slab(pad_ref, w9_ref, NB, H, W, Ho, Wo, stride) + bd_ref[0, :]

    # --- 1x1 conv + bias + ReLU ------------------------------------------------------
    y3 = jnp.dot(y2.reshape(NB * Ho * Wo, Cmid).astype(compute_dtype), w2_ref[...],
                 preferred_element_type=jnp.float32)
    y3 = jnp.maximum(y3 + b2_ref[...], 0.0)
    o_ref[...] = y3.reshape(1, NB * Ho * Wo, Cmid).astype(o_ref.dtype)


def _dw_pw_kernel(x_ref, w9_ref, bd_ref, wp_ref, bp_ref, o_ref, pad_ref, *,
                  NB, H, W, Ho, Wo, stride, compute_dtype):
    """first_half (downsampling): dw3x3(stride)(+BN) -> 1x1 conv(+BN)+ReLU."""
    Cin = x_ref.shape[-1]
    Cout = wp_ref.shape[-1]

    _zero_halo(pad_ref, NB, H, W, Cin)
    pad_ref[:, pl.ds(1, H), pl.ds(1, W), :] = x_ref[0].astype(jnp.float32)

    y1 = _dw3x3_from_slab(pad_ref, w9_ref, NB, H, W, Ho, Wo, stride) + bd_ref[0, :]

    y2 = jnp.dot(y1.reshape(NB * Ho * Wo, Cin).astype(compute_dtype), wp_ref[...],
                 preferred_element_type=jnp.float32)
    y2 = jnp.maximum(y2 + bp_ref[...], 0.0)
    o_ref[...] = y2.reshape(1, NB * Ho * Wo, Cout).astype(o_ref.dtype)


# ----------------------------------------------------------------------------
# Wrappers calling pallas_call
# ----------------------------------------------------------------------------
def _out_hw(H, W, stride):
    # 3x3 conv, pad=1, stride s
    return (H - 1) // stride + 1, (W - 1) // stride + 1


def _pick_batch_block(N, per_image_bytes, budget_bytes=8 << 20):
    """Largest divisor of N whose per-step working set stays within `budget_bytes`
    (leaves headroom inside v7x's 64 MiB physical / 32 MiB scoped VMEM even with the
    pipeline's double-buffered input/output blocks)."""
    nb = max(1, min(N, budget_bytes // max(per_image_bytes, 1)))
    while N % nb:
        nb -= 1
    return nb


def fused_second_half(x_nhwc, w1, b1, w9, bd, w2, b2, stride, compute_dtype):
    """pw1(+BN)+ReLU -> dw3x3(stride)(+BN) -> pw2(+BN)+ReLU as ONE kernel."""
    N, H, W, Cin = x_nhwc.shape
    Cmid = w1.shape[1]
    Ho, Wo = _out_hw(H, W, stride)

    per_img = 4 * (2 * H * W * Cin                 # double-buffered input block
                   + (H + 2) * (W + 2) * Cmid      # padded scratch slab
                   + 2 * Ho * Wo * Cmid)           # double-buffered output block
    NB = _pick_batch_block(N, per_img)
    G = N // NB
    xg = x_nhwc.reshape(G, NB, H, W, Cin)          # contiguous reshape, free in XLA

    out = pl.pallas_call(
        functools.partial(_pw_dw_pw_kernel, NB=NB, H=H, W=W, Ho=Ho, Wo=Wo,
                          stride=stride, compute_dtype=compute_dtype),
        out_shape=jax.ShapeDtypeStruct((G, NB * Ho * Wo, Cmid), jnp.float32),
        grid=(G,),
        in_specs=[
            pl.BlockSpec((1, NB, H, W, Cin), lambda g: (g, 0, 0, 0, 0)),
            pl.BlockSpec((Cin, Cmid), lambda g: (0, 0)),
            pl.BlockSpec((1, Cmid), lambda g: (0, 0)),
            pl.BlockSpec((9, Cmid), lambda g: (0, 0)),
            pl.BlockSpec((1, Cmid), lambda g: (0, 0)),
            pl.BlockSpec((Cmid, Cmid), lambda g: (0, 0)),
            pl.BlockSpec((1, Cmid), lambda g: (0, 0)),
        ],
        out_specs=pl.BlockSpec((1, NB * Ho * Wo, Cmid), lambda g: (g, 0, 0)),
        scratch_shapes=[pltpu.VMEM((NB, H + 2, W + 2, Cmid), jnp.float32)],
        compiler_params=pltpu.CompilerParams(dimension_semantics=("parallel",)),
    )(xg,
      w1.astype(compute_dtype),                    # pre-cast MXU operands in wrapper
      b1.reshape(1, Cmid),
      w9,                                          # dw taps stay f32 (v5e VPU)
      bd.reshape(1, Cmid),
      w2.astype(compute_dtype),
      b2.reshape(1, Cmid))
    return out.reshape(N, Ho, Wo, Cmid)


def fused_first_half(x_nhwc, w9, bd, wp, bp, stride, compute_dtype):
    """dw3x3(stride)(+BN) -> pw(+BN)+ReLU as ONE kernel (downsampling branch)."""
    N, H, W, Cin = x_nhwc.shape
    Cout = wp.shape[1]
    Ho, Wo = _out_hw(H, W, stride)

    per_img = 4 * (2 * H * W * Cin
                   + (H + 2) * (W + 2) * Cin
                   + 2 * Ho * Wo * Cout)
    NB = _pick_batch_block(N, per_img)
    G = N // NB
    xg = x_nhwc.reshape(G, NB, H, W, Cin)

    out = pl.pallas_call(
        functools.partial(_dw_pw_kernel, NB=NB, H=H, W=W, Ho=Ho, Wo=Wo,
                          stride=stride, compute_dtype=compute_dtype),
        out_shape=jax.ShapeDtypeStruct((G, NB * Ho * Wo, Cout), jnp.float32),
        grid=(G,),
        in_specs=[
            pl.BlockSpec((1, NB, H, W, Cin), lambda g: (g, 0, 0, 0, 0)),
            pl.BlockSpec((9, Cin), lambda g: (0, 0)),
            pl.BlockSpec((1, Cin), lambda g: (0, 0)),
            pl.BlockSpec((Cin, Cout), lambda g: (0, 0)),
            pl.BlockSpec((1, Cout), lambda g: (0, 0)),
        ],
        out_specs=pl.BlockSpec((1, NB * Ho * Wo, Cout), lambda g: (g, 0, 0)),
        scratch_shapes=[pltpu.VMEM((NB, H + 2, W + 2, Cin), jnp.float32)],
        compiler_params=pltpu.CompilerParams(dimension_semantics=("parallel",)),
    )(xg, w9, bd.reshape(1, Cin), wp.astype(compute_dtype), bp.reshape(1, Cout))
    return out.reshape(N, Ho, Wo, Cout)


# ----------------------------------------------------------------------------
# Full ShufflenetResidual forward (Pallas path)
# ----------------------------------------------------------------------------
def shufflenet_residual_nhwc(x, params, stride, is_downsampling,
                             compute_dtype=jnp.bfloat16):
    """Transpose-free NHWC entry point (use this boundary if the surrounding model is
    NHWC; the NCHW wrapper below only adds the PyTorch-layout transposes)."""
    N, H, W, C = x.shape

    # Fold inference-BN scales into the conv / dw weights once, outside the kernel.
    w_pw1 = params["sh_pw1_w"] * params["sh_pw1_s"][None, :]
    w_dw = params["sh_dw_w"] * params["sh_dw_s"][None, :]
    w_pw2 = params["sh_pw2_w"] * params["sh_pw2_s"][None, :]

    if is_downsampling:
        fh_dw = params["fh_dw_w"] * params["fh_dw_s"][None, :]
        fh_pw = params["fh_pw_w"] * params["fh_pw_s"][None, :]
        fh = fused_first_half(x, fh_dw, params["fh_dw_b"], fh_pw, params["fh_pw_b"],
                              stride, compute_dtype)
        sh = fused_second_half(x, w_pw1, params["sh_pw1_b"], w_dw, params["sh_dw_b"],
                               w_pw2, params["sh_pw2_b"], stride, compute_dtype)
    else:
        half = C // 2
        # Select the second channel half inside the kernel's first matmul by zero-
        # padding the pw1 weight rows (exact); avoids materializing x[..., half:] in HBM.
        w_pw1 = jnp.concatenate(
            [jnp.zeros((half, w_pw1.shape[1]), w_pw1.dtype), w_pw1], axis=0)
        fh = x[..., :half]   # pass-through branch; slice fuses into the interleave below
        sh = fused_second_half(x, w_pw1, params["sh_pw1_b"], w_dw, params["sh_dw_b"],
                               w_pw2, params["sh_pw2_b"], stride, compute_dtype)

    # concat + channel_shuffle(groups=2) fused into ONE interleave:
    # shuffled output channel 2*i + g is branch g (fh=0, sh=1) channel i.
    Nn, Ho, Wo, Ch = sh.shape
    return jnp.stack([fh.astype(sh.dtype), sh], axis=-1).reshape(Nn, Ho, Wo, 2 * Ch)


def shufflenet_residual(x_nchw, params, stride, is_downsampling,
                        compute_dtype=jnp.bfloat16):
    """NCHW public interface matching the PyTorch module."""
    x = jnp.transpose(x_nchw, (0, 2, 3, 1))            # NCHW -> NHWC
    out = shufflenet_residual_nhwc(x, params, stride, is_downsampling, compute_dtype)
    return jnp.transpose(out, (0, 3, 1, 2))             # NHWC -> NCHW


# ----------------------------------------------------------------------------
# Deterministic parameter init (synthetic; matches the module's shapes)
# ----------------------------------------------------------------------------
def make_params(key, in_ch, out_ch, is_downsampling):
    half = out_ch // 2
    keys = iter(jax.random.split(key, 32))

    def w_mat(cin, cout):  # 1x1 conv weight as (Cin, Cout)
        return 0.1 * jax.random.normal(next(keys), (cin, cout), jnp.float32)

    def w_dw(c):           # depthwise 3x3 weight as (9, C), index dy*3+dx
        return 0.1 * jax.random.normal(next(keys), (9, c), jnp.float32)

    def bn(c):             # folded inference BatchNorm -> (scale, bias)
        s = 1.0 + 0.1 * jax.random.normal(next(keys), (c,), jnp.float32)
        b = 0.1 * jax.random.normal(next(keys), (c,), jnp.float32)
        return s, b

    p = {}
    if is_downsampling:
        p["fh_dw_w"] = w_dw(in_ch)
        p["fh_dw_s"], p["fh_dw_b"] = bn(in_ch)
        p["fh_pw_w"] = w_mat(in_ch, half)
        p["fh_pw_s"], p["fh_pw_b"] = bn(half)

    sh_in = in_ch if is_downsampling else half
    p["sh_pw1_w"] = w_mat(sh_in, half)
    p["sh_pw1_s"], p["sh_pw1_b"] = bn(half)
    p["sh_dw_w"] = w_dw(half)
    p["sh_dw_s"], p["sh_dw_b"] = bn(half)
    p["sh_pw2_w"] = w_mat(half, half)
    p["sh_pw2_s"], p["sh_pw2_b"] = bn(half)
    return p


# ----------------------------------------------------------------------------
# Pure-JAX reference (lax.conv) for correctness checking
# ----------------------------------------------------------------------------
def ref_forward(x, params, stride, is_downsampling):
    dn = ("NCHW", "OIHW", "NCHW")

    def dw(z, w9, s, b, st):
        C = z.shape[1]
        w = w9.reshape(3, 3, C).transpose(2, 0, 1)[:, None, :, :]  # (C,1,3,3)
        y = lax.conv_general_dilated(z, w, (st, st), ((1, 1), (1, 1)),
                                     dimension_numbers=dn, feature_group_count=C)
        return y * s[None, :, None, None] + b[None, :, None, None]

    def pw(z, wm, s, b, relu):
        w = wm.T[:, :, None, None]  # (Cout, Cin, 1, 1)
        y = lax.conv_general_dilated(z, w, (1, 1), ((0, 0), (0, 0)), dimension_numbers=dn)
        y = y * s[None, :, None, None] + b[None, :, None, None]
        return jnp.maximum(y, 0.0) if relu else y

    if is_downsampling:
        fh = dw(x, params["fh_dw_w"], params["fh_dw_s"], params["fh_dw_b"], stride)
        fh = pw(fh, params["fh_pw_w"], params["fh_pw_s"], params["fh_pw_b"], True)
        branch_in = x
    else:
        half_in = x.shape[1] // 2
        fh = x[:, :half_in]
        branch_in = x[:, half_in:]

    sh = pw(branch_in, params["sh_pw1_w"], params["sh_pw1_s"], params["sh_pw1_b"], True)
    sh = dw(sh, params["sh_dw_w"], params["sh_dw_s"], params["sh_dw_b"], stride)
    sh = pw(sh, params["sh_pw2_w"], params["sh_pw2_s"], params["sh_pw2_b"], True)

    out = jnp.concatenate([fh, sh], axis=1)
    B, C, H, W = out.shape
    out = out.reshape(B, 2, C // 2, H, W).transpose(0, 2, 1, 3, 4).reshape(B, C, H, W)
    return out


# ----------------------------------------------------------------------------
if __name__ == "__main__":
    key = jax.random.PRNGKey(0)
    kx1, kx2, kp1, kp2 = jax.random.split(key, 4)

    # Case 1: non-downsampling block (stride=1), in=out=8 channels
    x1 = jax.random.normal(kx1, (2, 8, 16, 16), jnp.float32)
    p1 = make_params(kp1, 8, 8, is_downsampling=False)
    r1 = ref_forward(x1, p1, 1, False)

    y1_f32 = jax.block_until_ready(
        shufflenet_residual(x1, p1, 1, False, compute_dtype=jnp.float32))
    assert y1_f32.shape == (2, 8, 16, 16)
    assert jnp.allclose(y1_f32, r1, rtol=1e-3, atol=1e-3)

    y1_bf16 = jax.block_until_ready(shufflenet_residual(x1, p1, 1, False))  # default bf16 MXU path
    assert jnp.allclose(y1_bf16, r1, rtol=5e-2, atol=5e-2)

    # Case 2: downsampling block (stride=2), in=4 -> out=8 channels
    x2 = jax.random.normal(kx2, (2, 4, 16, 16), jnp.float32)
    p2 = make_params(kp2, 4, 8, is_downsampling=True)
    r2 = ref_forward(x2, p2, 2, True)

    y2_f32 = jax.block_until_ready(
        shufflenet_residual(x2, p2, 2, True, compute_dtype=jnp.float32))
    assert y2_f32.shape == (2, 8, 8, 8)
    assert jnp.allclose(y2_f32, r2, rtol=1e-3, atol=1e-3)

    y2_bf16 = jax.block_until_ready(shufflenet_residual(x2, p2, 2, True))
    assert jnp.allclose(y2_bf16, r2, rtol=5e-2, atol=5e-2)

    print("KERNEL_OK")
</pallas_src>

<mosaic_0001>
module attributes {stable_mosaic.version = 11 : i64} {
  func.func @_pw_dw_pw_kernel(%arg0: i32, %arg1: memref<1x2x16x16x8xf32, #tpu.memory_space<vmem>>, %arg2: memref<8x4xf32, #tpu.memory_space<vmem>>, %arg3: memref<1x4xf32, #tpu.memory_space<vmem>>, %arg4: memref<9x4xf32, #tpu.memory_space<vmem>>, %arg5: memref<1x4xf32, #tpu.memory_space<vmem>>, %arg6: memref<4x4xf32, #tpu.memory_space<vmem>>, %arg7: memref<1x4xf32, #tpu.memory_space<vmem>>, %arg8: memref<1x512x4xf32, #tpu.memory_space<vmem>>, %arg9: memref<2x18x18x4xf32, #tpu.memory_space<vmem>>) attributes {dimension_semantics = [#tpu.dimension_semantics<parallel>], iteration_bounds = array<i64: 1>, scalar_prefetch = 0 : i64, scratch_operands = 1 : i64, tpu.core_type = #tpu.core_type<tc>, window_params = [{transform_indices = @transform_0, window_bounds = array<i64: 1, 2, 16, 16, 8>}, {pipeline_mode = #tpu.pipeline_mode<synchronous>, transform_indices = @transform_1, window_bounds = array<i64: 8, 4>}, {pipeline_mode = #tpu.pipeline_mode<synchronous>, transform_indices = @transform_2, window_bounds = array<i64: 1, 4>}, {pipeline_mode = #tpu.pipeline_mode<synchronous>, transform_indices = @transform_3, window_bounds = array<i64: 9, 4>}, {pipeline_mode = #tpu.pipeline_mode<synchronous>, transform_indices = @transform_4, window_bounds = array<i64: 1, 4>}, {pipeline_mode = #tpu.pipeline_mode<synchronous>, transform_indices = @transform_5, window_bounds = array<i64: 4, 4>}, {pipeline_mode = #tpu.pipeline_mode<synchronous>, transform_indices = @transform_6, window_bounds = array<i64: 1, 4>}, {transform_indices = @transform_7, window_bounds = array<i64: 1, 512, 4>}]} {
    %c0 = arith.constant 0 : index
    %c0_0 = arith.constant 0 : index
    %c0_1 = arith.constant 0 : index
    %c0_2 = arith.constant 0 : index
    %c0_3 = arith.constant 0 : index
    %0 = vector.load %arg1[%c0, %c0_0, %c0_1, %c0_2, %c0_3] : memref<1x2x16x16x8xf32, #tpu.memory_space<vmem>>, vector<1x2x16x16x8xf32>
    %1 = vector.shape_cast %0 : vector<1x2x16x16x8xf32> to vector<2x16x16x8xf32>
    %2 = vector.shape_cast %1 : vector<2x16x16x8xf32> to vector<512x8xf32>
    %c0_4 = arith.constant 0 : index
    %c0_5 = arith.constant 0 : index
    %3 = vector.load %arg2[%c0_4, %c0_5] : memref<8x4xf32, #tpu.memory_space<vmem>>, vector<8x4xf32>
    %cst = arith.constant dense<0.000000e+00> : vector<512x4xf32>
    %4 = tpu.matmul %2, %3, %cst {dimension_numbers = #tpu.dot_dimension_numbers<[1], [0], [0], [1], [0, 0, 1, 1], [], []>} : vector<512x8xf32>, vector<8x4xf32>, vector<512x4xf32> -> vector<512x4xf32>
    %c0_6 = arith.constant 0 : index
    %c0_7 = arith.constant 0 : index
    %5 = vector.load %arg3[%c0_6, %c0_7] : memref<1x4xf32, #tpu.memory_space<vmem>>, vector<1x4xf32>
    %6 = vector.broadcast %5 : vector<1x4xf32> to vector<512x4xf32>
    %7 = arith.addf %4, %6 : vector<512x4xf32>
    %cst_8 = arith.constant 0.000000e+00 : f32
    %8 = vector.broadcast %cst_8 : f32 to vector<512x4xf32>
    %9 = arith.maximumf %7, %8 : vector<512x4xf32>
    %cst_9 = arith.constant 0.000000e+00 : f32
    %10 = vector.broadcast %cst_9 : f32 to vector<2x1x18x4xf32>
    %c0_10 = arith.constant 0 : index
    %c0_11 = arith.constant 0 : index
    %c0_12 = arith.constant 0 : index
    %c0_13 = arith.constant 0 : index
    %11 = vector.load %arg9[%c0_10, %c0_11, %c0_12, %c0_13] : memref<2x18x18x4xf32, #tpu.memory_space<vmem>>, vector<2x1x18x4xf32>
    tpu.vector_store %arg9[%c0_10, %c0_11, %c0_12, %c0_13], %10 {strides = array<i32>} : memref<2x18x18x4xf32, #tpu.memory_space<vmem>>, vector<2x1x18x4xf32>,
    %cst_14 = arith.constant 0.000000e+00 : f32
    %12 = vector.broadcast %cst_14 : f32 to vector<2x1x18x4xf32>
    %c0_15 = arith.constant 0 : index
    %c17 = arith.constant 17 : index
    %c0_16 = arith.constant 0 : index
    %c0_17 = arith.constant 0 : index
    %13 = vector.load %arg9[%c0_15, %c17, %c0_16, %c0_17] : memref<2x18x18x4xf32, #tpu.memory_space<vmem>>, vector<2x1x18x4xf32>
    tpu.vector_store %arg9[%c0_15, %c17, %c0_16, %c0_17], %12 {strides = array<i32>} : memref<2x18x18x4xf32, #tpu.memory_space<vmem>>, vector<2x1x18x4xf32>,
    %cst_18 = arith.constant 0.000000e+00 : f32
    %14 = vector.broadcast %cst_18 : f32 to vector<2x18x1x4xf32>
    %c0_19 = arith.constant 0 : index
    %c0_20 = arith.constant 0 : index
    %c0_21 = arith.constant 0 : index
    %c0_22 = arith.constant 0 : index
    %15 = vector.load %arg9[%c0_19, %c0_20, %c0_21, %c0_22] : memref<2x18x18x4xf32, #tpu.memory_space<vmem>>, vector<2x18x1x4xf32>
    tpu.vector_store %arg9[%c0_19, %c0_20, %c0_21, %c0_22], %14 {strides = array<i32>} : memref<2x18x18x4xf32, #tpu.memory_space<vmem>>, vector<2x18x1x4xf32>,
    %cst_23 = arith.constant 0.000000e+00 : f32
    %16 = vector.broadcast %cst_23 : f32 to vector<2x18x1x4xf32>
    %c0_24 = arith.constant 0 : index
    %c0_25 = arith.constant 0 : index
    %c17_26 = arith.constant 17 : index
    %c0_27 = arith.constant 0 : index
    %17 = vector.load %arg9[%c0_24, %c0_25, %c17_26, %c0_27] : memref<2x18x18x4xf32, #tpu.memory_space<vmem>>, vector<2x18x1x4xf32>
    tpu.vector_store %arg9[%c0_24, %c0_25, %c17_26, %c0_27], %16 {strides = array<i32>} : memref<2x18x18x4xf32, #tpu.memory_space<vmem>>, vector<2x18x1x4xf32>,
    %18 = vector.shape_cast %9 : vector<512x4xf32> to vector<2x16x16x4xf32>
    %c0_28 = arith.constant 0 : index
    %c1 = arith.constant 1 : index
    %c1_29 = arith.constant 1 : index
    %c0_30 = arith.constant 0 : index
    %19 = vector.load %arg9[%c0_28, %c1, %c1_29, %c0_30] : memref<2x18x18x4xf32, #tpu.memory_space<vmem>>, vector<2x16x16x4xf32>
    tpu.vector_store %arg9[%c0_28, %c1, %c1_29, %c0_30], %18 {strides = array<i32>} : memref<2x18x18x4xf32, #tpu.memory_space<vmem>>, vector<2x16x16x4xf32>,
    %c0_31 = arith.constant 0 : index
    %c0_32 = arith.constant 0 : index
    %c0_33 = arith.constant 0 : index
    %c0_34 = arith.constant 0 : index
    %20 = vector.load %arg9[%c0_31, %c0_32, %c0_33, %c0_34] : memref<2x18x18x4xf32, #tpu.memory_space<vmem>>, vector<2x16x16x4xf32>
    %c0_35 = arith.constant 0 : index
    %c0_36 = arith.constant 0 : index
    %21 = vector.load %arg4[%c0_35, %c0_36] : memref<9x4xf32, #tpu.memory_space<vmem>>, vector<1x4xf32>
    %22 = vector.shape_cast %21 : vector<1x4xf32> to vector<4xf32>
    %23 = vector.shape_cast %22 : vector<4xf32> to vector<1x1x1x4xf32>
    %24 = vector.broadcast %23 : vector<1x1x1x4xf32> to vector<2x16x16x4xf32>
    %25 = arith.mulf %20, %24 : vector<2x16x16x4xf32>
    %c0_37 = arith.constant 0 : index
    %c0_38 = arith.constant 0 : index
    %c1_39 = arith.constant 1 : index
    %c0_40 = arith.constant 0 : index
    %26 = vector.load %arg9[%c0_37, %c0_38, %c1_39, %c0_40] : memref<2x18x18x4xf32, #tpu.memory_space<vmem>>, vector<2x16x16x4xf32>
    %c1_41 = arith.constant 1 : index
    %c0_42 = arith.constant 0 : index
    %27 = vector.load %arg4[%c1_41, %c0_42] : memref<9x4xf32, #tpu.memory_space<vmem>>, vector<1x4xf32>
    %28 = vector.shape_cast %27 : vector<1x4xf32> to vector<4xf32>
    %29 = vector.shape_cast %28 : vector<4xf32> to vector<1x1x1x4xf32>
    %30 = vector.broadcast %29 : vector<1x1x1x4xf32> to vector<2x16x16x4xf32>
    %31 = arith.mulf %26, %30 : vector<2x16x16x4xf32>
    %32 = arith.addf %25, %31 : vector<2x16x16x4xf32>
    %c0_43 = arith.constant 0 : index
    %c0_44 = arith.constant 0 : index
    %c2 = arith.constant 2 : index
    %c0_45 = arith.constant 0 : index
    %33 = vector.load %arg9[%c0_43, %c0_44, %c2, %c0_45] : memref<2x18x18x4xf32, #tpu.memory_space<vmem>>, vector<2x16x16x4xf32>
    %c2_46 = arith.constant 2 : index
    %c0_47 = arith.constant 0 : index
    %34 = vector.load %arg4[%c2_46, %c0_47] : memref<9x4xf32, #tpu.memory_space<vmem>>, vector<1x4xf32>
    %35 = vector.shape_cast %34 : vector<1x4xf32> to vector<4xf32>
    %36 = vector.shape_cast %35 : vector<4xf32> to vector<1x1x1x4xf32>
    %37 = vector.broadcast %36 : vector<1x1x1x4xf32> to vector<2x16x16x4xf32>
    %38 = arith.mulf %33, %37 : vector<2x16x16x4xf32>
    %39 = arith.addf %32, %38 : vector<2x16x16x4xf32>
    %c0_48 = arith.constant 0 : index
    %c1_49 = arith.constant 1 : index
    %c0_50 = arith.constant 0 : index
    %c0_51 = arith.constant 0 : index
    %40 = vector.load %arg9[%c0_48, %c1_49, %c0_50, %c0_51] : memref<2x18x18x4xf32, #tpu.memory_space<vmem>>, vector<2x16x16x4xf32>
    %c3 = arith.constant 3 : index
    %c0_52 = arith.constant 0 : index
    %41 = vector.load %arg4[%c3, %c0_52] : memref<9x4xf32, #tpu.memory_space<vmem>>, vector<1x4xf32>
    %42 = vector.shape_cast %41 : vector<1x4xf32> to vector<4xf32>
    %43 = vector.shape_cast %42 : vector<4xf32> to vector<1x1x1x4xf32>
    %44 = vector.broadcast %43 : vector<1x1x1x4xf32> to vector<2x16x16x4xf32>
    %45 = arith.mulf %40, %44 : vector<2x16x16x4xf32>
    %46 = arith.addf %39, %45 : vector<2x16x16x4xf32>
    %c0_53 = arith.constant 0 : index
    %c1_54 = arith.constant 1 : index
    %c1_55 = arith.constant 1 : index
    %c0_56 = arith.constant 0 : index
    %47 = vector.load %arg9[%c0_53, %c1_54, %c1_55, %c0_56] : memref<2x18x18x4xf32, #tpu.memory_space<vmem>>, vector<2x16x16x4xf32>
    %c4 = arith.constant 4 : index
    %c0_57 = arith.constant 0 : index
    %48 = vector.load %arg4[%c4, %c0_57] : memref<9x4xf32, #tpu.memory_space<vmem>>, vector<1x4xf32>
    %49 = vector.shape_cast %48 : vector<1x4xf32> to vector<4xf32>
    %50 = vector.shape_cast %49 : vector<4xf32> to vector<1x1x1x4xf32>
    %51 = vector.broadcast %50 : vector<1x1x1x4xf32> to vector<2x16x16x4xf32>
    %52 = arith.mulf %47, %51 : vector<2x16x16x4xf32>
    %53 = arith.addf %46, %52 : vector<2x16x16x4xf32>
    %c0_58 = arith.constant 0 : index
    %c1_59 = arith.constant 1 : index
    %c2_60 = arith.constant 2 : index
    %c0_61 = arith.constant 0 : index
    %54 = vector.load %arg9[%c0_58, %c1_59, %c2_60, %c0_61] : memref<2x18x18x4xf32, #tpu.memory_space<vmem>>, vector<2x16x16x4xf32>
    %c5 = arith.constant 5 : index
    %c0_62 = arith.constant 0 : index
    %55 = vector.load %arg4[%c5, %c0_62] : memref<9x4xf32, #tpu.memory_space<vmem>>, vector<1x4xf32>
    %56 = vector.shape_cast %55 : vector<1x4xf32> to vector<4xf32>
    %57 = vector.shape_cast %56 : vector<4xf32> to vector<1x1x1x4xf32>
    %58 = vector.broadcast %57 : vector<1x1x1x4xf32> to vector<2x16x16x4xf32>
    %59 = arith.mulf %54, %58 : vector<2x16x16x4xf32>
    %60 = arith.addf %53, %59 : vector<2x16x16x4xf32>
    %c0_63 = arith.constant 0 : index
    %c2_64 = arith.constant 2 : index
    %c0_65 = arith.constant 0 : index
    %c0_66 = arith.constant 0 : index
    %61 = vector.load %arg9[%c0_63, %c2_64, %c0_65, %c0_66] : memref<2x18x18x4xf32, #tpu.memory_space<vmem>>, vector<2x16x16x4xf32>
    %c6 = arith.constant 6 : index
    %c0_67 = arith.constant 0 : index
    %62 = vector.load %arg4[%c6, %c0_67] : memref<9x4xf32, #tpu.memory_space<vmem>>, vector<1x4xf32>
    %63 = vector.shape_cast %62 : vector<1x4xf32> to vector<4xf32>
    %64 = vector.shape_cast %63 : vector<4xf32> to vector<1x1x1x4xf32>
    %65 = vector.broadcast %64 : vector<1x1x1x4xf32> to vector<2x16x16x4xf32>
    %66 = arith.mulf %61, %65 : vector<2x16x16x4xf32>
    %67 = arith.addf %60, %66 : vector<2x16x16x4xf32>
    %c0_68 = arith.constant 0 : index
    %c2_69 = arith.constant 2 : index
    %c1_70 = arith.constant 1 : index
    %c0_71 = arith.constant 0 : index
    %68 = vector.load %arg9[%c0_68, %c2_69, %c1_70, %c0_71] : memref<2x18x18x4xf32, #tpu.memory_space<vmem>>, vector<2x16x16x4xf32>
    %c7 = arith.constant 7 : index
    %c0_72 = arith.constant 0 : index
    %69 = vector.load %arg4[%c7, %c0_72] : memref<9x4xf32, #tpu.memory_space<vmem>>, vector<1x4xf32>
    %70 = vector.shape_cast %69 : vector<1x4xf32> to vector<4xf32>
    %71 = vector.shape_cast %70 : vector<4xf32> to vector<1x1x1x4xf32>
    %72 = vector.broadcast %71 : vector<1x1x1x4xf32> to vector<2x16x16x4xf32>
    %73 = arith.mulf %68, %72 : vector<2x16x16x4xf32>
    %74 = arith.addf %67, %73 : vector<2x16x16x4xf32>
    %c0_73 = arith.constant 0 : index
    %c2_74 = arith.constant 2 : index
    %c2_75 = arith.constant 2 : index
    %c0_76 = arith.constant 0 : index
    %75 = vector.load %arg9[%c0_73, %c2_74, %c2_75, %c0_76] : memref<2x18x18x4xf32, #tpu.memory_space<vmem>>, vector<2x16x16x4xf32>
    %c8 = arith.constant 8 : index
    %c0_77 = arith.constant 0 : index
    %76 = vector.load %arg4[%c8, %c0_77] : memref<9x4xf32, #tpu.memory_space<vmem>>, vector<1x4xf32>
    %77 = vector.shape_cast %76 : vector<1x4xf32> to vector<4xf32>
    %78 = vector.shape_cast %77 : vector<4xf32> to vector<1x1x1x4xf32>
    %79 = vector.broadcast %78 : vector<1x1x1x4xf32> to vector<2x16x16x4xf32>
    %80 = arith.mulf %75, %79 : vector<2x16x16x4xf32>
    %81 = arith.addf %74, %80 : vector<2x16x16x4xf32>
    %c0_78 = arith.constant 0 : index
    %c0_79 = arith.constant 0 : index
    %82 = vector.load %arg5[%c0_78, %c0_79] : memref<1x4xf32, #tpu.memory_space<vmem>>, vector<1x4xf32>
    %83 = vector.shape_cast %82 : vector<1x4xf32> to vector<4xf32>
    %84 = vector.shape_cast %83 : vector<4xf32> to vector<1x1x1x4xf32>
    %85 = vector.broadcast %84 : vector<1x1x1x4xf32> to vector<2x16x16x4xf32>
    %86 = arith.addf %81, %85 : vector<2x16x16x4xf32>
    %87 = vector.shape_cast %86 : vector<2x16x16x4xf32> to vector<512x4xf32>
    %c0_80 = arith.constant 0 : index
    %c0_81 = arith.constant 0 : index
    %88 = vector.load %arg6[%c0_80, %c0_81] : memref<4x4xf32, #tpu.memory_space<vmem>>, vector<4x4xf32>
    %cst_82 = arith.constant dense<0.000000e+00> : vector<512x4xf32>
    %89 = tpu.matmul %87, %88, %cst_82 {dimension_numbers = #tpu.dot_dimension_numbers<[1], [0], [0], [1], [0, 0, 1, 1], [], []>} : vector<512x4xf32>, vector<4x4xf32>, vector<512x4xf32> -> vector<512x4xf32>
    %c0_83 = arith.constant 0 : index
    %c0_84 = arith.constant 0 : index
    %90 = vector.load %arg7[%c0_83, %c0_84] : memref<1x4xf32, #tpu.memory_space<vmem>>, vector<1x4xf32>
    %91 = vector.broadcast %90 : vector<1x4xf32> to vector<512x4xf32>
    %92 = arith.addf %89, %91 : vector<512x4xf32>
    %cst_85 = arith.constant 0.000000e+00 : f32
    %93 = vector.broadcast %cst_85 : f32 to vector<512x4xf32>
    %94 = arith.maximumf %92, %93 : vector<512x4xf32>
    %95 = vector.shape_cast %94 : vector<512x4xf32> to vector<1x512x4xf32>
    %c0_86 = arith.constant 0 : index
    %c0_87 = arith.constant 0 : index
    %c0_88 = arith.constant 0 : index
    %96 = vector.load %arg8[%c0_86, %c0_87, %c0_88] : memref<1x512x4xf32, #tpu.memory_space<vmem>>, vector<1x512x4xf32>
    tpu.vector_store %arg8[%c0_86, %c0_87, %c0_88], %95 {strides = array<i32>} : memref<1x512x4xf32, #tpu.memory_space<vmem>>, vector<1x512x4xf32>,
    return
  }
  func.func @transform_0(%arg0: i32) -> (i32, i32, i32, i32, i32) {
    %c0_i32 = arith.constant 0 : i32
    %c0_i32_0 = arith.constant 0 : i32
    %c0_i32_1 = arith.constant 0 : i32
    %c0_i32_2 = arith.constant 0 : i32
    %c0_i32_3 = arith.constant 0 : i32
    return %arg0, %c0_i32, %c0_i32_0, %c0_i32_1, %c0_i32_2 : i32, i32, i32, i32, i32
  }
  func.func @transform_1(%arg0: i32) -> (i32, i32) {
    %c0_i32 = arith.constant 0 : i32
    %c0_i32_0 = arith.constant 0 : i32
    %c0_i32_1 = arith.constant 0 : i32
    return %c0_i32, %c0_i32_0 : i32, i32
  }
  func.func @transform_2(%arg0: i32) -> (i32, i32) {
    %c0_i32 = arith.constant 0 : i32
    %c0_i32_0 = arith.constant 0 : i32
    %c0_i32_1 = arith.constant 0 : i32
    return %c0_i32, %c0_i32_0 : i32, i32
  }
  func.func @transform_3(%arg0: i32) -> (i32, i32) {
    %c0_i32 = arith.constant 0 : i32
    %c0_i32_0 = arith.constant 0 : i32
    %c0_i32_1 = arith.constant 0 : i32
    return %c0_i32, %c0_i32_0 : i32, i32
  }
  func.func @transform_4(%arg0: i32) -> (i32, i32) {
    %c0_i32 = arith.constant 0 : i32
    %c0_i32_0 = arith.constant 0 : i32
    %c0_i32_1 = arith.constant 0 : i32
    return %c0_i32, %c0_i32_0 : i32, i32
  }
  func.func @transform_5(%arg0: i32) -> (i32, i32) {
    %c0_i32 = arith.constant 0 : i32
    %c0_i32_0 = arith.constant 0 : i32
    %c0_i32_1 = arith.constant 0 : i32
    return %c0_i32, %c0_i32_0 : i32, i32
  }
  func.func @transform_6(%arg0: i32) -> (i32, i32) {
    %c0_i32 = arith.constant 0 : i32
    %c0_i32_0 = arith.constant 0 : i32
    %c0_i32_1 = arith.constant 0 : i32
    return %c0_i32, %c0_i32_0 : i32, i32
  }
  func.func @transform_7(%arg0: i32) -> (i32, i32, i32) {
    %c0_i32 = arith.constant 0 : i32
    %c0_i32_0 = arith.constant 0 : i32
    %c0_i32_1 = arith.constant 0 : i32
    return %arg0, %c0_i32, %c0_i32_0 : i32, i32, i32
  }
}

</mosaic_0001>

<bundles_post_ra>
// kernel: tpu_custom_call.1
= control target key start
LH: loop header
LB: loop body
LE: loop exit
PB: predicated region body
PF: predicated region fallthrough
CT: control target
= control target key end

     0   :  { %vm98_vm0 = vcmask 64512   ;;  %vm740_vm1 = vcmask 31744   ;;  %v3895_v46 = vmov 0.0   ;;  %vm755_vm2 = vcmask 24576   ;;  %s6867_s1 = inlined_call_operand.vmem [shape: f32[8,4], index: 1, kind: input, shape index: {}]   ;;  %s6868_s0 = inlined_call_operand.vmem [shape: f32[1,2,16,16,8], index: 0, kind: input, shape index: {}]   ;;  %s6869_s5 = inlined_call_operand.vmem [shape: f32[4,4], index: 5, kind: input, shape index: {}]   ;;  %s6870_s2 = inlined_call_operand.vmem [shape: f32[1,4], index: 2, kind: input, shape index: {}]   ;;  %s6871_s3 = inlined_call_operand.vmem [shape: f32[9,4], index: 3, kind: input, shape index: {}]   ;;  %s6872_s4 = inlined_call_operand.vmem [shape: f32[1,4], index: 4, kind: input, shape index: {}]   ;;  %s6873_s6 = inlined_call_operand.vmem [shape: f32[1,4], index: 6, kind: input, shape index: {}]   ;;  %s6874_s7 = inlined_call_operand.vmem [shape: f32[1,512,4], index: 7, kind: output, shape index: {}]  }
   0x1   :  { %v90_v0 = vld [vmem:[%s6867_s1] sm:$0xff]  ;;  %v27_v2 = vld [vmem:[%s6868_s0 + $0x8] sm:$0xff]  ;;  %v28_v3 = vld [vmem:[%s6868_s0 + $0x10] sm:$0xff]  ;;  %741 = vst.msk [vmem:[#allocation2] sm:$0xff] %vm740_vm1, %v3895_v46  ;;  %vm743_vm3 = vcmask 25600   ;;  %vm2874_vm4 = vcmask 1043456  }
   0x2   :  { %v26_v1 = vld [vmem:[%s6868_s0] sm:$0xff]  ;;  %3666 = vmatprep.subr.mxu0 %v90_v0  ;;  %v29_v4 = vld [vmem:[%s6868_s0 + $0x18] sm:$0xff]  ;;  %v31_v6 = vld [vmem:[%s6868_s0 + $0x28] sm:$0xff]  ;;  %742 = vst.msk [vmem:[#allocation2 + $0x8] sm:$0xff] %vm740_vm1, %v3895_v46 }
   0x3   :  { %3668 = vmatprep.mubr.msk.f32.mxu0 %vm98_vm0, %v26_v1  ;;  %3667 = vmatpush3.msra.mxu0 %v90_v0  ;;  %v30_v5 = vld [vmem:[%s6868_s0 + $0x20] sm:$0xff]  ;;  %v32_v7 = vld [vmem:[%s6868_s0 + $0x30] sm:$0xff]  ;;  %v33_v8 = vld [vmem:[%s6868_s0 + $0x38] sm:$0xff]  ;;  %745 = vst.msk [vmem:[#allocation2 + $0x1b0] sm:$0xff] %vm740_vm1, %v3895_v46 }
   0x4   :  { %3669 = vmatmul.mubr.msk.f32.vlgmr.msra.gmra.mrb[0].mxu0 %vm98_vm0, %v27_v2  ;;  %v34_v9 = vld [vmem:[%s6868_s0 + $0x40] sm:$0xff]  ;;  %v35_v10 = vld [vmem:[%s6868_s0 + $0x48] sm:$0xff]  ;;  %v36_v11 = vld [vmem:[%s6868_s0 + $0x50] sm:$0xff]  ;;  %746 = vst.msk [vmem:[#allocation2 + $0x1b8] sm:$0xff] %vm740_vm1, %v3895_v46 }
   0x5   :  { %3671 = vmatprep.mubr.msk.f32.mxu0 %vm98_vm0, %v28_v3  ;;  %v37_v12 = vld [vmem:[%s6868_s0 + $0x58] sm:$0xff]  ;;  %v38_v13 = vld [vmem:[%s6868_s0 + $0x60] sm:$0xff]  ;;  %v39_v14 = vld [vmem:[%s6868_s0 + $0x68] sm:$0xff]  ;;  %749 = vst.msk [vmem:[#allocation2 + $0x198] sm:$0xff] %vm740_vm1, %v3895_v46 }
   0x6   :  { %v40_v15 = vld [vmem:[%s6868_s0 + $0x70] sm:$0xff]  ;;  %v41_v16 = vld [vmem:[%s6868_s0 + $0x78] sm:$0xff]  ;;  %v42_v17 = vld [vmem:[%s6868_s0 + $0x80] sm:$0xff]  ;;  %750 = vst.msk [vmem:[#allocation2 + $0x1a0] sm:$0xff] %vm740_vm1, %v3895_v46 }
   0x7   :  { %v43_v18 = vld [vmem:[%s6868_s0 + $0x88] sm:$0xff]  ;;  %v44_v19 = vld [vmem:[%s6868_s0 + $0x90] sm:$0xff]  ;;  %v45_v20 = vld [vmem:[%s6868_s0 + $0x98] sm:$0xff]  ;;  %752 = vst.msk [vmem:[#allocation2 + $0x348] sm:$0xff] %vm740_vm1, %v3895_v46 }
   0x8   :  { %3672 = vmatmul.mubr.msk.f32.gmra.mrb[2].mxu0 %vm98_vm0, %v29_v4  ;;  %v46_v21 = vld [vmem:[%s6868_s0 + $0xa0] sm:$0xff]  ;;  %v47_v22 = vld [vmem:[%s6868_s0 + $0xa8] sm:$0xff]  ;;  %v48_v23 = vld [vmem:[%s6868_s0 + $0xb0] sm:$0xff]  ;;  %753 = vst.msk [vmem:[#allocation2 + $0x350] sm:$0xff] %vm740_vm1, %v3895_v46 }
   0x9   :  { %3674 = vmatprep.mubr.msk.f32.mxu0 %vm98_vm0, %v30_v5  ;;  %v49_v24 = vld [vmem:[%s6868_s0 + $0xb8] sm:$0xff]  ;;  %v50_v25 = vld [vmem:[%s6868_s0 + $0xc0] sm:$0xff]  ;;  %v51_v26 = vld [vmem:[%s6868_s0 + $0xc8] sm:$0xff]  ;;  %756 = vst.msk [vmem:[#allocation2] sm:$0x1] %vm755_vm2, %v3895_v46 }
   0xa   :  { %v52_v27 = vld [vmem:[%s6868_s0 + $0xd0] sm:$0xff]  ;;  %v53_v28 = vld [vmem:[%s6868_s0 + $0xd8] sm:$0xff]  ;;  %v54_v29 = vld [vmem:[%s6868_s0 + $0xe0] sm:$0xff]  ;;  %757 = vst.msk [vmem:[#allocation2 + $0x18] sm:$0x1] %vm755_vm2, %v3895_v46 }
   0xb   :  { %v55_v30 = vld [vmem:[%s6868_s0 + $0xe8] sm:$0xff]  ;;  %v56_v31 = vld [vmem:[%s6868_s0 + $0xf0] sm:$0xff]  ;;  %v57_v32 = vld [vmem:[%s6868_s0 + $0xf8] sm:$0xff]  ;;  %758 = vst.msk [vmem:[#allocation2 + $0x30] sm:$0x1] %vm755_vm2, %v3895_v46 }
   0xc   :  { %3675 = vmatmul.mubr.msk.f32.gmra.mrb[4].mxu0 %vm98_vm0, %v31_v6  ;;  %v58_v33 = vld [vmem:[%s6868_s0 + $0x100] sm:$0xff]  ;;  %v59_v34 = vld [vmem:[%s6868_s0 + $0x108] sm:$0xff]  ;;  %v60_v35 = vld [vmem:[%s6868_s0 + $0x110] sm:$0xff]  ;;  %759 = vst.msk [vmem:[#allocation2 + $0x48] sm:$0x1] %vm755_vm2, %v3895_v46 }
   0xd   :  { %3677 = vmatprep.mubr.msk.f32.mxu0 %vm98_vm0, %v32_v7  ;;  %v61_v36 = vld [vmem:[%s6868_s0 + $0x118] sm:$0xff]  ;;  %v62_v37 = vld [vmem:[%s6868_s0 + $0x120] sm:$0xff]  ;;  %v63_v38 = vld [vmem:[%s6868_s0 + $0x128] sm:$0xff]  ;;  %760 = vst.msk [vmem:[#allocation2 + $0x60] sm:$0x1] %vm755_vm2, %v3895_v46 }
   0xe   :  { %v64_v39 = vld [vmem:[%s6868_s0 + $0x130] sm:$0xff]  ;;  %v65_v40 = vld [vmem:[%s6868_s0 + $0x138] sm:$0xff]  ;;  %v66_v41 = vld [vmem:[%s6868_s0 + $0x140] sm:$0xff]  ;;  %761 = vst.msk [vmem:[#allocation2 + $0x78] sm:$0x1] %vm755_vm2, %v3895_v46 }
   0xf   :  { %v67_v42 = vld [vmem:[%s6868_s0 + $0x148] sm:$0xff]  ;;  %v68_v43 = vld [vmem:[%s6868_s0 + $0x150] sm:$0xff]  ;;  %v69_v44 = vld [vmem:[%s6868_s0 + $0x158] sm:$0xff]  ;;  %762 = vst.msk [vmem:[#allocation2 + $0x90] sm:$0x1] %vm755_vm2, %v3895_v46 }
  0x10   :  { %3678 = vmatmul.mubr.msk.f32.gmra.mrb[6].mxu0 %vm98_vm0, %v33_v8  ;;  %v70_v45 = vld [vmem:[%s6868_s0 + $0x160] sm:$0xff]  ;;  %v4138_v47 = vld [vmem:[%s6868_s0 + $0x168] sm:$0xff]  ;;  %763 = vst.msk [vmem:[#allocation2 + $0xa8] sm:$0x1] %vm755_vm2, %v3895_v46  ;;  %764 = vst.msk [vmem:[#allocation2 + $0xc0] sm:$0x1] %vm755_vm2, %v3895_v46 }
  0x11   :  { %3680 = vmatprep.mubr.msk.f32.mxu0 %vm98_vm0, %v34_v9  ;;  %765 = vst.msk [vmem:[#allocation2 + $0xd8] sm:$0x1] %vm755_vm2, %v3895_v46  ;;  %766 = vst.msk [vmem:[#allocation2 + $0xf0] sm:$0x1] %vm755_vm2, %v3895_v46  ;;  %v72_v48 = vld [vmem:[%s6868_s0 + $0x170] sm:$0xff]  ;;  %v73_v49 = vld [vmem:[%s6868_s0 + $0x178] sm:$0xff] }
  0x12   :  { %767 = vst.msk [vmem:[#allocation2 + $0x108] sm:$0x1] %vm755_vm2, %v3895_v46  ;;  %768 = vst.msk [vmem:[#allocation2 + $0x120] sm:$0x1] %vm755_vm2, %v3895_v46  ;;  %v74_v50 = vld [vmem:[%s6868_s0 + $0x180] sm:$0xff]  ;;  %v75_v51 = vld [vmem:[%s6868_s0 + $0x188] sm:$0xff] }
  0x13   :  { %769 = vst.msk [vmem:[#allocation2 + $0x138] sm:$0x1] %vm755_vm2, %v3895_v46  ;;  %770 = vst.msk [vmem:[#allocation2 + $0x150] sm:$0x1] %vm755_vm2, %v3895_v46  ;;  %v76_v52 = vld [vmem:[%s6868_s0 + $0x190] sm:$0xff]  ;;  %v77_v53 = vld [vmem:[%s6868_s0 + $0x198] sm:$0xff] }
  0x14   :  { %3681 = vmatmul.mubr.msk.f32.gmra.mrb[8].mxu0 %vm98_vm0, %v35_v10  ;;  %771 = vst.msk [vmem:[#allocation2 + $0x168] sm:$0x1] %vm755_vm2, %v3895_v46  ;;  %772 = vst.msk [vmem:[#allocation2 + $0x180] sm:$0x1] %vm755_vm2, %v3895_v46  ;;  %v78_v54 = vld [vmem:[%s6868_s0 + $0x1a0] sm:$0xff]  ;;  %v79_v55 = vld [vmem:[%s6868_s0 + $0x1a8] sm:$0xff] }
  0x15   :  { %3683 = vmatprep.mubr.msk.f32.mxu0 %vm98_vm0, %v36_v11  ;;  %775 = vst.msk [vmem:[#allocation2 + $0x1c8] sm:$0x1] %vm755_vm2, %v3895_v46  ;;  %776 = vst.msk [vmem:[#allocation2 + $0x1e0] sm:$0x1] %vm755_vm2, %v3895_v46  ;;  %v80_v56 = vld [vmem:[%s6868_s0 + $0x1b0] sm:$0xff]  ;;  %v81_v57 = vld [vmem:[%s6868_s0 + $0x1b8] sm:$0xff] }
  0x16   :  { %777 = vst.msk [vmem:[#allocation2 + $0x1f8] sm:$0x1] %vm755_vm2, %v3895_v46  ;;  %778 = vst.msk [vmem:[#allocation2 + $0x210] sm:$0x1] %vm755_vm2, %v3895_v46  ;;  %v82_v58 = vld [vmem:[%s6868_s0 + $0x1c0] sm:$0xff]  ;;  %v83_v59 = vld [vmem:[%s6868_s0 + $0x1c8] sm:$0xff] }
  0x17   :  { %779 = vst.msk [vmem:[#allocation2 + $0x228] sm:$0x1] %vm755_vm2, %v3895_v46  ;;  %780 = vst.msk [vmem:[#allocation2 + $0x240] sm:$0x1] %vm755_vm2, %v3895_v46  ;;  %v84_v60 = vld [vmem:[%s6868_s0 + $0x1d0] sm:$0xff]  ;;  %v85_v62 = vld [vmem:[%s6868_s0 + $0x1d8] sm:$0xff] }
  0x18   :  { %3684 = vmatmul.mubr.msk.f32.gmra.mrb[10].mxu0 %vm98_vm0, %v37_v12  ;;  %781 = vst.msk [vmem:[#allocation2 + $0x258] sm:$0x1] %vm755_vm2, %v3895_v46  ;;  %782 = vst.msk [vmem:[#allocation2 + $0x270] sm:$0x1] %vm755_vm2, %v3895_v46  ;;  %v2674_v61 = vld [vmem:[%s6869_s5] sm:$0xf] }
  0x19   :  { %3686 = vmatprep.mubr.msk.f32.mxu0 %vm98_vm0, %v38_v13  ;;  %783 = vst.msk [vmem:[#allocation2 + $0x288] sm:$0x1] %vm755_vm2, %v3895_v46  ;;  %784 = vst.msk [vmem:[#allocation2 + $0x2a0] sm:$0x1] %vm755_vm2, %v3895_v46  ;;  %3764 = vmatprep.subr.msk.mxu1 %vm2874_vm4, %v2674_v61  ;;  %v86_v63 = vld [vmem:[%s6868_s0 + $0x1e0] sm:$0xff]  ;;  %v87_v0 = vld [vmem:[%s6868_s0 + $0x1e8] sm:$0xff] }
  0x1a   :  { %785 = vst.msk [vmem:[#allocation2 + $0x2b8] sm:$0x1] %vm755_vm2, %v3895_v46  ;;  %786 = vst.msk [vmem:[#allocation2 + $0x2d0] sm:$0x1] %vm755_vm2, %v3895_v46  ;;  %3765 = vmatpush3.msk.msra.mxu1 %vm2874_vm4, %v2674_v61  ;;  %v88_v1 = vld [vmem:[%s6868_s0 + $0x1f0] sm:$0xff]  ;;  %v89_v2 = vld [vmem:[%s6868_s0 + $0x1f8] sm:$0xff] }
  0x1b   :  { %787 = vst.msk [vmem:[#allocation2 + $0x2e8] sm:$0x1] %vm755_vm2, %v3895_v46  ;;  %788 = vst.msk [vmem:[#allocation2 + $0x300] sm:$0x1] %vm755_vm2, %v3895_v46  ;;  %v4368_v3 = vld [vmem:[%s6870_s2] ss:$0 sm:$0xff] }
  0x1c   :  { %3687 = vmatmul.mubr.msk.f32.gmra.mrb[12].mxu0 %vm98_vm0, %v39_v14  ;;  %789 = vst.msk [vmem:[#allocation2 + $0x318] sm:$0x1] %vm755_vm2, %v3895_v46  ;;  %790 = vst.msk [vmem:[#allocation2 + $0x330] sm:$0x1] %vm755_vm2, %v3895_v46  ;;  %v893_v5 = vld [vmem:[#allocation2] sm:$0xff]  ;;  %v894_v11 = vld [vmem:[#allocation2 + $0x8] sm:$0xff] }
  0x1d   :  { %3689 = vmatprep.mubr.msk.f32.mxu0 %vm98_vm0, %v40_v15  ;;  %793 = vst.msk [vmem:[#allocation2 + $0x29] sm:$0x1] %vm755_vm2, %v3895_v46  ;;  %794 = vst.msk [vmem:[#allocation2 + $0x41] sm:$0x1] %vm755_vm2, %v3895_v46  ;;  %v4373_v6 = vld [vmem:[%s6871_s3] ss:$0 sm:$0xff] }
  0x1e   :  { %795 = vst.msk [vmem:[#allocation2 + $0x59] sm:$0x1] %vm755_vm2, %v3895_v46  ;;  %796 = vst.msk [vmem:[#allocation2 + $0x71] sm:$0x1] %vm755_vm2, %v3895_v46  ;;  %v1026_v7 = vld [vmem:[#allocation2 + $0x1] sm:$0xff]  ;;  %v962_v15 = vmul.f32 %v4373_v6, %v893_v5 }
  0x1f   :  { %797 = vst.msk [vmem:[#allocation2 + $0x89] sm:$0x1] %vm755_vm2, %v3895_v46  ;;  %798 = vst.msk [vmem:[#allocation2 + $0xa1] sm:$0x1] %vm755_vm2, %v3895_v46  ;;  %v4379_v10 = vld [vmem:[%s6871_s3 + $0x1] ss:$0 sm:$0xff] }
  0x20   :  { %3690 = vmatmul.mubr.msk.f32.gmra.mrb[14].mxu0 %vm98_vm0, %v41_v16  ;;  %799 = vst.msk [vmem:[#allocation2 + $0xb9] sm:$0x1] %vm755_vm2, %v3895_v46  ;;  %800 = vst.msk [vmem:[#allocation2 + $0xd1] sm:$0x1] %vm755_vm2, %v3895_v46 }
  0x21   :  { %3692 = vmatprep.mubr.msk.f32.mxu0 %vm98_vm0, %v42_v17  ;;  %801 = vst.msk [vmem:[#allocation2 + $0xe9] sm:$0x1] %vm755_vm2, %v3895_v46  ;;  %802 = vst.msk [vmem:[#allocation2 + $0x101] sm:$0x1] %vm755_vm2, %v3895_v46 }
  0x22   :  { %803 = vst.msk [vmem:[#allocation2 + $0x119] sm:$0x1] %vm755_vm2, %v3895_v46  ;;  %804 = vst.msk [vmem:[#allocation2 + $0x131] sm:$0x1] %vm755_vm2, %v3895_v46 }
  0x23   :  { %805 = vst.msk [vmem:[#allocation2 + $0x149] sm:$0x1] %vm755_vm2, %v3895_v46  ;;  %806 = vst.msk [vmem:[#allocation2 + $0x161] sm:$0x1] %vm755_vm2, %v3895_v46 }
  0x24   :  { %3693 = vmatmul.mubr.msk.f32.gmra.mrb[16].mxu0 %vm98_vm0, %v43_v18  ;;  %807 = vst.msk [vmem:[#allocation2 + $0x179] sm:$0x1] %vm755_vm2, %v3895_v46  ;;  %808 = vst.msk [vmem:[#allocation2 + $0x191] sm:$0x1] %vm755_vm2, %v3895_v46  ;;  %v1095_v18 = vmul.f32 %v4379_v10, %v1026_v7 }
  0x25   :  { %3695 = vmatprep.mubr.msk.f32.mxu0 %vm98_vm0, %v44_v19  ;;  %811 = vst.msk [vmem:[#allocation2 + $0x1d9] sm:$0x1] %vm755_vm2, %v3895_v46  ;;  %812 = vst.msk [vmem:[#allocation2 + $0x1f1] sm:$0x1] %vm755_vm2, %v3895_v46  ;;  %v1223_v19 = vld [vmem:[#allocation2 + $0x2] sm:$0xff] }
  0x26   :  { %813 = vst.msk [vmem:[#allocation2 + $0x209] sm:$0x1] %vm755_vm2, %v3895_v46  ;;  %814 = vst.msk [vmem:[#allocation2 + $0x221] sm:$0x1] %vm755_vm2, %v3895_v46 }
  0x27   :  { %815 = vst.msk [vmem:[#allocation2 + $0x239] sm:$0x1] %vm755_vm2, %v3895_v46  ;;  %816 = vst.msk [vmem:[#allocation2 + $0x251] sm:$0x1] %vm755_vm2, %v3895_v46 }
  0x28   :  { %3696 = vmatmul.mubr.msk.f32.gmra.mrb[18].mxu0 %vm98_vm0, %v45_v20  ;;  %817 = vst.msk [vmem:[#allocation2 + $0x269] sm:$0x1] %vm755_vm2, %v3895_v46  ;;  %818 = vst.msk [vmem:[#allocation2 + $0x281] sm:$0x1] %vm755_vm2, %v3895_v46  ;;  %v4387_v20 = vld [vmem:[%s6871_s3 + $0x2] ss:$0 sm:$0xff] }
  0x29   :  { %3698 = vmatprep.mubr.msk.f32.mxu0 %vm98_vm0, %v46_v21  ;;  %819 = vst.msk [vmem:[#allocation2 + $0x299] sm:$0x1] %vm755_vm2, %v3895_v46  ;;  %820 = vst.msk [vmem:[#allocation2 + $0x2b1] sm:$0x1] %vm755_vm2, %v3895_v46  ;;  %v963_v21 = vmul.f32 %v4373_v6, %v894_v11 }
  0x2a   :  { %821 = vst.msk [vmem:[#allocation2 + $0x2c9] sm:$0x1] %vm755_vm2, %v3895_v46  ;;  %822 = vst.msk [vmem:[#allocation2 + $0x2e1] sm:$0x1] %vm755_vm2, %v3895_v46 }
  0x2b   :  { %823 = vst.msk [vmem:[#allocation2 + $0x2f9] sm:$0x1] %vm755_vm2, %v3895_v46  ;;  %824 = vst.msk [vmem:[#allocation2 + $0x311] sm:$0x1] %vm755_vm2, %v3895_v46 }
  0x2c   :  { %3699 = vmatmul.mubr.msk.f32.gmra.mrb[20].mxu0 %vm98_vm0, %v47_v22  ;;  %825 = vst.msk [vmem:[#allocation2 + $0x329] sm:$0x1] %vm755_vm2, %v3895_v46  ;;  %826 = vst.msk [vmem:[#allocation2 + $0x341] sm:$0x1] %vm755_vm2, %v3895_v46 }
  0x2d   :  { %3701 = vmatprep.mubr.msk.f32.mxu0 %vm98_vm0, %v48_v23  ;;  %773 = vst.msk [vmem:[#allocation2 + $0x198] sm:$0x1] %vm755_vm2, %v3895_v46  ;;  %774 = vst.msk [vmem:[#allocation2 + $0x1b0] sm:$0x1] %vm755_vm2, %v3895_v46 }
  0x2e   :  { %791 = vst.msk [vmem:[#allocation2 + $0x348] sm:$0x1] %vm755_vm2, %v3895_v46 }
  0x2f   :  { %744 = vst.msk [vmem:[#allocation2 + $0x10] sm:$0x3] %vm743_vm3, %v3895_v46  ;;  %747 = vst.msk [vmem:[#allocation2 + $0x1c0] sm:$0x3] %vm743_vm3, %v3895_v46 }
  0x30   :  { %3702 = vmatmul.mubr.msk.f32.gmra.mrb[22].mxu0 %vm98_vm0, %v49_v24  ;;  %751 = vst.msk [vmem:[#allocation2 + $0x1a8] sm:$0x3] %vm743_vm3, %v3895_v46  ;;  %754 = vst.msk [vmem:[#allocation2 + $0x358] sm:$0x3] %vm743_vm3, %v3895_v46 }
  0x31   :  { %3704 = vmatprep.mubr.msk.f32.mxu0 %vm98_vm0, %v50_v25  ;;  %792 = vst.msk [vmem:[#allocation2 + $0x11] sm:$0x1] %vm755_vm2, %v3895_v46  ;;  %809 = vst.msk [vmem:[#allocation2 + $0x1a9] sm:$0x1] %vm755_vm2, %v3895_v46 }
  0x32   :  { %810 = vst.msk [vmem:[#allocation2 + $0x1c1] sm:$0x1] %vm755_vm2, %v3895_v46  ;;  %827 = vst.msk [vmem:[#allocation2 + $0x359] sm:$0x1] %vm755_vm2, %v3895_v46 }
  0x34   :  { %3705 = vmatmul.mubr.msk.f32.gmra.mrb[24].mxu0 %vm98_vm0, %v51_v26 }
  0x35   :  { %3707 = vmatprep.mubr.msk.f32.mxu0 %vm98_vm0, %v52_v27 }
  0x36   :  { %v1027_v12 = vld [vmem:[#allocation2 + $0x9] sm:$0xff] }
  0x37   :  { %v1096_v22 = vmul.f32 %v4379_v10, %v1027_v12 }
  0x38   :  { %3708 = vmatmul.mubr.msk.f32.gmra.mrb[26].mxu0 %vm98_vm0, %v53_v28  ;;  %v1224_v25 = vld [vmem:[#allocation2 + $0xa] sm:$0xff]  ;;  %v1292_v28 = vmul.f32 %v4387_v20, %v1223_v19 }
  0x39   :  { %3710 = vmatprep.mubr.msk.f32.mxu0 %vm98_vm0, %v54_v29 }
  0x3c   :  { %3711 = vmatmul.mubr.msk.f32.gmra.mrb[28].mxu0 %vm98_vm0, %v55_v30 }
  0x3d   :  { %3713 = vmatprep.mubr.msk.f32.mxu0 %vm98_vm0, %v56_v31  ;;  %v1159_v31 = vadd.f32 %v1095_v18, %v962_v15 }
  0x40   :  { %3714 = vmatmul.mubr.msk.f32.gmra.mrb[30].mxu0 %vm98_vm0, %v57_v32  ;;  %v1160_v32 = vadd.f32 %v1096_v22, %v963_v21 }
  0x41   :  { %3716 = vmatprep.mubr.msk.f32.mxu0 %vm98_vm0, %v58_v33  ;;  %v1293_v33 = vmul.f32 %v4387_v20, %v1224_v25 }
  0x44   :  { %3717 = vmatmul.mubr.msk.f32.gmra.mrb[32].mxu0 %vm98_vm0, %v59_v34 }
  0x45   :  { %3719 = vmatprep.mubr.msk.f32.mxu0 %vm98_vm0, %v60_v35 }
  0x48   :  { %3720 = vmatmul.mubr.msk.f32.gmra.mrb[34].mxu0 %vm98_vm0, %v61_v36 }
  0x49   :  { %3722 = vmatprep.mubr.msk.f32.mxu0 %vm98_vm0, %v62_v37  ;;  %v4404_v37 = vld [vmem:[%s6871_s3 + $0x4] ss:$0 sm:$0xff] }
  0x4c   :  { %3723 = vmatmul.mubr.msk.f32.gmra.mrb[36].mxu0 %vm98_vm0, %v63_v38  ;;  %v4409_v38 = vld [vmem:[%s6871_s3 + $0x5] ss:$0 sm:$0xff] }
  0x4d   :  { %3725 = vmatprep.mubr.msk.f32.mxu0 %vm98_vm0, %v64_v39 }
  0x50   :  { %3726 = vmatmul.mubr.msk.f32.gmra.mrb[38].mxu0 %vm98_vm0, %v65_v40  ;;  %v4414_v40 = vld [vmem:[%s6871_s3 + $0x3] ss:$0 sm:$0xff] }
  0x51   :  { %3728 = vmatprep.mubr.msk.f32.mxu0 %vm98_vm0, %v66_v41 }
  0x54   :  { %3729 = vmatmul.mubr.msk.f32.gmra.mrb[40].mxu0 %vm98_vm0, %v67_v42 }
  0x55   :  { %3731 = vmatprep.mubr.msk.f32.mxu0 %vm98_vm0, %v68_v43  ;;  %v1356_v43 = vadd.f32 %v1292_v28, %v1159_v31 }
  0x58   :  { %3732 = vmatmul.mubr.msk.f32.gmra.mrb[42].mxu0 %vm98_vm0, %v69_v44  ;;  %v1357_v44 = vadd.f32 %v1293_v33, %v1160_v32 }
  0x59   :  { %3734 = vmatprep.mubr.msk.f32.mxu0 %vm98_vm0, %v70_v45 }
  0x5c   :  { %3735 = vmatmul.mubr.msk.f32.gmra.mrb[44].mxu0 %vm98_vm0, %v4138_v47 }
  0x5d   :  { %3737 = vmatprep.mubr.msk.f32.mxu0 %vm98_vm0, %v72_v48 }
  0x60   :  { %3738 = vmatmul.mubr.msk.f32.gmra.mrb[46].mxu0 %vm98_vm0, %v73_v49 }
  0x61   :  { %3740 = vmatprep.mubr.msk.f32.mxu0 %vm98_vm0, %v74_v50 }
  0x64   :  { %3741 = vmatmul.mubr.msk.f32.gmra.mrb[48].mxu0 %vm98_vm0, %v75_v51 }
  0x65   :  { %3743 = vmatprep.mubr.msk.f32.mxu0 %vm98_vm0, %v76_v52 }
  0x68   :  { %3744 = vmatmul.mubr.msk.f32.gmra.mrb[50].mxu0 %vm98_vm0, %v77_v53 }
  0x69   :  { %3746 = vmatprep.mubr.msk.f32.mxu0 %vm98_vm0, %v78_v54 }
  0x6c   :  { %3747 = vmatmul.mubr.msk.f32.gmra.mrb[52].mxu0 %vm98_vm0, %v79_v55 }
  0x6d   :  { %3749 = vmatprep.mubr.msk.f32.mxu0 %vm98_vm0, %v80_v56 }
  0x70   :  { %3750 = vmatmul.mubr.msk.f32.gmra.mrb[54].mxu0 %vm98_vm0, %v81_v57 }
  0x71   :  { %3752 = vmatprep.mubr.msk.f32.mxu0 %vm98_vm0, %v82_v58 }
  0x74   :  { %3753 = vmatmul.mubr.msk.f32.gmra.mrb[56].mxu0 %vm98_vm0, %v83_v59  ;;  %v4434_v59 = vld [vmem:[%s6871_s3 + $0x7] ss:$0 sm:$0xff] }
  0x75   :  { %3755 = vmatprep.mubr.msk.f32.mxu0 %vm98_vm0, %v84_v60  ;;  %v4439_v60 = vld [vmem:[%s6871_s3 + $0x8] ss:$0 sm:$0xff] }
  0x78   :  { %3756 = vmatmul.mubr.msk.f32.gmra.mrb[58].mxu0 %vm98_vm0, %v85_v62 }
  0x79   :  { %3758 = vmatprep.mubr.msk.f32.mxu0 %vm98_vm0, %v86_v63  ;;  %v4444_v63 = vld [vmem:[%s6871_s3 + $0x6] ss:$0 sm:$0xff] }
  0x7c   :  { %3759 = vmatmul.mubr.msk.f32.gmra.mrb[60].mxu0 %vm98_vm0, %v87_v0 }
  0x7d   :  { %3761 = vmatprep.mubr.msk.f32.mxu0 %vm98_vm0, %v88_v1 }
  0x80   :  { %3762 = vmatmul.mubr.msk.f32.gmra.mrb[62].mxu0 %vm98_vm0, %v89_v2 }
  0xd7   :  { %v3670_v4 = vpop.f32.mrb[0].mxu0 }
  0xd8   :  { %v363_v8 = vadd.f32 %v3670_v4, %v4368_v3  ;;  %v357_v9 = vpop.f32.mrb[1].mxu0 }
  0xd9   :  { %v358_v13 = vadd.f32 %v4368_v3, %v357_v9 }
  0xda   :  { %v677_v14 = vmax.f32 %v363_v8, 0.0 }
  0xdb   :  { %v676_v16 = vmax.f32 %v358_v13, 0.0  ;;  %v3673_v17 = vpop.f32.mrb[2].mxu0 }
  0xdc   :  { %830 = vst.msk [vmem:[#allocation2 + $0x21] sm:$0xff] %vm740_vm1, %v677_v14  ;;  %v373_v23 = vadd.f32 %v3673_v17, %v4368_v3  ;;  %v367_v24 = vpop.f32.mrb[3].mxu0 }
  0xdd   :  { %829 = vst.msk [vmem:[#allocation2 + $0x19] sm:$0xff] %vm740_vm1, %v676_v16  ;;  %v368_v26 = vadd.f32 %v4368_v3, %v367_v24 }
  0xde   :  { %v679_v27 = vmax.f32 %v373_v23, 0.0 }
  0xdf   :  { %v678_v29 = vmax.f32 %v368_v26, 0.0  ;;  %v3676_v30 = vpop.f32.mrb[4].mxu0 }
  0xe0   :  { %832 = vst.msk [vmem:[#allocation2 + $0x39] sm:$0xff] %vm740_vm1, %v679_v27  ;;  %v383_v34 = vadd.f32 %v3676_v30, %v4368_v3  ;;  %v377_v35 = vpop.f32.mrb[5].mxu0 }
  0xe1   :  { %831 = vst.msk [vmem:[#allocation2 + $0x31] sm:$0xff] %vm740_vm1, %v678_v29  ;;  %v378_v36 = vadd.f32 %v4368_v3, %v377_v35 }
  0xe2   :  { %v681_v39 = vmax.f32 %v383_v34, 0.0 }
  0xe3   :  { %v680_v41 = vmax.f32 %v378_v36, 0.0  ;;  %v3679_v42 = vpop.f32.mrb[6].mxu0  ;;  %v1618_v45 = vld [vmem:[#allocation2 + $0x21] sm:$0xff] }
  0xe4   :  { %v4416_v46 = vld [vmem:[#allocation2 + $0x22] sm:$0xff]  ;;  %834 = vst.msk [vmem:[#allocation2 + $0x51] sm:$0xff] %vm740_vm1, %v681_v39  ;;  %v393_v47 = vadd.f32 %v3679_v42, %v4368_v3  ;;  %v387_v48 = vpop.f32.mrb[7].mxu0  ;;  %v1420_v49 = vld [vmem:[#allocation2 + $0x18] sm:$0xff]  ;;  %v1687_v52 = vmul.f32 %v4404_v37, %v1618_v45  ;;  %v4424_v54 = vmul.f32 %v4379_v10, %v1618_v45 }
  0xe5   :  { %v1617_v50 = vld [vmem:[#allocation2 + $0x19] sm:$0xff]  ;;  %v1884_v53 = vmul.f32 %v4409_v38, %v4416_v46  ;;  %833 = vst.msk [vmem:[#allocation2 + $0x49] sm:$0xff] %vm740_vm1, %v680_v41  ;;  %v388_v55 = vadd.f32 %v4368_v3, %v387_v48  ;;  %v1489_v56 = vmul.f32 %v4414_v40, %v1420_v49  ;;  %v964_v1 = vmul.f32 %v4373_v6, %v1420_v49 }
  0xe6   :  { %v1814_v51 = vld [vmem:[#allocation2 + $0x1a] sm:$0xff]  ;;  %v1686_v57 = vmul.f32 %v4404_v37, %v1617_v50  ;;  %v683_v62 = vmax.f32 %v393_v47, 0.0  ;;  %v1097_v2 = vmul.f32 %v4379_v10, %v1617_v50 }
  0xe7   :  { %v1883_v58 = vmul.f32 %v4409_v38, %v1814_v51  ;;  %v1421_v61 = vld [vmem:[#allocation2 + $0x20] sm:$0xff]  ;;  %v682_v4 = vmax.f32 %v388_v55, 0.0  ;;  %v3682_v5 = vpop.f32.mrb[8].mxu0  ;;  %v1553_v7 = vadd.f32 %v1489_v56, %v1356_v43  ;;  %v1294_v11 = vmul.f32 %v4387_v20, %v1814_v51 }
  0xe8   :  { %v1490_v0 = vmul.f32 %v4414_v40, %v1421_v61  ;;  %v4449_v8 = vld [vmem:[#allocation2 + $0x39] sm:$0xff]  ;;  %v965_v12 = vmul.f32 %v4373_v6, %v1421_v61  ;;  %836 = vst.msk [vmem:[#allocation2 + $0x69] sm:$0xff] %vm740_vm1, %v683_v62  ;;  %v403_v13 = vadd.f32 %v3682_v5, %v4368_v3  ;;  %v397_v14 = vpop.f32.mrb[9].mxu0  ;;  %v4457_v15 = vld [vmem:[#allocation2 + $0x30] sm:$0xff]  ;;  %v1161_v34 = vadd.f32 %v1097_v2, %v964_v1 }
  0xe9   :  { %v4451_v9 = vld [vmem:[#allocation2 + $0x3a] sm:$0xff]  ;;  %v4459_v16 = vld [vmem:[#allocation2 + $0x31] sm:$0xff]  ;;  %v2279_v19 = vmul.f32 %v4434_v59, %v4449_v8  ;;  %835 = vst.msk [vmem:[#allocation2 + $0x61] sm:$0xff] %vm740_vm1, %v682_v4  ;;  %v398_v22 = vadd.f32 %v4368_v3, %v397_v14  ;;  %v1750_v23 = vadd.f32 %v1686_v57, %v1553_v7  ;;  %v2081_v24 = vmul.f32 %v4444_v63, %v4457_v15 }
  0xea   :  { %v4461_v17 = vld [vmem:[#allocation2 + $0x32] sm:$0xff]  ;;  %v1554_v18 = vadd.f32 %v1490_v0, %v1357_v44  ;;  %v2476_v21 = vmul.f32 %v4439_v60, %v4451_v9  ;;  %v2278_v25 = vmul.f32 %v4434_v59, %v4459_v16  ;;  %v685_v27 = vmax.f32 %v403_v13, 0.0  ;;  %v4509_v4 = vld [vmem:[%s6872_s4] ss:$0 sm:$0xff] }
  0xeb   :  { %v4473_v26 = vld [vmem:[#allocation2 + $0x38] sm:$0xff]  ;;  %v2475_v28 = vmul.f32 %v4439_v60, %v4461_v17  ;;  %v684_v31 = vmax.f32 %v398_v22, 0.0  ;;  %v3685_v32 = vpop.f32.mrb[10].mxu0  ;;  %v1947_v33 = vadd.f32 %v1883_v58, %v1750_v23  ;;  %v1491_v35 = vmul.f32 %v4414_v40, %v4457_v15 }
  0xec   :  { %v1751_v29 = vadd.f32 %v1687_v52, %v1554_v18  ;;  %v2082_v30 = vmul.f32 %v4444_v63, %v4473_v26  ;;  %838 = vst.msk [vmem:[#allocation2 + $0x81] sm:$0xff] %vm740_vm1, %v685_v27  ;;  %v413_v36 = vadd.f32 %v3685_v32, %v4368_v3  ;;  %v407_v39 = vpop.f32.mrb[11].mxu0  ;;  %v1688_v42 = vmul.f32 %v4404_v37, %v4459_v16  ;;  %v4487_v44 = vld [vmem:[#allocation2 + $0x48] sm:$0xff]  ;;  %v4515_v13 = vld [vmem:[#allocation2 + $0x50] sm:$0xff] }
  0xed   :  { %v1885_v43 = vmul.f32 %v4409_v38, %v4461_v17  ;;  %v4489_v45 = vld [vmem:[#allocation2 + $0x49] sm:$0xff]  ;;  %837 = vst.msk [vmem:[#allocation2 + $0x79] sm:$0xff] %vm740_vm1, %v684_v31  ;;  %v408_v48 = vadd.f32 %v4368_v3, %v407_v39  ;;  %v2145_v49 = vadd.f32 %v2081_v24, %v1947_v33  ;;  %v1358_v50 = vadd.f32 %v1294_v11, %v1161_v34  ;;  %v4521_v22 = vld [vmem:[#allocation2 + $0x51] sm:$0xff] }
  0xee   :  { %v1948_v41 = vadd.f32 %v1884_v53, %v1751_v29  ;;  %v4491_v47 = vld [vmem:[#allocation2 + $0x4a] sm:$0xff]  ;;  %v2083_v51 = vmul.f32 %v4444_v63, %v4487_v44  ;;  %v687_v52 = vmax.f32 %v413_v36, 0.0  ;;  %v2280_v55 = vmul.f32 %v4434_v59, %v4489_v45 }
  0xef   :  { %v4501_v56 = vmul.f32 %v4439_v60, %v4491_v47  ;;  %v686_v57 = vmax.f32 %v408_v48, 0.0  ;;  %v3688_v58 = vpop.f32.mrb[12].mxu0  ;;  %v2342_v61 = vadd.f32 %v2278_v25, %v2145_v49  ;;  %v1555_v62 = vadd.f32 %v1491_v35, %v1358_v50  ;;  %v4525_v25 = vld [vmem:[#allocation2 + $0x52] sm:$0xff] }
  0xf0   :  { %v2146_v53 = vadd.f32 %v2082_v30, %v1948_v41  ;;  %v1162_v0 = vadd.f32 %v4424_v54, %v965_v12  ;;  %840 = vst.msk [vmem:[#allocation2 + $0x99] sm:$0xff] %vm740_vm1, %v687_v52  ;;  %v423_v1 = vadd.f32 %v3688_v58, %v4368_v3  ;;  %v417_v2 = vpop.f32.mrb[13].mxu0  ;;  %v1295_v7 = vmul.f32 %v4387_v20, %v4416_v46  ;;  %v4547_v52 = vld [vmem:[#allocation2 + $0x60] sm:$0xff] }
  0xf1   :  { %v1492_v11 = vmul.f32 %v4414_v40, %v4473_v26  ;;  %839 = vst.msk [vmem:[#allocation2 + $0x91] sm:$0xff] %vm740_vm1, %v686_v57  ;;  %v418_v54 = vadd.f32 %v4368_v3, %v417_v2  ;;  %v2539_v12 = vadd.f32 %v2475_v28, %v2342_v61  ;;  %v1752_v14 = vadd.f32 %v1688_v42, %v1555_v62  ;;  %v4555_v62 = vld [vmem:[#allocation2 + $0x62] sm:$0xff] }
  0xf2   :  { %v2343_v5 = vadd.f32 %v2279_v19, %v2146_v53  ;;  %v1689_v18 = vmul.f32 %v4404_v37, %v4449_v8  ;;  %v689_v19 = vmax.f32 %v423_v1, 0.0  ;;  %v1359_v24 = vadd.f32 %v1295_v7, %v1162_v0  ;;  %v4549_v53 = vld [vmem:[#allocation2 + $0x61] sm:$0xff] }
  0xf3   :  { %v1886_v46 = vmul.f32 %v4409_v38, %v4451_v9  ;;  %v688_v27 = vmax.f32 %v418_v54, 0.0  ;;  %v3691_v29 = vpop.f32.mrb[14].mxu0  ;;  %v2610_v30 = vadd.f32 %v4509_v4, %v2539_v12  ;;  %v1949_v31 = vadd.f32 %v1885_v43, %v1752_v14 }
  0xf4   :  { %v2540_v23 = vadd.f32 %v2476_v21, %v2343_v5  ;;  %v2084_v28 = vmul.f32 %v4444_v63, %v4515_v13  ;;  %842 = vst.msk [vmem:[#allocation2 + $0xb1] sm:$0xff] %vm740_vm1, %v689_v19  ;;  %v433_v32 = vadd.f32 %v3691_v29, %v4368_v3  ;;  %v427_v33 = vpop.f32.mrb[15].mxu0  ;;  %v1556_v34 = vadd.f32 %v1492_v11, %v1359_v24 }
  0xf5   :  { %v2281_v35 = vmul.f32 %v4434_v59, %v4521_v22  ;;  %841 = vst.msk [vmem:[#allocation2 + $0xa9] sm:$0xff] %vm740_vm1, %v688_v27  ;;  %v428_v36 = vadd.f32 %v4368_v3, %v427_v33  ;;  %3766 = vmatprep.mubr.msk.f32.mxu1 %vm740_vm1, %v2610_v30  ;;  %v2147_v39 = vadd.f32 %v2083_v51, %v1949_v31  ;;  %v4583_v33 = vld [vmem:[#allocation2 + $0x69] sm:$0xff] }
  0xf6   :  { %v2611_v21 = vadd.f32 %v4509_v4, %v2540_v23  ;;  %v2478_v41 = vmul.f32 %v4439_v60, %v4525_v25  ;;  %v966_v42 = vmul.f32 %v4373_v6, %v4457_v15  ;;  %v691_v43 = vmax.f32 %v433_v32, 0.0  ;;  %v4581_v32 = vld [vmem:[#allocation2 + $0x68] sm:$0xff] }
  0xf7   :  { %v1753_v48 = vadd.f32 %v1689_v18, %v1556_v34  ;;  %v1099_v49 = vmul.f32 %v4379_v10, %v4459_v16  ;;  %v1296_v50 = vmul.f32 %v4387_v20, %v4461_v17  ;;  %v690_v51 = vmax.f32 %v428_v36, 0.0  ;;  %v3694_v57 = vpop.f32.mrb[16].mxu0 }
  0xf8   :  { %3767 = vmatmul.mubr.msk.f32.vlgmr.msra.gmra.mrb[0].mxu1 %vm740_vm1, %v2611_v21  ;;  %v2344_v58 = vadd.f32 %v2280_v55, %v2147_v39  ;;  %v1493_v15 = vmul.f32 %v4414_v40, %v4487_v44  ;;  %v1690_v61 = vmul.f32 %v4404_v37, %v4489_v45  ;;  %844 = vst.msk [vmem:[#allocation2 + $0xc9] sm:$0xff] %vm740_vm1, %v691_v43  ;;  %v437_v17 = vpop.f32.mrb[17].mxu0 }
  0xf9   :  { %v443_v16 = vadd.f32 %v3694_v57, %v4368_v3  ;;  %v1950_v0 = vadd.f32 %v1886_v46, %v1753_v48  ;;  %v1163_v1 = vadd.f32 %v1099_v49, %v966_v42  ;;  %v1887_v2 = vmul.f32 %v4409_v38, %v4491_v47  ;;  %843 = vst.msk [vmem:[#allocation2 + $0xc1] sm:$0xff] %vm740_vm1, %v690_v51 }
  0xfa   :  { %v438_v55 = vadd.f32 %v4368_v3, %v437_v17  ;;  %v2541_v5 = vadd.f32 %v4501_v56, %v2344_v58  ;;  %v2085_v7 = vmul.f32 %v4444_v63, %v4547_v52  ;;  %v2282_v11 = vmul.f32 %v4434_v59, %v4549_v53 }
  0xfb   :  { %v693_v54 = vmax.f32 %v443_v16, 0.0  ;;  %v2148_v12 = vadd.f32 %v2084_v28, %v1950_v0  ;;  %v1360_v14 = vadd.f32 %v1296_v50, %v1163_v1  ;;  %v4570_v18 = vmul.f32 %v4439_v60, %v4555_v62  ;;  %v3697_v24 = vpop.f32.mrb[18].mxu0 }
  0xfc   :  { %v692_v19 = vmax.f32 %v438_v55, 0.0  ;;  %v2612_v23 = vadd.f32 %v4509_v4, %v2541_v5  ;;  %v967_v56 = vmul.f32 %v4373_v6, %v4473_v26  ;;  %v1100_v46 = vmul.f32 %v4379_v10, %v4449_v8  ;;  %v447_v30 = vpop.f32.mrb[19].mxu0  ;;  %v4611_v55 = vld [vmem:[#allocation2 + $0x78] sm:$0xff] }
  0xfd   :  { %846 = vst.msk [vmem:[#allocation2 + $0xe1] sm:$0xff] %vm740_vm1, %v693_v54  ;;  %v2345_v27 = vadd.f32 %v2281_v35, %v2148_v12  ;;  %v453_v29 = vadd.f32 %v3697_v24, %v4368_v3  ;;  %v1557_v31 = vadd.f32 %v1493_v15, %v1360_v14  ;;  %v1297_v28 = vmul.f32 %v4387_v20, %v4451_v9  ;;  %v4592_v35 = vld [vmem:[#allocation2 + $0x6a] sm:$0xff] }
  0xfe   :  { %845 = vst.msk [vmem:[#allocation2 + $0xd9] sm:$0xff] %vm740_vm1, %v692_v19  ;;  %3769 = vmatprep.mubr.msk.f32.mxu1 %vm740_vm1, %v2612_v23  ;;  %v448_v8 = vadd.f32 %v4368_v3, %v447_v30  ;;  %v1164_v26 = vadd.f32 %v1100_v46, %v967_v56  ;;  %v1494_v21 = vmul.f32 %v4414_v40, %v4515_v13  ;;  %v4620_v19 = vld [vmem:[#allocation2 + $0x7a] sm:$0xff] }
  0xff   :  { %v1691_v34 = vmul.f32 %v4404_v37, %v4521_v22  ;;  %v2542_v9 = vadd.f32 %v2478_v41, %v2345_v27  ;;  %v695_v36 = vmax.f32 %v453_v29, 0.0  ;;  %v1754_v39 = vadd.f32 %v1690_v61, %v1557_v31  ;;  %v3700_v51 = vpop.f32.mrb[20].mxu0 }
 0x100   :  { %v1888_v42 = vmul.f32 %v4409_v38, %v4525_v25  ;;  %v694_v43 = vmax.f32 %v448_v8, 0.0  ;;  %v1361_v48 = vadd.f32 %v1297_v28, %v1164_v26  ;;  %v2086_v49 = vmul.f32 %v4444_v63, %v4581_v32  ;;  %v457_v61 = vpop.f32.mrb[21].mxu0  ;;  %v4638_v8 = vld [vmem:[#allocation2 + $0x80] sm:$0xff] }
 0x101   :  { %v2283_v50 = vmul.f32 %v4434_v59, %v4583_v33  ;;  %v2613_v57 = vadd.f32 %v4509_v4, %v2542_v9  ;;  %848 = vst.msk [vmem:[#allocation2 + $0xf9] sm:$0xff] %vm740_vm1, %v695_v36  ;;  %v1951_v58 = vadd.f32 %v1887_v2, %v1754_v39  ;;  %v2480_v41 = vmul.f32 %v4439_v60, %v4592_v35  ;;  %v4613_v2 = vld [vmem:[#allocation2 + $0x79] sm:$0xff]  ;;  %v4640_v26 = vld [vmem:[#allocation2 + $0x81] sm:$0xff] }
 0x102   :  { %v463_v15 = vadd.f32 %v3700_v51, %v4368_v3  ;;  %847 = vst.msk [vmem:[#allocation2 + $0xf1] sm:$0xff] %vm740_vm1, %v694_v43  ;;  %v1558_v16 = vadd.f32 %v1494_v21, %v1361_v48  ;;  %v458_v17 = vadd.f32 %v4368_v3, %v457_v61  ;;  %v968_v0 = vmul.f32 %v4373_v6, %v4487_v44  ;;  %v4649_v39 = vld [vmem:[#allocation2 + $0x82] sm:$0xff] }
 0x103   :  { %v1101_v1 = vmul.f32 %v4379_v10, %v4489_v45  ;;  %3770 = vmatmul.mubr.msk.f32.gmra.mrb[2].mxu1 %vm740_vm1, %v2613_v57  ;;  %v2149_v5 = vadd.f32 %v2085_v7, %v1951_v58  ;;  %v1298_v12 = vmul.f32 %v4387_v20, %v4491_v47  ;;  %v1495_v14 = vmul.f32 %v4414_v40, %v4547_v52  ;;  %v3703_v56 = vpop.f32.mrb[22].mxu0 }
 0x104   :  { %v697_v54 = vmax.f32 %v463_v15, 0.0  ;;  %v1755_v44 = vadd.f32 %v1691_v34, %v1558_v16  ;;  %v696_v23 = vmax.f32 %v458_v17, 0.0  ;;  %v1692_v45 = vmul.f32 %v4404_v37, %v4549_v53  ;;  %v467_v29 = vpop.f32.mrb[23].mxu0 }
 0x105   :  { %v1165_v24 = vadd.f32 %v1101_v1, %v968_v0  ;;  %v2346_v46 = vadd.f32 %v2282_v11, %v2149_v5  ;;  %v1889_v7 = vmul.f32 %v4409_v38, %v4555_v62  ;;  %v2087_v47 = vmul.f32 %v4444_v63, %v4611_v55 }
 0x106   :  { %850 = vst.msk [vmem:[#allocation2 + $0x111] sm:$0xff] %vm740_vm1, %v697_v54  ;;  %v2284_v27 = vmul.f32 %v4434_v59, %v4613_v2  ;;  %v1952_v30 = vadd.f32 %v1888_v42, %v1755_v44  ;;  %849 = vst.msk [vmem:[#allocation2 + $0x109] sm:$0xff] %vm740_vm1, %v696_v23  ;;  %v4634_v28 = vmul.f32 %v4439_v60, %v4620_v19  ;;  %v4675_v44 = vld [vmem:[#allocation2 + $0x90] sm:$0xff] }
 0x107   :  { %v1362_v31 = vadd.f32 %v1298_v12, %v1165_v24  ;;  %v969_v11 = vmul.f32 %v4373_v6, %v4515_v13  ;;  %v2543_v21 = vadd.f32 %v4570_v18, %v2346_v46  ;;  %v1102_v34 = vmul.f32 %v4379_v10, %v4521_v22  ;;  %v4655_v18 = vpop.f32.mrb[24].mxu0  ;;  %v4677_v23 = vld [vmem:[#allocation2 + $0x91] sm:$0xff] }
 0x108   :  { %v1299_v9 = vmul.f32 %v4387_v20, %v4525_v25  ;;  %v1496_v36 = vmul.f32 %v4414_v40, %v4581_v32  ;;  %v2150_v42 = vadd.f32 %v2086_v49, %v1952_v30  ;;  %v1693_v13 = vmul.f32 %v4404_v37, %v4583_v33  ;;  %v477_v58 = vpop.f32.mrb[25].mxu0 }
 0x109   :  { %v1559_v43 = vadd.f32 %v1495_v14, %v1362_v31  ;;  %v1890_v48 = vmul.f32 %v4409_v38, %v4592_v35  ;;  %v2614_v22 = vadd.f32 %v4509_v4, %v2543_v21  ;;  %v1166_v51 = vadd.f32 %v1102_v34, %v969_v11 }
 0x10a   :  { %v2088_v25 = vmul.f32 %v4444_v63, %v4638_v8  ;;  %v2285_v57 = vmul.f32 %v4434_v59, %v4640_v26  ;;  %v2347_v49 = vadd.f32 %v2283_v50, %v2150_v42  ;;  %v4664_v61 = vmul.f32 %v4439_v60, %v4649_v39 }
 0x10b   :  { %v1756_v15 = vadd.f32 %v1692_v45, %v1559_v43  ;;  %v473_v16 = vadd.f32 %v3703_v56, %v4368_v3  ;;  %3772 = vmatprep.mubr.msk.f32.mxu1 %vm740_vm1, %v2614_v22  ;;  %v1363_v17 = vadd.f32 %v1299_v9, %v1166_v51  ;;  %v468_v0 = vadd.f32 %v4368_v3, %v467_v29  ;;  %v4679_v24 = vpop.f32.mrb[26].mxu0  ;;  %v4683_v29 = vld [vmem:[#allocation2 + $0x92] sm:$0xff] }
 0x10c   :  { %v970_v1 = vmul.f32 %v4373_v6, %v4547_v52  ;;  %v1103_v5 = vmul.f32 %v4379_v10, %v4549_v53  ;;  %v2544_v54 = vadd.f32 %v2480_v41, %v2347_v49  ;;  %v1300_v14 = vmul.f32 %v4387_v20, %v4555_v62  ;;  %v4685_v53 = vpop.f32.mrb[27].mxu0  ;;  %v4705_v43 = vld [vmem:[#allocation2 + $0x98] sm:$0xff] }
 0x10d   :  { %v1953_v50 = vadd.f32 %v1889_v7, %v1756_v15  ;;  %v699_v12 = vmax.f32 %v473_v16, 0.0  ;;  %v1560_v45 = vadd.f32 %v1496_v36, %v1363_v17  ;;  %v698_v56 = vmax.f32 %v468_v0, 0.0  ;;  %v4715_v16 = vld [vmem:[#allocation2 + $0x9a] sm:$0xff] }
 0x10e   :  { %v1167_v46 = vadd.f32 %v1103_v5, %v970_v1  ;;  %v1497_v52 = vmul.f32 %v4414_v40, %v4611_v55  ;;  %v2615_v41 = vadd.f32 %v4509_v4, %v2544_v54  ;;  %v1694_v62 = vmul.f32 %v4404_v37, %v4613_v2 }
 0x10f   :  { %v2151_v7 = vadd.f32 %v2087_v47, %v1953_v50  ;;  %852 = vst.msk [vmem:[#allocation2 + $0x129] sm:$0xff] %vm740_vm1, %v699_v12  ;;  %v1891_v30 = vmul.f32 %v4409_v38, %v4620_v19  ;;  %v1757_v31 = vadd.f32 %v1693_v13, %v1560_v45  ;;  %851 = vst.msk [vmem:[#allocation2 + $0x121] sm:$0xff] %vm740_vm1, %v698_v56  ;;  %v4707_v13 = vld [vmem:[#allocation2 + $0x99] sm:$0xff]  ;;  %v4709_v22 = vpop.f32.mrb[28].mxu0 }
 0x110   :  { %v1364_v11 = vadd.f32 %v1300_v14, %v1167_v46  ;;  %v2089_v21 = vmul.f32 %v4444_v63, %v4675_v44  ;;  %v2286_v34 = vmul.f32 %v4434_v59, %v4677_v23  ;;  %3773 = vmatmul.mubr.msk.f32.gmra.mrb[4].mxu1 %vm740_vm1, %v2615_v41  ;;  %v2483_v9 = vmul.f32 %v4439_v60, %v4683_v29 }
 0x111   :  { %v2348_v47 = vadd.f32 %v2284_v27, %v2151_v7  ;;  %v971_v36 = vmul.f32 %v4373_v6, %v4581_v32  ;;  %v1104_v42 = vmul.f32 %v4379_v10, %v4583_v33  ;;  %v1954_v51 = vadd.f32 %v1890_v48, %v1757_v31  ;;  %v4717_v32 = vpop.f32.mrb[29].mxu0 }
 0x112   :  { %v1561_v49 = vadd.f32 %v1497_v52, %v1364_v11  ;;  %v1301_v27 = vmul.f32 %v4387_v20, %v4592_v35  ;;  %v1498_v15 = vmul.f32 %v4414_v40, %v4638_v8  ;;  %v1695_v0 = vmul.f32 %v4404_v37, %v4640_v26  ;;  %v4747_v11 = vld [vmem:[#allocation2 + $0xa8] sm:$0xff] }
 0x113   :  { %v2545_v33 = vadd.f32 %v4634_v28, %v2348_v47  ;;  %v1168_v17 = vadd.f32 %v1104_v42, %v971_v36  ;;  %v1892_v48 = vmul.f32 %v4409_v38, %v4649_v39  ;;  %v2152_v1 = vadd.f32 %v2088_v25, %v1954_v51  ;;  %v4735_v45 = vpop.f32.mrb[30].mxu0  ;;  %v4754_v36 = vld [vmem:[#allocation2 + $0xaa] sm:$0xff] }
 0x114   :  { %v1758_v5 = vadd.f32 %v1694_v62, %v1561_v49  ;;  %v2090_v35 = vmul.f32 %v4444_v63, %v4705_v43  ;;  %v2287_v54 = vmul.f32 %v4434_v59, %v4707_v13  ;;  %v4731_v28 = vmul.f32 %v4439_v60, %v4715_v16  ;;  %v4740_v41 = vpop.f32.mrb[31].mxu0 }
 0x115   :  { %v2616_v50 = vadd.f32 %v4509_v4, %v2545_v33  ;;  %v1365_v12 = vadd.f32 %v1301_v27, %v1168_v17  ;;  %v483_v14 = vadd.f32 %v4655_v18, %v4368_v3  ;;  %v2349_v25 = vadd.f32 %v2285_v57, %v2152_v1  ;;  %v4749_v57 = vld [vmem:[#allocation2 + $0xa9] sm:$0xff] }
 0x116   :  { %v1955_v56 = vadd.f32 %v1891_v30, %v1758_v5  ;;  %v478_v46 = vadd.f32 %v4368_v3, %v477_v58  ;;  %v972_v52 = vmul.f32 %v4373_v6, %v4611_v55  ;;  %v1105_v31 = vmul.f32 %v4379_v10, %v4613_v2 }
 0x117   :  { %3775 = vmatprep.mubr.msk.f32.mxu1 %vm740_vm1, %v2616_v50  ;;  %v1562_v7 = vadd.f32 %v1498_v15, %v1365_v12  ;;  %v701_v62 = vmax.f32 %v483_v14, 0.0  ;;  %v1302_v18 = vmul.f32 %v4387_v20, %v4620_v19  ;;  %v2546_v58 = vadd.f32 %v4664_v61, %v2349_v25  ;;  %v4761_v49 = vpop.f32.mrb[32].mxu0  ;;  %v4779_v50 = vld [vmem:[#allocation2 + $0xb1] sm:$0xff] }
 0x118   :  { %v2153_v30 = vadd.f32 %v2089_v21, %v1955_v56  ;;  %v700_v55 = vmax.f32 %v478_v46, 0.0  ;;  %v1499_v47 = vmul.f32 %v4414_v40, %v4675_v44  ;;  %v1169_v2 = vadd.f32 %v1105_v31, %v972_v52  ;;  %v4769_v33 = vpop.f32.mrb[33].mxu0  ;;  %v4788_v56 = vld [vmem:[#allocation2 + $0xb2] sm:$0xff] }
 0x119   :  { %v1759_v42 = vadd.f32 %v1695_v0, %v1562_v7  ;;  %854 = vst.msk [vmem:[#allocation2 + $0x141] sm:$0xff] %vm740_vm1, %v701_v62  ;;  %v1696_v19 = vmul.f32 %v4404_v37, %v4677_v23  ;;  %v1893_v51 = vmul.f32 %v4409_v38, %v4683_v29  ;;  %v2617_v61 = vadd.f32 %v4509_v4, %v2546_v58 }
 0x11a   :  { %v2350_v21 = vadd.f32 %v2286_v34, %v2153_v30  ;;  %853 = vst.msk [vmem:[#allocation2 + $0x139] sm:$0xff] %vm740_vm1, %v700_v55  ;;  %v2091_v27 = vmul.f32 %v4444_v63, %v4747_v11  ;;  %v2288_v15 = vmul.f32 %v4434_v59, %v4749_v57  ;;  %v1366_v0 = vadd.f32 %v1302_v18, %v1169_v2  ;;  %v4777_v34 = vld [vmem:[#allocation2 + $0xb0] sm:$0xff] }
 0x11b   :  { %v1956_v17 = vadd.f32 %v1892_v48, %v1759_v42  ;;  %v4773_v1 = vmul.f32 %v4439_v60, %v4754_v36  ;;  %v973_v5 = vmul.f32 %v4373_v6, %v4638_v8  ;;  %3776 = vmatmul.mubr.msk.f32.gmra.mrb[6].mxu1 %vm740_vm1, %v2617_v61  ;;  %v1106_v14 = vmul.f32 %v4379_v10, %v4640_v26 }
 0x11c   :  { %v2547_v12 = vadd.f32 %v2483_v9, %v2350_v21  ;;  %v1303_v48 = vmul.f32 %v4387_v20, %v4649_v39  ;;  %v1500_v25 = vmul.f32 %v4414_v40, %v4705_v43  ;;  %v1563_v8 = vadd.f32 %v1499_v47, %v1366_v0  ;;  %v4794_v9 = vpop.f32.mrb[34].mxu0  ;;  %v4821_v0 = vld [vmem:[#allocation2 + $0xc1] sm:$0xff] }
 0x11d   :  { %v2154_v46 = vadd.f32 %v2090_v35, %v1956_v17  ;;  %v1697_v52 = vmul.f32 %v4404_v37, %v4707_v13  ;;  %v1894_v7 = vmul.f32 %v4409_v38, %v4715_v16  ;;  %v1170_v62 = vadd.f32 %v1106_v14, %v973_v5  ;;  %v4801_v18 = vpop.f32.mrb[35].mxu0 }
 0x11e   :  { %v2618_v26 = vadd.f32 %v4509_v4, %v2547_v12  ;;  %v2092_v39 = vmul.f32 %v4444_v63, %v4777_v34  ;;  %v2289_v31 = vmul.f32 %v4434_v59, %v4779_v50  ;;  %v1760_v58 = vadd.f32 %v1696_v19, %v1563_v8 }
 0x11f   :  { %v2351_v35 = vadd.f32 %v2287_v54, %v2154_v46  ;;  %v4805_v30 = vmul.f32 %v4439_v60, %v4788_v56  ;;  %v493_v55 = vadd.f32 %v4679_v24, %v4368_v3  ;;  %v1367_v47 = vadd.f32 %v1303_v48, %v1170_v62  ;;  %v4819_v24 = vld [vmem:[#allocation2 + $0xc0] sm:$0xff]  ;;  %v4823_v5 = vpop.f32.mrb[36].mxu0 }
 0x120   :  { %3778 = vmatprep.mubr.msk.f32.mxu1 %vm740_vm1, %v2618_v26  ;;  %v488_v42 = vadd.f32 %v4368_v3, %v4685_v53  ;;  %v974_v2 = vmul.f32 %v4373_v6, %v4675_v44  ;;  %v1107_v54 = vmul.f32 %v4379_v10, %v4677_v23  ;;  %v1957_v61 = vadd.f32 %v1893_v51, %v1760_v58  ;;  %v4827_v23 = vld [vmem:[#allocation2 + $0xc2] sm:$0xff] }
 0x121   :  { %v2548_v19 = vadd.f32 %v4731_v28, %v2351_v35  ;;  %v703_v21 = vmax.f32 %v493_v55, 0.0  ;;  %v1304_v17 = vmul.f32 %v4387_v20, %v4683_v29  ;;  %v1564_v53 = vadd.f32 %v1500_v25, %v1367_v47  ;;  %v4829_v28 = vpop.f32.mrb[37].mxu0  ;;  %v4849_v55 = vld [vmem:[#allocation2 + $0xc8] sm:$0xff] }
 0x122   :  { %v702_v12 = vmax.f32 %v488_v42, 0.0  ;;  %v1171_v14 = vadd.f32 %v1107_v54, %v974_v2  ;;  %v1501_v44 = vmul.f32 %v4414_v40, %v4747_v11  ;;  %v2155_v48 = vadd.f32 %v2091_v27, %v1957_v61  ;;  %v4851_v47 = vld [vmem:[#allocation2 + $0xc9] sm:$0xff] }
 0x123   :  { %v2619_v51 = vadd.f32 %v4509_v4, %v2548_v19  ;;  %856 = vst.msk [vmem:[#allocation2 + $0x159] sm:$0xff] %vm740_vm1, %v703_v21  ;;  %v1698_v29 = vmul.f32 %v4404_v37, %v4749_v57  ;;  %v1895_v25 = vmul.f32 %v4409_v38, %v4754_v36  ;;  %v1761_v46 = vadd.f32 %v1697_v52, %v1564_v53  ;;  %v4853_v42 = vpop.f32.mrb[38].mxu0  ;;  %v4859_v61 = vld [vmem:[#allocation2 + $0xca] sm:$0xff] }
 0x124   :  { %855 = vst.msk [vmem:[#allocation2 + $0x151] sm:$0xff] %vm740_vm1, %v702_v12  ;;  %v1368_v8 = vadd.f32 %v1304_v17, %v1171_v14  ;;  %v2093_v26 = vmul.f32 %v4444_v63, %v4819_v24  ;;  %v2290_v62 = vmul.f32 %v4434_v59, %v4821_v0  ;;  %v2352_v27 = vadd.f32 %v2288_v15, %v2155_v48 }
 0x125   :  { %3779 = vmatmul.mubr.msk.f32.gmra.mrb[8].mxu1 %vm740_vm1, %v2619_v51  ;;  %v2487_v35 = vmul.f32 %v4439_v60, %v4827_v23  ;;  %v975_v58 = vmul.f32 %v4373_v6, %v4705_v43  ;;  %v1108_v52 = vmul.f32 %v4379_v10, %v4707_v13  ;;  %v1958_v2 = vadd.f32 %v1894_v7, %v1761_v46  ;;  %v4861_v43 = vpop.f32.mrb[39].mxu0 }
 0x126   :  { %v1565_v54 = vadd.f32 %v1501_v44, %v1368_v8  ;;  %v1305_v15 = vmul.f32 %v4387_v20, %v4715_v16  ;;  %v1502_v19 = vmul.f32 %v4414_v40, %v4777_v34  ;;  %v2549_v13 = vadd.f32 %v4773_v1, %v2352_v27 }
 0x127   :  { %v1172_v21 = vadd.f32 %v1108_v52, %v975_v58  ;;  %v1699_v17 = vmul.f32 %v4404_v37, %v4779_v50  ;;  %v1896_v7 = vmul.f32 %v4409_v38, %v4788_v56  ;;  %v2156_v53 = vadd.f32 %v2092_v39, %v1958_v2  ;;  %v4879_v46 = vpop.f32.mrb[40].mxu0 }
 0x128   :  { %v1762_v12 = vadd.f32 %v1698_v29, %v1565_v54  ;;  %v2094_v16 = vmul.f32 %v4444_v63, %v4849_v55  ;;  %v2291_v14 = vmul.f32 %v4434_v59, %v4851_v47  ;;  %v2620_v44 = vadd.f32 %v4509_v4, %v2549_v13  ;;  %v4885_v58 = vpop.f32.mrb[41].mxu0 }
 0x129   :  { %v1369_v51 = vadd.f32 %v1305_v15, %v1172_v21  ;;  %v4875_v1 = vmul.f32 %v4439_v60, %v4859_v61  ;;  %v503_v48 = vadd.f32 %v4709_v22, %v4368_v3  ;;  %v2353_v39 = vadd.f32 %v2289_v31, %v2156_v53  ;;  %v4892_v31 = vld [vmem:[#allocation2 + $0xd8] sm:$0xff] }
 0x12a   :  { %v1959_v29 = vadd.f32 %v1895_v25, %v1762_v12  ;;  %v498_v8 = vadd.f32 %v4368_v3, %v4717_v32  ;;  %v976_v27 = vmul.f32 %v4373_v6, %v4747_v11  ;;  %3781 = vmatprep.mubr.msk.f32.mxu1 %vm740_vm1, %v2620_v44  ;;  %v1109_v54 = vmul.f32 %v4379_v10, %v4749_v57  ;;  %v4894_v25 = vld [vmem:[#allocation2 + $0xd9] sm:$0xff] }
 0x12b   :  { %v1566_v52 = vadd.f32 %v1502_v19, %v1369_v51  ;;  %v705_v2 = vmax.f32 %v503_v48, 0.0  ;;  %v1306_v22 = vmul.f32 %v4387_v20, %v4754_v36  ;;  %v2550_v32 = vadd.f32 %v4805_v30, %v2353_v39  ;;  %v4899_v21 = vld [vmem:[#allocation2 + $0xda] sm:$0xff]  ;;  %v4906_v12 = vpop.f32.mrb[42].mxu0 }
 0x12c   :  { %v2157_v15 = vadd.f32 %v2093_v26, %v1959_v29  ;;  %v704_v11 = vmax.f32 %v498_v8, 0.0  ;;  %v1503_v13 = vmul.f32 %v4414_v40, %v4819_v24  ;;  %v1173_v57 = vadd.f32 %v1109_v54, %v976_v27  ;;  %v4914_v51 = vpop.f32.mrb[43].mxu0  ;;  %v4924_v27 = vld [vmem:[#allocation2 + $0xe1] sm:$0xff] }
 0x12d   :  { %v1763_v19 = vadd.f32 %v1699_v17, %v1566_v52  ;;  %858 = vst.msk [vmem:[#allocation2 + $0x171] sm:$0xff] %vm740_vm1, %v705_v2  ;;  %v1700_v36 = vmul.f32 %v4404_v37, %v4821_v0  ;;  %v1897_v53 = vmul.f32 %v4409_v38, %v4827_v23  ;;  %v2621_v30 = vadd.f32 %v4509_v4, %v2550_v32 }
 0x12e   :  { %v2354_v26 = vadd.f32 %v2290_v62, %v2157_v15  ;;  %857 = vst.msk [vmem:[#allocation2 + $0x169] sm:$0xff] %vm740_vm1, %v704_v11  ;;  %v2095_v44 = vmul.f32 %v4444_v63, %v4892_v31  ;;  %v2292_v17 = vmul.f32 %v4434_v59, %v4894_v25  ;;  %v1370_v39 = vadd.f32 %v1306_v22, %v1173_v57  ;;  %v4922_v62 = vld [vmem:[#allocation2 + $0xe0] sm:$0xff] }
 0x12f   :  { %v1960_v48 = vadd.f32 %v1896_v7, %v1763_v19  ;;  %v4918_v29 = vmul.f32 %v4439_v60, %v4899_v21  ;;  %v977_v8 = vmul.f32 %v4373_v6, %v4777_v34  ;;  %3782 = vmatmul.mubr.msk.f32.gmra.mrb[10].mxu1 %vm740_vm1, %v2621_v30  ;;  %v1110_v2 = vmul.f32 %v4379_v10, %v4779_v50  ;;  %v4933_v22 = vld [vmem:[#allocation2 + $0xe2] sm:$0xff] }
 0x130   :  { %v2551_v52 = vadd.f32 %v2487_v35, %v2354_v26  ;;  %v1307_v7 = vmul.f32 %v4387_v20, %v4788_v56  ;;  %v1504_v54 = vmul.f32 %v4414_v40, %v4849_v55  ;;  %v1567_v34 = vadd.f32 %v1503_v13, %v1370_v39  ;;  %v4939_v35 = vpop.f32.mrb[44].mxu0 }
 0x131   :  { %v2158_v32 = vadd.f32 %v2094_v16, %v1960_v48  ;;  %v1701_v15 = vmul.f32 %v4404_v37, %v4851_v47  ;;  %v1898_v11 = vmul.f32 %v4409_v38, %v4859_v61  ;;  %v1174_v19 = vadd.f32 %v1110_v2, %v977_v8  ;;  %v4948_v16 = vpop.f32.mrb[45].mxu0 }
 0x132   :  { %v2622_v50 = vadd.f32 %v4509_v4, %v2551_v52  ;;  %v2096_v56 = vmul.f32 %v4444_v63, %v4922_v62  ;;  %v4946_v57 = vmul.f32 %v4434_v59, %v4924_v27  ;;  %v1764_v30 = vadd.f32 %v1700_v36, %v1567_v34 }
 0x133   :  { %v2355_v13 = vadd.f32 %v2291_v14, %v2158_v32  ;;  %v4952_v26 = vmul.f32 %v4439_v60, %v4933_v22  ;;  %v513_v48 = vadd.f32 %v4735_v45, %v4368_v3  ;;  %v1371_v39 = vadd.f32 %v1307_v7, %v1174_v19  ;;  %v4966_v45 = vld [vmem:[#allocation2 + $0xf0] sm:$0xff]  ;;  %v4970_v7 = vpop.f32.mrb[46].mxu0 }
 0x134   :  { %3784 = vmatprep.mubr.msk.f32.mxu1 %vm740_vm1, %v2622_v50  ;;  %v508_v8 = vadd.f32 %v4368_v3, %v4740_v41  ;;  %v978_v52 = vmul.f32 %v4373_v6, %v4819_v24  ;;  %v1111_v14 = vmul.f32 %v4379_v10, %v4821_v0  ;;  %v1961_v2 = vadd.f32 %v1897_v53, %v1764_v30  ;;  %v4968_v50 = vld [vmem:[#allocation2 + $0xf1] sm:$0xff]  ;;  %v4976_v24 = vpop.f32.mrb[47].mxu0 }
 0x135   :  { %v2552_v36 = vadd.f32 %v4875_v1, %v2355_v13  ;;  %v707_v32 = vmax.f32 %v513_v48, 0.0  ;;  %v1308_v34 = vmul.f32 %v4387_v20, %v4827_v23  ;;  %v1568_v3 = vadd.f32 %v1504_v54, %v1371_v39  ;;  %v4974_v10 = vld [vmem:[#allocation2 + $0xf2] sm:$0xff] }
 0x136   :  { %v706_v41 = vmax.f32 %v508_v8, 0.0  ;;  %v1175_v19 = vadd.f32 %v1111_v14, %v978_v52  ;;  %v1505_v6 = vmul.f32 %v4414_v40, %v4892_v31  ;;  %v2159_v1 = vadd.f32 %v2095_v44, %v1961_v2  ;;  %v5004_v8 = vld [vmem:[%s6871_s3 + $0x1] ss:$0 sm:$0xff]  ;;  %v5008_v52 = vld [vmem:[#allocation2 + $0xf8] sm:$0xff] }
 0x137   :  { %v2623_v0 = vadd.f32 %v4509_v4, %v2552_v36  ;;  %860 = vst.msk [vmem:[#allocation2 + $0x189] sm:$0xff] %vm740_vm1, %v707_v32  ;;  %v1702_v20 = vmul.f32 %v4404_v37, %v4894_v25  ;;  %v1899_v23 = vmul.f32 %v4409_v38, %v4899_v21  ;;  %v1765_v53 = vadd.f32 %v1701_v15, %v1568_v3  ;;  %v4997_v15 = vld [vmem:[%s6871_s3] ss:$0 sm:$0xff]  ;;  %v5012_v36 = vpop.f32.mrb[48].mxu0 }
 0x138   :  { %859 = vst.msk [vmem:[#allocation2 + $0x181] sm:$0xff] %vm740_vm1, %v706_v41  ;;  %v1372_v54 = vadd.f32 %v1308_v34, %v1175_v19  ;;  %v2097_v13 = vmul.f32 %v4444_v63, %v4966_v45  ;;  %v2294_v30 = vmul.f32 %v4434_v59, %v4968_v50  ;;  %v2356_v44 = vadd.f32 %v2292_v17, %v2159_v1  ;;  %v5010_v14 = vld [vmem:[#allocation2 + $0xf9] sm:$0xff]  ;;  %v5025_v41 = vpop.f32.mrb[49].mxu0 }
 0x139   :  { %3785 = vmatmul.mubr.msk.f32.gmra.mrb[12].mxu1 %vm740_vm1, %v2623_v0  ;;  %v4992_v48 = vmul.f32 %v4439_v60, %v4974_v10  ;;  %v979_v39 = vmul.f32 %v4997_v15, %v4849_v55  ;;  %v1112_v17 = vmul.f32 %v5004_v8, %v4851_v47  ;;  %v1962_v2 = vadd.f32 %v1898_v11, %v1765_v53  ;;  %v5017_v55 = vld [vmem:[%s6871_s3 + $0x2] ss:$0 sm:$0xff]  ;;  %v5023_v47 = vld [vmem:[#allocation2 + $0xfa] sm:$0xff] }
 0x13a   :  { %v1569_v32 = vadd.f32 %v1505_v6, %v1372_v54  ;;  %v1309_v34 = vmul.f32 %v5017_v55, %v4859_v61  ;;  %v1506_v3 = vmul.f32 %v4414_v40, %v4922_v62  ;;  %6875 = vst [vmem:[#allocation3_spill] sm:$0xff] %v5025_v41  ;;  %v2553_v19 = vadd.f32 %v4918_v29, %v2356_v44 }
 0x13b   :  { %v1176_v0 = vadd.f32 %v1112_v17, %v979_v39  ;;  %v1703_v11 = vmul.f32 %v4404_v37, %v4924_v27  ;;  %v1900_v6 = vmul.f32 %v4409_v38, %v4933_v22  ;;  %v2160_v1 = vadd.f32 %v2096_v56, %v1962_v2  ;;  %v5046_v37 = vld [vmem:[%s6870_s2] ss:$0 sm:$0xff]  ;;  %v5050_v56 = vpop.f32.mrb[50].mxu0 }
 0x13c   :  { %v1766_v53 = vadd.f32 %v1702_v20, %v1569_v32  ;;  %v2098_v61 = vmul.f32 %v4444_v63, %v5008_v52  ;;  %v5036_v40 = vmul.f32 %v4434_v59, %v5010_v14  ;;  %v2624_v54 = vadd.f32 %v4509_v4, %v2553_v19  ;;  %6876 = vst [vmem:[#allocation4_spill] sm:$0xff] %v5050_v56  ;;  %v5057_v39 = vpop.f32.mrb[51].mxu0  ;;  %v5072_v19 = vld [vmem:[%s6871_s3 + $0x3] ss:$0 sm:$0xff] }
 0x13d   :  { %v1373_v41 = vadd.f32 %v1309_v34, %v1176_v0  ;;  %v5041_v29 = vmul.f32 %v4439_v60, %v5023_v47  ;;  %v523_v38 = vadd.f32 %v5046_v37, %v4761_v49  ;;  %v2357_v59 = vadd.f32 %v4946_v57, %v2160_v1  ;;  %6877 = vst [vmem:[#allocation5_spill] sm:$0xff] %v5057_v39  ;;  %v5064_v57 = vld [vmem:[#allocation2 + $0x108] sm:$0xff]  ;;  %v5089_v0 = vld [vmem:[%s6871_s3 + $0x5] ss:$0 sm:$0xff] }
 0x13e   :  { %v1963_v20 = vadd.f32 %v1899_v23, %v1766_v53  ;;  %v518_v44 = vadd.f32 %v5046_v37, %v4769_v33  ;;  %v980_v60 = vmul.f32 %v4997_v15, %v4892_v31  ;;  %3787 = vmatprep.mubr.msk.f32.mxu1 %vm740_vm1, %v2624_v54  ;;  %v1113_v49 = vmul.f32 %v5004_v8, %v4894_v25  ;;  %v5066_v23 = vld [vmem:[#allocation2 + $0x109] sm:$0xff] }
 0x13f   :  { %v1570_v17 = vadd.f32 %v1506_v3, %v1373_v41  ;;  %v709_v2 = vmax.f32 %v523_v38, 0.0  ;;  %v1310_v32 = vmul.f32 %v5017_v55, %v4899_v21  ;;  %v2554_v33 = vadd.f32 %v4952_v26, %v2357_v59  ;;  %v5076_v25 = vld [vmem:[#allocation2 + $0x10a] sm:$0xff]  ;;  %v5082_v26 = vld [vmem:[%s6871_s3 + $0x4] ss:$0 sm:$0xff]  ;;  %v5102_v59 = vld [vmem:[%s6871_s3 + $0x7] ss:$0 sm:$0xff] }
 0x140   :  { %v2161_v34 = vadd.f32 %v2097_v13, %v1963_v20  ;;  %v708_v31 = vmax.f32 %v518_v44, 0.0  ;;  %v1507_v3 = vmul.f32 %v5072_v19, %v4966_v45  ;;  %v1177_v21 = vadd.f32 %v1113_v49, %v980_v60  ;;  %v5119_v49 = vld [vmem:[#allocation2 + $0x110] sm:$0xff] }
 0x141   :  { %v1767_v41 = vadd.f32 %v1703_v11, %v1570_v17  ;;  %862 = vst.msk [vmem:[#allocation2 + $0x1d1] sm:$0xff] %vm740_vm1, %v709_v2  ;;  %v1704_v13 = vmul.f32 %v5082_v26, %v4968_v50  ;;  %v1901_v1 = vmul.f32 %v5089_v0, %v4974_v10  ;;  %v5093_v11 = vpop.f32.mrb[52].mxu0  ;;  %v2625_v53 = vadd.f32 %v4509_v4, %v2554_v33  ;;  %v5121_v33 = vld [vmem:[#allocation2 + $0x111] sm:$0xff] }
 0x142   :  { %6878 = vst [vmem:[#allocation6_spill] sm:$0xff] %v5093_v11  ;;  %v2358_v54 = vadd.f32 %v2294_v30, %v2161_v34  ;;  %861 = vst.msk [vmem:[#allocation2 + $0x1c9] sm:$0xff] %vm740_vm1, %v708_v31  ;;  %v2099_v38 = vmul.f32 %v4444_v63, %v5064_v57  ;;  %v2296_v20 = vmul.f32 %v5102_v59, %v5066_v23  ;;  %v5106_v44 = vpop.f32.mrb[53].mxu0  ;;  %v5111_v30 = vld [vmem:[%s6871_s3 + $0x8] ss:$0 sm:$0xff] }
 0x143   :  { %6879 = vst [vmem:[#allocation7_spill] sm:$0xff] %v5106_v44  ;;  %v1964_v60 = vadd.f32 %v1900_v6, %v1767_v41  ;;  %v1374_v17 = vadd.f32 %v1310_v32, %v1177_v21  ;;  %v5115_v63 = vmul.f32 %v5111_v30, %v5076_v25  ;;  %v981_v2 = vmul.f32 %v4997_v15, %v4922_v62  ;;  %v5131_v41 = vld [vmem:[#allocation2 + $0x112] sm:$0xff] }
 0x144   :  { %3788 = vmatmul.mubr.msk.f32.gmra.mrb[14].mxu1 %vm740_vm1, %v2625_v53  ;;  %v2555_v6 = vadd.f32 %v4992_v48, %v2358_v54  ;;  %v1114_v32 = vmul.f32 %v5004_v8, %v4924_v27  ;;  %v1311_v34 = vmul.f32 %v5017_v55, %v4933_v22  ;;  %v1508_v31 = vmul.f32 %v5072_v19, %v5008_v52  ;;  %v5137_v48 = vpop.f32.mrb[54].mxu0  ;;  %v5143_v22 = vld [vmem:[%s6871_s3 + $0x6] ss:$0 sm:$0xff] }
 0x145   :  { %v2162_v62 = vadd.f32 %v2098_v61, %v1964_v60  ;;  %v1571_v21 = vadd.f32 %v1507_v3, %v1374_v17  ;;  %v1705_v44 = vmul.f32 %v5082_v26, %v5010_v14  ;;  %v1902_v53 = vmul.f32 %v5089_v0, %v5023_v47  ;;  %6880 = vst [vmem:[#allocation8_spill] sm:$0xff] %v5137_v48  ;;  %v5149_v60 = vpop.f32.mrb[55].mxu0 }
 0x146   :  { %v2626_v27 = vadd.f32 %v4509_v4, %v2555_v6  ;;  %v1178_v54 = vadd.f32 %v1114_v32, %v981_v2  ;;  %v2100_v61 = vmul.f32 %v5143_v22, %v5119_v49  ;;  %v2297_v3 = vmul.f32 %v5102_v59, %v5121_v33  ;;  %6881 = vst [vmem:[#allocation9_spill] sm:$0xff] %v5149_v60 }
 0x147   :  { %v2359_v17 = vadd.f32 %v5036_v40, %v2162_v62  ;;  %v1768_v11 = vadd.f32 %v1704_v13, %v1571_v21  ;;  %v5154_v6 = vmul.f32 %v5111_v30, %v5131_v41  ;;  %v533_v2 = vadd.f32 %v5046_v37, %v4794_v9  ;;  %v5168_v9 = vld [vmem:[#allocation2 + $0x120] sm:$0xff] }
 0x148   :  { %3790 = vmatprep.mubr.msk.f32.mxu1 %vm740_vm1, %v2626_v27  ;;  %v1375_v32 = vadd.f32 %v1311_v34, %v1178_v54  ;;  %v528_v48 = vadd.f32 %v5046_v37, %v4801_v18  ;;  %v982_v39 = vmul.f32 %v4997_v15, %v4966_v45  ;;  %v1115_v40 = vmul.f32 %v5004_v8, %v4968_v50  ;;  %v5170_v27 = vld [vmem:[#allocation2 + $0x121] sm:$0xff]  ;;  %v5172_v34 = vpop.f32.mrb[56].mxu0 }
 0x149   :  { %v2556_v13 = vadd.f32 %v5041_v29, %v2359_v17  ;;  %v1965_v62 = vadd.f32 %v1901_v1, %v1768_v11  ;;  %v711_v21 = vmax.f32 %v533_v2, 0.0  ;;  %v1312_v60 = vmul.f32 %v5017_v55, %v4974_v10  ;;  %v5176_v50 = vld [vmem:[#allocation2 + $0x122] sm:$0xff]  ;;  %v5178_v29 = vpop.f32.mrb[57].mxu0 }
 0x14a   :  { %v1572_v18 = vadd.f32 %v1508_v31, %v1375_v32  ;;  %v710_v54 = vmax.f32 %v528_v48, 0.0  ;;  %v1179_v56 = vadd.f32 %v1115_v40, %v982_v39  ;;  %v1509_v45 = vmul.f32 %v5072_v19, %v5064_v57  ;;  %v5198_v40 = vld [vmem:[#allocation2 + $0x128] sm:$0xff] }
 0x14b   :  { %v2627_v1 = vadd.f32 %v4509_v4, %v2556_v13  ;;  %v2163_v11 = vadd.f32 %v2099_v38, %v1965_v62  ;;  %864 = vst.msk [vmem:[#allocation2 + $0x1e9] sm:$0xff] %vm740_vm1, %v711_v21  ;;  %v1706_v10 = vmul.f32 %v5082_v26, %v5066_v23  ;;  %v1903_v31 = vmul.f32 %v5089_v0, %v5076_v25  ;;  %v5206_v21 = vld [vmem:[#allocation2 + $0x12a] sm:$0xff] }
 0x14c   :  { %v1769_v48 = vadd.f32 %v1705_v44, %v1572_v18  ;;  %863 = vst.msk [vmem:[#allocation2 + $0x1e1] sm:$0xff] %vm740_vm1, %v710_v54  ;;  %v1376_v39 = vadd.f32 %v1312_v60, %v1179_v56  ;;  %v2101_v17 = vmul.f32 %v5143_v22, %v5168_v9  ;;  %v2298_v2 = vmul.f32 %v5102_v59, %v5170_v27  ;;  %v5200_v56 = vld [vmem:[#allocation2 + $0x129] sm:$0xff] }
 0x14d   :  { %3791 = vmatmul.mubr.msk.f32.gmra.mrb[16].mxu1 %vm740_vm1, %v2627_v1  ;;  %v2360_v4 = vadd.f32 %v2296_v20, %v2163_v11  ;;  %v2495_v38 = vmul.f32 %v5111_v30, %v5176_v50  ;;  %v983_v32 = vmul.f32 %v4997_v15, %v5008_v52  ;;  %v1116_v44 = vmul.f32 %v5004_v8, %v5010_v14  ;;  %v5217_v11 = vpop.f32.mrb[58].mxu0 }
 0x14e   :  { %v1966_v60 = vadd.f32 %v1902_v53, %v1769_v48  ;;  %v1573_v13 = vadd.f32 %v1509_v45, %v1376_v39  ;;  %v1313_v62 = vmul.f32 %v5017_v55, %v5023_v47  ;;  %v1510_v20 = vmul.f32 %v5072_v19, %v5119_v49  ;;  %6882 = vst [vmem:[#allocation10_spill] sm:$0xff] %v5217_v11  ;;  %v5240_v11 = vld [vmem:[#allocation2 + $0x138] sm:$0xff] }
 0x14f   :  { %v2557_v18 = vadd.f32 %v5115_v63, %v2360_v4  ;;  %v1180_v52 = vadd.f32 %v1116_v44, %v983_v32  ;;  %v1707_v14 = vmul.f32 %v5082_v26, %v5121_v33  ;;  %v1904_v54 = vmul.f32 %v5089_v0, %v5131_v41  ;;  %v5222_v63 = vld [vmem:[%s6872_s4] ss:$0 sm:$0xff]  ;;  %v5229_v4 = vpop.f32.mrb[59].mxu0 }
 0x150   :  { %v2164_v1 = vadd.f32 %v2100_v61, %v1966_v60  ;;  %v1770_v53 = vadd.f32 %v1706_v10, %v1573_v13  ;;  %v2102_v45 = vmul.f32 %v5143_v22, %v5198_v40  ;;  %v2299_v47 = vmul.f32 %v5102_v59, %v5200_v56 }
 0x151   :  { %v2628_v48 = vadd.f32 %v5222_v63, %v2557_v18  ;;  %v1377_v39 = vadd.f32 %v1313_v62, %v1180_v52  ;;  %v2496_v61 = vmul.f32 %v5111_v30, %v5206_v21  ;;  %v543_v10 = vadd.f32 %v5046_v37, %v4823_v5 }
 0x152   :  { %v2361_v32 = vadd.f32 %v2297_v3, %v2164_v1  ;;  %v1967_v44 = vadd.f32 %v1903_v31, %v1770_v53  ;;  %v538_v60 = vadd.f32 %v5046_v37, %v4829_v28  ;;  %v984_v13 = vmul.f32 %v4997_v15, %v5064_v57  ;;  %v5242_v3 = vld [vmem:[#allocation2 + $0x139] sm:$0xff] }
 0x153   :  { %3793 = vmatprep.mubr.msk.f32.mxu1 %vm740_vm1, %v2628_v48  ;;  %v1574_v18 = vadd.f32 %v1510_v20, %v1377_v39  ;;  %v713_v62 = vmax.f32 %v543_v10, 0.0  ;;  %v1117_v52 = vmul.f32 %v5004_v8, %v5066_v23  ;;  %v1314_v5 = vmul.f32 %v5017_v55, %v5076_v25  ;;  %v5247_v53 = vld [vmem:[#allocation2 + $0x13a] sm:$0xff] }
 0x154   :  { %v2558_v31 = vadd.f32 %v5154_v6, %v2361_v32  ;;  %v2165_v28 = vadd.f32 %v2101_v17, %v1967_v44  ;;  %v712_v1 = vmax.f32 %v538_v60, 0.0  ;;  %v1511_v57 = vmul.f32 %v5072_v19, %v5168_v9 }
 0x155   :  { %v1771_v20 = vadd.f32 %v1707_v14, %v1574_v18  ;;  %866 = vst.msk [vmem:[#allocation2 + $0x201] sm:$0xff] %vm740_vm1, %v713_v62  ;;  %v1181_v23 = vadd.f32 %v1117_v52, %v984_v13  ;;  %v1708_v25 = vmul.f32 %v5082_v26, %v5170_v27  ;;  %v1905_v48 = vmul.f32 %v5089_v0, %v5176_v50  ;;  %v5264_v13 = vld [vmem:[#allocation2 + $0x140] sm:$0xff] }
 0x156   :  { %v2629_v39 = vadd.f32 %v5222_v63, %v2558_v31  ;;  %v2362_v6 = vadd.f32 %v2298_v2, %v2165_v28  ;;  %865 = vst.msk [vmem:[#allocation2 + $0x1f9] sm:$0xff] %vm740_vm1, %v712_v1  ;;  %v2103_v17 = vmul.f32 %v5143_v22, %v5240_v11  ;;  %v2300_v14 = vmul.f32 %v5102_v59, %v5242_v3  ;;  %v5266_v18 = vld [vmem:[#allocation2 + $0x141] sm:$0xff] }
 0x157   :  { %v1968_v10 = vadd.f32 %v1904_v54, %v1771_v20  ;;  %v1378_v32 = vadd.f32 %v1314_v5, %v1181_v23  ;;  %v2497_v44 = vmul.f32 %v5111_v30, %v5247_v53  ;;  %v985_v60 = vmul.f32 %v4997_v15, %v5119_v49  ;;  %v5275_v5 = vld [vmem:[#allocation2 + $0x142] sm:$0xff] }
 0x158   :  { %3794 = vmatmul.mubr.msk.f32.gmra.mrb[18].mxu1 %vm740_vm1, %v2629_v39  ;;  %v2559_v2 = vadd.f32 %v2495_v38, %v2362_v6  ;;  %v1118_v62 = vmul.f32 %v5004_v8, %v5121_v33  ;;  %v1315_v54 = vmul.f32 %v5017_v55, %v5131_v41  ;;  %v1512_v52 = vmul.f32 %v5072_v19, %v5198_v40  ;;  %v5281_v38 = vpop.f32.mrb[60].mxu0 }
 0x159   :  { %v2166_v31 = vadd.f32 %v2102_v45, %v1968_v10  ;;  %v1575_v49 = vadd.f32 %v1511_v57, %v1378_v32  ;;  %v1709_v28 = vmul.f32 %v5082_v26, %v5200_v56  ;;  %v1906_v1 = vmul.f32 %v5089_v0, %v5206_v21  ;;  %v5288_v39 = vpop.f32.mrb[61].mxu0 }
 0x15a   :  { %v2630_v33 = vadd.f32 %v5222_v63, %v2559_v2  ;;  %v1182_v20 = vadd.f32 %v1118_v62, %v985_v60  ;;  %v2104_v41 = vmul.f32 %v5143_v22, %v5264_v13  ;;  %v2301_v23 = vmul.f32 %v5102_v59, %v5266_v18  ;;  %6883 = vst [vmem:[#allocation11_spill] sm:$0xff] %v5288_v39  ;;  %v5305_v39 = vld [vmem:[#allocation2 + $0x150] sm:$0xff] }
 0x15b   :  { %v2363_v45 = vadd.f32 %v2299_v47, %v2166_v31  ;;  %v1772_v57 = vadd.f32 %v1708_v25, %v1575_v49  ;;  %v5292_v6 = vmul.f32 %v5111_v30, %v5275_v5  ;;  %v553_v10 = vadd.f32 %v5046_v37, %v4853_v42  ;;  %v5307_v42 = vld [vmem:[#allocation2 + $0x151] sm:$0xff] }
 0x15c   :  { %3796 = vmatprep.mubr.msk.f32.mxu1 %vm740_vm1, %v2630_v33  ;;  %v1379_v32 = vadd.f32 %v1315_v54, %v1182_v20  ;;  %v548_v60 = vadd.f32 %v5046_v37, %v4861_v43  ;;  %v986_v2 = vmul.f32 %v4997_v15, %v5168_v9  ;;  %v1119_v47 = vmul.f32 %v5004_v8, %v5170_v27  ;;  %v5311_v9 = vld [vmem:[#allocation2 + $0x152] sm:$0xff] }
 0x15d   :  { %v2560_v25 = vadd.f32 %v2496_v61, %v2363_v45  ;;  %v1969_v62 = vadd.f32 %v1905_v48, %v1772_v57  ;;  %v715_v31 = vmax.f32 %v553_v10, 0.0  ;;  %v1316_v49 = vmul.f32 %v5017_v55, %v5176_v50 }
 0x15e   :  { %v1576_v54 = vadd.f32 %v1512_v52, %v1379_v32  ;;  %v714_v33 = vmax.f32 %v548_v60, 0.0  ;;  %v1183_v20 = vadd.f32 %v1119_v47, %v986_v2  ;;  %v1513_v43 = vmul.f32 %v5072_v19, %v5240_v11  ;;  %v5331_v2 = vld [vmem:[#allocation2 + $0x158] sm:$0xff] }
 0x15f   :  { %v2631_v27 = vadd.f32 %v5222_v63, %v2560_v25  ;;  %v2167_v61 = vadd.f32 %v2103_v17, %v1969_v62  ;;  %868 = vst.msk [vmem:[#allocation2 + $0x219] sm:$0xff] %vm740_vm1, %v715_v31  ;;  %v1710_v50 = vmul.f32 %v5082_v26, %v5242_v3  ;;  %v1907_v48 = vmul.f32 %v5089_v0, %v5247_v53  ;;  %v5333_v47 = vld [vmem:[#allocation2 + $0x159] sm:$0xff] }
 0x160   :  { %v1773_v45 = vadd.f32 %v1709_v28, %v1576_v54  ;;  %867 = vst.msk [vmem:[#allocation2 + $0x211] sm:$0xff] %vm740_vm1, %v714_v33  ;;  %v1380_v52 = vadd.f32 %v1316_v49, %v1183_v20  ;;  %v2105_v57 = vmul.f32 %v5143_v22, %v5305_v39  ;;  %v2302_v10 = vmul.f32 %v5102_v59, %v5307_v42  ;;  %v5339_v49 = vld [vmem:[#allocation2 + $0x15a] sm:$0xff] }
 0x161   :  { %3797 = vmatmul.mubr.msk.f32.gmra.mrb[20].mxu1 %vm740_vm1, %v2631_v27  ;;  %v2364_v17 = vadd.f32 %v2300_v14, %v2167_v61  ;;  %v2499_v32 = vmul.f32 %v5111_v30, %v5311_v9  ;;  %v987_v60 = vmul.f32 %v4997_v15, %v5198_v40  ;;  %v1120_v28 = vmul.f32 %v5004_v8, %v5200_v56 }
 0x162   :  { %v1970_v25 = vadd.f32 %v1906_v1, %v1773_v45  ;;  %v1577_v62 = vadd.f32 %v1513_v43, %v1380_v52  ;;  %v1317_v31 = vmul.f32 %v5017_v55, %v5206_v21  ;;  %v1514_v14 = vmul.f32 %v5072_v19, %v5264_v13  ;;  %v5349_v43 = vpop.f32.mrb[62].mxu0 }
 0x163   :  { %v2561_v54 = vadd.f32 %v2497_v44, %v2364_v17  ;;  %v1184_v33 = vadd.f32 %v1120_v28, %v987_v60  ;;  %v1711_v40 = vmul.f32 %v5082_v26, %v5266_v18  ;;  %v1908_v56 = vmul.f32 %v5089_v0, %v5275_v5  ;;  %v5356_v17 = vpop.f32.mrb[63].mxu0 }
 0x164   :  { %v2168_v20 = vadd.f32 %v2104_v41, %v1970_v25  ;;  %v1774_v27 = vadd.f32 %v1710_v50, %v1577_v62  ;;  %v2106_v1 = vmul.f32 %v5143_v22, %v5331_v2  ;;  %v2303_v21 = vmul.f32 %v5102_v59, %v5333_v47 }
 0x165   :  { %v2632_v61 = vadd.f32 %v5222_v63, %v2561_v54  ;;  %v1381_v44 = vadd.f32 %v1317_v31, %v1184_v33  ;;  %v2500_v45 = vmul.f32 %v5111_v30, %v5339_v49  ;;  %v563_v52 = vadd.f32 %v5046_v37, %v4879_v46  ;;  %v5367_v54 = vld [vmem:[#allocation2 + $0x168] sm:$0xff] }
 0x166   :  { %v2365_v41 = vadd.f32 %v2301_v23, %v2168_v20  ;;  %v1971_v50 = vadd.f32 %v1907_v48, %v1774_v27  ;;  %v558_v60 = vadd.f32 %v5046_v37, %v4885_v58  ;;  %v988_v28 = vmul.f32 %v4997_v15, %v5240_v11  ;;  %v5369_v23 = vld [vmem:[#allocation2 + $0x169] sm:$0xff] }
 0x167   :  { %3799 = vmatprep.mubr.msk.f32.mxu1 %vm740_vm1, %v2632_v61  ;;  %v1578_v25 = vadd.f32 %v1514_v14, %v1381_v44  ;;  %v717_v62 = vmax.f32 %v563_v52, 0.0  ;;  %v1121_v31 = vmul.f32 %v5004_v8, %v5242_v3  ;;  %v1318_v46 = vmul.f32 %v5017_v55, %v5247_v53  ;;  %v5374_v20 = vld [vmem:[#allocation2 + $0x16a] sm:$0xff] }
 0x168   :  { %v2562_v48 = vadd.f32 %v5292_v6, %v2365_v41  ;;  %v2169_v58 = vadd.f32 %v2105_v57, %v1971_v50  ;;  %v716_v33 = vmax.f32 %v558_v60, 0.0  ;;  %v1515_v11 = vmul.f32 %v5072_v19, %v5305_v39  ;;  %v5391_v60 = vld [vmem:[#allocation2 + $0x170] sm:$0xff] }
 0x169   :  { %v1775_v14 = vadd.f32 %v1711_v40, %v1578_v25  ;;  %870 = vst.msk [vmem:[#allocation2 + $0x231] sm:$0xff] %vm740_vm1, %v717_v62  ;;  %v1185_v3 = vadd.f32 %v1121_v31, %v988_v28  ;;  %v1712_v53 = vmul.f32 %v5082_v26, %v5307_v42  ;;  %v1909_v27 = vmul.f32 %v5089_v0, %v5311_v9  ;;  %v5393_v28 = vld [vmem:[#allocation2 + $0x171] sm:$0xff] }
 0x16a   :  { %v2633_v61 = vadd.f32 %v5222_v63, %v2562_v48  ;;  %v2366_v6 = vadd.f32 %v2302_v10, %v2169_v58  ;;  %869 = vst.msk [vmem:[#allocation2 + $0x229] sm:$0xff] %vm740_vm1, %v716_v33  ;;  %v2107_v57 = vmul.f32 %v5143_v22, %v5367_v54  ;;  %v2304_v40 = vmul.f32 %v5102_v59, %v5369_v23  ;;  %v5402_v31 = vld [vmem:[#allocation2 + $0x172] sm:$0xff] }
 0x16b   :  { %v1972_v44 = vadd.f32 %v1908_v56, %v1775_v14  ;;  %v1382_v52 = vadd.f32 %v1318_v46, %v1185_v3  ;;  %v2501_v41 = vmul.f32 %v5111_v30, %v5374_v20  ;;  %v989_v50 = vmul.f32 %v4997_v15, %v5264_v13 }
 0x16c   :  { %3800 = vmatmul.mubr.msk.f32.gmra.mrb[22].mxu1 %vm740_vm1, %v2633_v61  ;;  %v2563_v10 = vadd.f32 %v2499_v32, %v2366_v6  ;;  %v1122_v25 = vmul.f32 %v5004_v8, %v5266_v18  ;;  %v1319_v56 = vmul.f32 %v5017_v55, %v5275_v5  ;;  %v1516_v62 = vmul.f32 %v5072_v19, %v5331_v2 }
 0x16d   :  { %v2170_v46 = vadd.f32 %v2106_v1, %v1972_v44  ;;  %v1579_v13 = vadd.f32 %v1515_v11, %v1382_v52  ;;  %v1713_v48 = vmul.f32 %v5082_v26, %v5333_v47  ;;  %v1910_v58 = vmul.f32 %v5089_v0, %v5339_v49 }
 0x16e   :  { %v2634_v32 = vadd.f32 %v5222_v63, %v2563_v10  ;;  %v1186_v33 = vadd.f32 %v1122_v25, %v989_v50  ;;  %v2108_v18 = vmul.f32 %v5143_v22, %v5391_v60  ;;  %v2305_v5 = vmul.f32 %v5102_v59, %v5393_v28  ;;  %v2040_v25 = vld [vmem:[#allocation2 + $0x180] sm:$0xff] }
 0x16f   :  { %v2367_v14 = vadd.f32 %v2303_v21, %v2170_v46  ;;  %v1776_v3 = vadd.f32 %v1712_v53, %v1579_v13  ;;  %v5415_v1 = vmul.f32 %v5111_v30, %v5402_v31  ;;  %v573_v11 = vadd.f32 %v5046_v37, %v4906_v12  ;;  %v2237_v12 = vld [vmem:[#allocation2 + $0x181] sm:$0xff] }
 0x170   :  { %3802 = vmatprep.mubr.msk.f32.mxu1 %vm740_vm1, %v2634_v32  ;;  %v1383_v61 = vadd.f32 %v1319_v56, %v1186_v33  ;;  %v568_v6 = vadd.f32 %v5046_v37, %v4914_v51  ;;  %v990_v44 = vmul.f32 %v4997_v15, %v5305_v39  ;;  %v1123_v21 = vmul.f32 %v5004_v8, %v5307_v42  ;;  %v2434_v32 = vld [vmem:[#allocation2 + $0x182] sm:$0xff] }
 0x171   :  { %v2564_v53 = vadd.f32 %v2500_v45, %v2367_v14  ;;  %v1973_v52 = vadd.f32 %v1909_v27, %v1776_v3  ;;  %v719_v50 = vmax.f32 %v573_v11, 0.0  ;;  %v1320_v10 = vmul.f32 %v5017_v55, %v5311_v9 }
 0x172   :  { %v1580_v46 = vadd.f32 %v1516_v62, %v1383_v61  ;;  %v718_v13 = vmax.f32 %v568_v6, 0.0  ;;  %v1187_v56 = vadd.f32 %v1123_v21, %v990_v44  ;;  %v1517_v51 = vmul.f32 %v5072_v19, %v5367_v54  ;;  %v2041_v6 = vld [vmem:[#allocation2 + $0x188] sm:$0xff] }
 0x173   :  { %v2635_v39 = vadd.f32 %v5222_v63, %v2564_v53  ;;  %v2171_v33 = vadd.f32 %v2107_v57, %v1973_v52  ;;  %872 = vst.msk [vmem:[#allocation2 + $0x249] sm:$0xff] %vm740_vm1, %v719_v50  ;;  %v1714_v42 = vmul.f32 %v5082_v26, %v5369_v23  ;;  %v1911_v9 = vmul.f32 %v5089_v0, %v5374_v20  ;;  %v2435_v50 = vld [vmem:[#allocation2 + $0x18a] sm:$0xff] }
 0x174   :  { %v1777_v45 = vadd.f32 %v1713_v48, %v1580_v46  ;;  %871 = vst.msk [vmem:[#allocation2 + $0x241] sm:$0xff] %vm740_vm1, %v718_v13  ;;  %v1384_v27 = vadd.f32 %v1320_v10, %v1187_v56  ;;  %v2109_v62 = vmul.f32 %v5143_v22, %v2040_v25  ;;  %v2306_v14 = vmul.f32 %v5102_v59, %v2237_v12  ;;  %v2238_v48 = vld [vmem:[#allocation2 + $0x189] sm:$0xff] }
 0x175   :  { %3803 = vmatmul.mubr.msk.f32.gmra.mrb[24].mxu1 %vm740_vm1, %v2635_v39  ;;  %v2368_v3 = vadd.f32 %v2304_v40, %v2171_v33  ;;  %v2503_v57 = vmul.f32 %v5111_v30, %v2434_v32  ;;  %v991_v11 = vmul.f32 %v4997_v15, %v5331_v2  ;;  %v1124_v61 = vmul.f32 %v5004_v8, %v5333_v47 }
 0x176   :  { %v1974_v44 = vadd.f32 %v1910_v58, %v1777_v45  ;;  %v1581_v21 = vadd.f32 %v1517_v51, %v1384_v27  ;;  %v1321_v53 = vmul.f32 %v5017_v55, %v5339_v49  ;;  %v1518_v52 = vmul.f32 %v5072_v19, %v5391_v60 }
 0x177   :  { %v2565_v40 = vadd.f32 %v2501_v41, %v2368_v3  ;;  %v1188_v10 = vadd.f32 %v1124_v61, %v991_v11  ;;  %v1715_v46 = vmul.f32 %v5082_v26, %v5393_v28  ;;  %v1912_v2 = vmul.f32 %v5089_v0, %v5402_v31 }
 0x178   :  { %v2172_v47 = vadd.f32 %v2108_v18, %v1974_v44  ;;  %v1778_v13 = vadd.f32 %v1714_v42, %v1581_v21  ;;  %v2110_v58 = vmul.f32 %v5143_v22, %v2041_v6  ;;  %v2307_v56 = vmul.f32 %v5102_v59, %v2238_v48  ;;  %v2042_v44 = vld [vmem:[#allocation2 + $0x198] sm:$0xff] }
 0x179   :  { %v2636_v49 = vadd.f32 %v5222_v63, %v2565_v40  ;;  %v1385_v51 = vadd.f32 %v1321_v53, %v1188_v10  ;;  %v5457_v39 = vmul.f32 %v5111_v30, %v2435_v50  ;;  %v583_v41 = vadd.f32 %v5046_v37, %v4939_v35  ;;  %v2239_v35 = vld [vmem:[#allocation2 + $0x199] sm:$0xff] }
 0x17a   :  { %v2369_v33 = vadd.f32 %v2305_v5, %v2172_v47  ;;  %v1975_v45 = vadd.f32 %v1911_v9, %v1778_v13  ;;  %v578_v27 = vadd.f32 %v5046_v37, %v4948_v16  ;;  %v992_v18 = vmul.f32 %v4997_v15, %v5367_v54  ;;  %v2436_v53 = vld [vmem:[#allocation2 + $0x19a] sm:$0xff] }
 0x17b   :  { %3805 = vmatprep.mubr.msk.f32.mxu1 %vm740_vm1, %v2636_v49  ;;  %v1582_v42 = vadd.f32 %v1518_v52, %v1385_v51  ;;  %v721_v3 = vmax.f32 %v583_v41, 0.0  ;;  %v1125_v11 = vmul.f32 %v5004_v8, %v5369_v23  ;;  %v1322_v61 = vmul.f32 %v5017_v55, %v5374_v20  ;;  %v2043_v13 = vld [vmem:[#allocation2 + $0x1a0] sm:$0xff] }
 0x17c   :  { %v2566_v5 = vadd.f32 %v5415_v1, %v2369_v33  ;;  %v2173_v9 = vadd.f32 %v2109_v62, %v1975_v45  ;;  %v720_v21 = vmax.f32 %v578_v27, 0.0  ;;  %v1519_v16 = vmul.f32 %v5072_v19, %v2040_v25  ;;  %v2437_v41 = vld [vmem:[#allocation2 + $0x1a2] sm:$0xff] }
 0x17d   :  { %v1779_v54 = vadd.f32 %v1715_v46, %v1582_v42  ;;  %874 = vst.msk [vmem:[#allocation2 + $0x261] sm:$0xff] %vm740_vm1, %v721_v3  ;;  %v1189_v52 = vadd.f32 %v1125_v11, %v992_v18  ;;  %v1716_v40 = vmul.f32 %v5082_v26, %v2237_v12  ;;  %v1913_v23 = vmul.f32 %v5089_v0, %v2434_v32  ;;  %v2240_v32 = vld [vmem:[#allocation2 + $0x1a1] sm:$0xff]  ;;  %v925_v18 = vld [vmem:[#allocation2 + $0x1b0] sm:$0xff] }
 0x17e   :  { %v2637_v10 = vadd.f32 %v5222_v63, %v2566_v5  ;;  %v2370_v20 = vadd.f32 %v2306_v14, %v2173_v9  ;;  %873 = vst.msk [vmem:[#allocation2 + $0x259] sm:$0xff] %vm740_vm1, %v720_v21  ;;  %v2111_v1 = vmul.f32 %v5143_v22, %v2042_v44  ;;  %v5479_v62 = vmul.f32 %v5102_v59, %v2239_v35  ;;  %v1058_v42 = vld [vmem:[#allocation2 + $0x1b1] sm:$0xff]  ;;  %v1649_v21 = vld [vmem:[#allocation2 + $0x1c9] sm:$0xff] }
 0x17f   :  { %v1976_v25 = vadd.f32 %v1912_v2, %v1779_v54  ;;  %v1386_v47 = vadd.f32 %v1322_v61, %v1189_v52  ;;  %v5482_v46 = vmul.f32 %v5111_v30, %v2436_v53  ;;  %v993_v12 = vmul.f32 %v4997_v15, %v5391_v60 }
 0x180   :  { %3806 = vmatmul.mubr.msk.f32.gmra.mrb[26].mxu1 %vm740_vm1, %v2637_v10  ;;  %v2567_v14 = vadd.f32 %v2503_v57, %v2370_v20  ;;  %v1126_v49 = vmul.f32 %v5004_v8, %v5393_v28  ;;  %v1323_v51 = vmul.f32 %v5017_v55, %v5402_v31  ;;  %v1520_v2 = vmul.f32 %v5072_v19, %v2041_v6  ;;  %v1255_v31 = vld [vmem:[#allocation2 + $0x1b2] sm:$0xff] }
 0x181   :  { %v2174_v33 = vadd.f32 %v2110_v58, %v1976_v25  ;;  %v1583_v45 = vadd.f32 %v1519_v16, %v1386_v47  ;;  %v1717_v27 = vmul.f32 %v5082_v26, %v2238_v48  ;;  %v1914_v60 = vmul.f32 %v5089_v0, %v2435_v50  ;;  %v1452_v50 = vld [vmem:[#allocation2 + $0x1c8] sm:$0xff] }
 0x182   :  { %v2638_v3 = vadd.f32 %v5222_v63, %v2567_v14  ;;  %v1190_v57 = vadd.f32 %v1126_v49, %v993_v12  ;;  %v2112_v11 = vmul.f32 %v5143_v22, %v2043_v13  ;;  %v5497_v28 = vmul.f32 %v5102_v59, %v2240_v32  ;;  %v5516_v47 = vld [vmem:[#allocation2 + $0x1e2] sm:$0xff]  ;;  %v926_v12 = vld [vmem:[#allocation2 + $0x1b8] sm:$0xff] }
 0x183   :  { %v2371_v61 = vadd.f32 %v2307_v56, %v2174_v33  ;;  %v1780_v6 = vadd.f32 %v1716_v40, %v1583_v45  ;;  %v5500_v58 = vmul.f32 %v5111_v30, %v2437_v41  ;;  %v593_v48 = vadd.f32 %v5046_v37, %v4970_v7  ;;  %v1846_v56 = vld [vmem:[#allocation2 + $0x1ca] sm:$0xff]  ;;  %v5511_v7 = vld [vmem:[#allocation2 + $0x1e0] sm:$0xff] }
 0x184   :  { %3808 = vmatprep.mubr.msk.f32.mxu1 %vm740_vm1, %v2638_v3  ;;  %v1387_v44 = vadd.f32 %v1323_v51, %v1190_v57  ;;  %v588_v35 = vadd.f32 %v5046_v37, %v4976_v24  ;;  %v994_v5 = vmul.f32 %v4997_v15, %v925_v18  ;;  %v1127_v9 = vmul.f32 %v5004_v8, %v1058_v42  ;;  %v5513_v40 = vld [vmem:[#allocation2 + $0x1e1] sm:$0xff]  ;;  %v1059_v13 = vld [vmem:[#allocation2 + $0x1b9] sm:$0xff]  ;;  %v1453_v51 = vld [vmem:[#allocation2 + $0x1d0] sm:$0xff] }
 0x185   :  { %v2568_v16 = vadd.f32 %v5457_v39, %v2371_v61  ;;  %v1977_v53 = vadd.f32 %v1913_v23, %v1780_v6  ;;  %v723_v54 = vmax.f32 %v593_v48, 0.0  ;;  %v1324_v52 = vmul.f32 %v5017_v55, %v1255_v31  ;;  %v1256_v49 = vld [vmem:[#allocation2 + $0x1ba] sm:$0xff]  ;;  %v1650_v18 = vld [vmem:[#allocation2 + $0x1d1] sm:$0xff]  ;;  %v5533_v31 = vld [vmem:[#allocation2 + $0x1e8] sm:$0xff] }
 0x186   :  { %v1584_v10 = vadd.f32 %v1520_v2, %v1387_v44  ;;  %v722_v20 = vmax.f32 %v588_v35, 0.0  ;;  %v1191_v25 = vadd.f32 %v1127_v9, %v994_v5  ;;  %v1521_v24 = vmul.f32 %v5072_v19, %v1452_v50  ;;  %v5535_v61 = vld [vmem:[#allocation2 + $0x1e9] sm:$0xff] }
 0x187   :  { %v2639_v32 = vadd.f32 %v5222_v63, %v2568_v16  ;;  %v2175_v39 = vadd.f32 %v2111_v1, %v1977_v53  ;;  %876 = vst.msk [vmem:[#allocation2 + $0x279] sm:$0xff] %vm740_vm1, %v723_v54  ;;  %v1718_v23 = vmul.f32 %v5082_v26, %v1649_v21  ;;  %v1915_v14 = vmul.f32 %v5089_v0, %v1846_v56  ;;  %v1847_v1 = vld [vmem:[#allocation2 + $0x1d2] sm:$0xff]  ;;  %v5539_v5 = vld [vmem:[#allocation2 + $0x1ea] sm:$0xff] }
 0x188   :  { %v1781_v2 = vadd.f32 %v1717_v27, %v1584_v10  ;;  %875 = vst.msk [vmem:[#allocation2 + $0x271] sm:$0xff] %vm740_vm1, %v722_v20  ;;  %v1388_v41 = vadd.f32 %v1324_v52, %v1191_v25  ;;  %v2113_v33 = vmul.f32 %v5143_v22, %v5511_v7  ;;  %v2310_v45 = vmul.f32 %v5102_v59, %v5513_v40 }
 0x189   :  { %3809 = vmatmul.mubr.msk.f32.gmra.mrb[28].mxu1 %vm740_vm1, %v2639_v32  ;;  %v2372_v42 = vadd.f32 %v5479_v62, %v2175_v39  ;;  %v2507_v3 = vmul.f32 %v5111_v30, %v5516_v47  ;;  %v995_v27 = vmul.f32 %v4997_v15, %v926_v12  ;;  %v1128_v57 = vmul.f32 %v5004_v8, %v1059_v13 }
 0x18a   :  { %v1978_v6 = vadd.f32 %v1914_v60, %v1781_v2  ;;  %v1585_v48 = vadd.f32 %v1521_v24, %v1388_v41  ;;  %v1325_v44 = vmul.f32 %v5017_v55, %v1256_v49  ;;  %v1522_v35 = vmul.f32 %v5072_v19, %v1453_v51 }
 0x18b   :  { %v2569_v62 = vadd.f32 %v5482_v46, %v2372_v42  ;;  %v1192_v9 = vadd.f32 %v1128_v57, %v995_v27  ;;  %v1719_v16 = vmul.f32 %v5082_v26, %v1650_v18  ;;  %v1916_v53 = vmul.f32 %v5089_v0, %v1847_v1  ;;  %v5560_v42 = vld [vmem:[#allocation2 + $0x1f8] sm:$0xff] }
 0x18c   :  { %v2176_v54 = vadd.f32 %v2112_v11, %v1978_v6  ;;  %v1782_v52 = vadd.f32 %v1718_v23, %v1585_v48  ;;  %v2114_v10 = vmul.f32 %v5143_v22, %v5533_v31  ;;  %v2311_v60 = vmul.f32 %v5102_v59, %v5535_v61  ;;  %v6884_v11 = vld [vmem:[#allocation3_spill] sm:$0xff] }
 0x18d   :  { %v2640_v20 = vadd.f32 %v5222_v63, %v2569_v62  ;;  %v1389_v25 = vadd.f32 %v1325_v44, %v1192_v9  ;;  %v2508_v24 = vmul.f32 %v5111_v30, %v5539_v5  ;;  %v603_v46 = vadd.f32 %v5046_v37, %v5012_v36  ;;  %v5562_v27 = vld [vmem:[#allocation2 + $0x1f9] sm:$0xff] }
 0x18e   :  { %v2373_v12 = vadd.f32 %v5497_v28, %v2176_v54  ;;  %v1979_v13 = vadd.f32 %v1915_v14, %v1782_v52  ;;  %v598_v32 = vadd.f32 %v5046_v37, %v6884_v11  ;;  %v996_v39 = vmul.f32 %v4997_v15, %v1452_v50  ;;  %v5567_v50 = vld [vmem:[#allocation2 + $0x1fa] sm:$0xff] }
 0x18f   :  { %3811 = vmatprep.mubr.msk.f32.mxu1 %vm740_vm1, %v2640_v20  ;;  %v1586_v23 = vadd.f32 %v1522_v35, %v1389_v25  ;;  %v725_v49 = vmax.f32 %v603_v46, 0.0  ;;  %v1129_v2 = vmul.f32 %v5004_v8, %v1649_v21  ;;  %v1326_v41 = vmul.f32 %v5017_v55, %v1846_v56  ;;  %v5585_v52 = vld [vmem:[#allocation2 + $0x200] sm:$0xff] }
 0x190   :  { %v2570_v36 = vadd.f32 %v5500_v58, %v2373_v12  ;;  %v2177_v28 = vadd.f32 %v2113_v33, %v1979_v13  ;;  %v724_v14 = vmax.f32 %v598_v32, 0.0  ;;  %v1523_v57 = vmul.f32 %v5072_v19, %v5511_v7  ;;  %v5587_v20 = vld [vmem:[#allocation2 + $0x201] sm:$0xff] }
 0x191   :  { %v1783_v6 = vadd.f32 %v1719_v16, %v1586_v23  ;;  %878 = vst.msk [vmem:[#allocation2 + $0x291] sm:$0xff] %vm740_vm1, %v725_v49  ;;  %v1193_v48 = vadd.f32 %v1129_v2, %v996_v39  ;;  %v1720_v21 = vmul.f32 %v5082_v26, %v5513_v40  ;;  %v1917_v56 = vmul.f32 %v5089_v0, %v5516_v47  ;;  %v5594_v12 = vld [vmem:[#allocation2 + $0x202] sm:$0xff] }
 0x192   :  { %v2641_v44 = vadd.f32 %v5222_v63, %v2570_v36  ;;  %v2374_v58 = vadd.f32 %v2310_v45, %v2177_v28  ;;  %877 = vst.msk [vmem:[#allocation2 + $0x289] sm:$0xff] %vm740_vm1, %v724_v14  ;;  %v2115_v33 = vmul.f32 %v5143_v22, %v5560_v42  ;;  %v2312_v35 = vmul.f32 %v5102_v59, %v5562_v27  ;;  %v6885_v2 = vld [vmem:[#allocation4_spill] sm:$0xff]  ;;  %v6886_v28 = vld [vmem:[#allocation5_spill] sm:$0xff] }
 0x193   :  { %v1980_v62 = vadd.f32 %v1916_v53, %v1783_v6  ;;  %v1390_v9 = vadd.f32 %v1326_v41, %v1193_v48  ;;  %v5582_v16 = vmul.f32 %v5111_v30, %v5567_v50  ;;  %v997_v54 = vmul.f32 %v4997_v15, %v1453_v51 }
 0x194   :  { %3812 = vmatmul.mubr.msk.f32.gmra.mrb[30].mxu1 %vm740_vm1, %v2641_v44  ;;  %v2571_v45 = vadd.f32 %v2507_v3, %v2374_v58  ;;  %v1130_v25 = vmul.f32 %v5004_v8, %v1650_v18  ;;  %v1327_v46 = vmul.f32 %v5017_v55, %v1847_v1  ;;  %v1524_v53 = vmul.f32 %v5072_v19, %v5533_v31  ;;  %v5620_v58 = vld [vmem:[#allocation2 + $0x210] sm:$0xff] }
 0x195   :  { %v2178_v13 = vadd.f32 %v2114_v10, %v1980_v62  ;;  %v1587_v11 = vadd.f32 %v1523_v57, %v1390_v9  ;;  %v1721_v51 = vmul.f32 %v5082_v26, %v5535_v61  ;;  %v1918_v32 = vmul.f32 %v5089_v0, %v5539_v5  ;;  %v5622_v62 = vld [vmem:[#allocation2 + $0x211] sm:$0xff] }
 0x196   :  { %v2642_v39 = vadd.f32 %v5222_v63, %v2571_v45  ;;  %v1194_v3 = vadd.f32 %v1130_v25, %v997_v54  ;;  %v2116_v18 = vmul.f32 %v5143_v22, %v5585_v52  ;;  %v2313_v1 = vmul.f32 %v5102_v59, %v5587_v20 }
 0x197   :  { %v2375_v23 = vadd.f32 %v2311_v60, %v2178_v13  ;;  %v1784_v49 = vadd.f32 %v1720_v21, %v1587_v11  ;;  %v5607_v10 = vmul.f32 %v5111_v30, %v5594_v12  ;;  %v613_v41 = vadd.f32 %v5046_v37, %v6885_v2  ;;  %v5654_v11 = vld [vmem:[%s6871_s3 + $0x1] ss:$0 sm:$0xff] }
 0x198   :  { %3814 = vmatprep.mubr.msk.f32.mxu1 %vm740_vm1, %v2642_v39  ;;  %v1391_v36 = vadd.f32 %v1327_v46, %v1194_v3  ;;  %v608_v14 = vadd.f32 %v5046_v37, %v6886_v28  ;;  %v998_v57 = vmul.f32 %v4997_v15, %v5511_v7  ;;  %v1131_v60 = vmul.f32 %v5004_v8, %v5513_v40  ;;  %v5626_v15 = vld [vmem:[#allocation2 + $0x212] sm:$0xff] }
 0x199   :  { %v2572_v6 = vadd.f32 %v2508_v24, %v2375_v23  ;;  %v1981_v48 = vadd.f32 %v1917_v56, %v1784_v49  ;;  %v727_v21 = vmax.f32 %v613_v41, 0.0  ;;  %v1328_v44 = vmul.f32 %v5017_v55, %v5516_v47  ;;  %v5660_v39 = vld [vmem:[#allocation2 + $0x219] sm:$0xff]  ;;  %v5665_v49 = vld [vmem:[%s6871_s3 + $0x2] ss:$0 sm:$0xff] }
 0x19a   :  { %v1588_v9 = vadd.f32 %v1524_v53, %v1391_v36  ;;  %v726_v54 = vmax.f32 %v608_v14, 0.0  ;;  %v1195_v45 = vadd.f32 %v1131_v60, %v998_v57  ;;  %v1525_v37 = vmul.f32 %v5072_v19, %v5560_v42  ;;  %v5647_v53 = vld [vmem:[%s6871_s3] ss:$0 sm:$0xff] }
 0x19b   :  { %v2643_v8 = vadd.f32 %v5222_v63, %v2572_v6  ;;  %v2179_v7 = vadd.f32 %v2115_v33, %v1981_v48  ;;  %880 = vst.msk [vmem:[#allocation2 + $0x2a9] sm:$0xff] %vm740_vm1, %v727_v21  ;;  %v1722_v55 = vmul.f32 %v5082_v26, %v5562_v27  ;;  %v1919_v40 = vmul.f32 %v5089_v0, %v5567_v50  ;;  %v5671_v41 = vld [vmem:[#allocation2 + $0x21a] sm:$0xff] }
 0x19c   :  { %v1785_v47 = vadd.f32 %v1721_v51, %v1588_v9  ;;  %879 = vst.msk [vmem:[#allocation2 + $0x2a1] sm:$0xff] %vm740_vm1, %v726_v54  ;;  %v1392_v24 = vadd.f32 %v1328_v44, %v1195_v45  ;;  %v2117_v56 = vmul.f32 %v5143_v22, %v5620_v58  ;;  %v2314_v25 = vmul.f32 %v5102_v59, %v5622_v62  ;;  %v5658_v51 = vld [vmem:[#allocation2 + $0x218] sm:$0xff]  ;;  %v6888_v44 = vld [vmem:[#allocation7_spill] sm:$0xff] }
 0x19d   :  { %3815 = vmatmul.mubr.msk.f32.gmra.mrb[32].mxu1 %vm740_vm1, %v2643_v8  ;;  %v2376_v33 = vadd.f32 %v2312_v35, %v2179_v7  ;;  %v5642_v46 = vmul.f32 %v5111_v30, %v5626_v15  ;;  %v999_v13 = vmul.f32 %v5647_v53, %v5533_v31  ;;  %v1132_v35 = vmul.f32 %v5654_v11, %v5535_v61  ;;  %v5703_v8 = vld [vmem:[#allocation2 + $0x228] sm:$0xff] }
 0x19e   :  { %v1982_v3 = vadd.f32 %v1918_v32, %v1785_v47  ;;  %v1589_v23 = vadd.f32 %v1525_v37, %v1392_v24  ;;  %v1329_v31 = vmul.f32 %v5665_v49, %v5539_v5  ;;  %v1526_v2 = vmul.f32 %v5072_v19, %v5585_v52 }
 0x19f   :  { %v2573_v61 = vadd.f32 %v5582_v16, %v2376_v33  ;;  %v1196_v36 = vadd.f32 %v1132_v35, %v999_v13  ;;  %v1723_v32 = vmul.f32 %v5082_v26, %v5587_v20  ;;  %v1920_v28 = vmul.f32 %v5089_v0, %v5594_v12  ;;  %v5690_v26 = vld [vmem:[%s6870_s2] ss:$0 sm:$0xff]  ;;  %v6887_v0 = vld [vmem:[#allocation6_spill] sm:$0xff]  ;;  %v5728_v33 = vld [vmem:[%s6871_s3 + $0x5] ss:$0 sm:$0xff] }
 0x1a0   :  { %v2180_v14 = vadd.f32 %v2116_v18, %v1982_v3  ;;  %v1786_v57 = vadd.f32 %v1722_v55, %v1589_v23  ;;  %v2118_v60 = vmul.f32 %v5143_v22, %v5658_v51  ;;  %v2315_v5 = vmul.f32 %v5102_v59, %v5660_v39 }
 0x1a1   :  { %v2644_v19 = vadd.f32 %v5222_v63, %v2573_v61  ;;  %v1393_v6 = vadd.f32 %v1329_v31, %v1196_v36  ;;  %v5685_v16 = vmul.f32 %v5111_v30, %v5671_v41  ;;  %v623_v18 = vadd.f32 %v5690_v26, %v6887_v0  ;;  %v5739_v31 = vld [vmem:[%s6871_s3 + $0x7] ss:$0 sm:$0xff] }
 0x1a2   :  { %v2377_v48 = vadd.f32 %v2313_v1, %v2180_v14  ;;  %v1983_v21 = vadd.f32 %v1919_v40, %v1786_v57  ;;  %v618_v59 = vadd.f32 %v5690_v26, %v6888_v44  ;;  %v1000_v9 = vmul.f32 %v5647_v53, %v5560_v42  ;;  %v5705_v1 = vld [vmem:[#allocation2 + $0x229] sm:$0xff]  ;;  %v5711_v42 = vld [vmem:[%s6871_s3 + $0x3] ss:$0 sm:$0xff]  ;;  %v5754_v57 = vld [vmem:[#allocation2 + $0x231] sm:$0xff] }
 0x1a3   :  { %3817 = vmatprep.mubr.msk.f32.mxu1 %vm740_vm1, %v2644_v19  ;;  %v1590_v30 = vadd.f32 %v1526_v2, %v1393_v6  ;;  %v729_v54 = vmax.f32 %v623_v18, 0.0  ;;  %v1133_v45 = vmul.f32 %v5654_v11, %v5562_v27  ;;  %v1330_v37 = vmul.f32 %v5665_v49, %v5567_v50  ;;  %v5715_v27 = vld [vmem:[#allocation2 + $0x22a] sm:$0xff]  ;;  %v5764_v18 = vld [vmem:[#allocation2 + $0x232] sm:$0xff] }
 0x1a4   :  { %v2574_v7 = vadd.f32 %v5607_v10, %v2377_v48  ;;  %v2181_v55 = vadd.f32 %v2117_v56, %v1983_v21  ;;  %v728_v40 = vmax.f32 %v618_v59, 0.0  ;;  %v1527_v47 = vmul.f32 %v5711_v42, %v5620_v58  ;;  %v5721_v10 = vld [vmem:[%s6871_s3 + $0x4] ss:$0 sm:$0xff]  ;;  %v5752_v14 = vld [vmem:[#allocation2 + $0x230] sm:$0xff] }
 0x1a5   :  { %v1787_v24 = vadd.f32 %v1723_v32, %v1590_v30  ;;  %882 = vst.msk [vmem:[#allocation2 + $0x2c1] sm:$0xff] %vm740_vm1, %v729_v54  ;;  %v1197_v50 = vadd.f32 %v1133_v45, %v1000_v9  ;;  %v1724_v56 = vmul.f32 %v5721_v10, %v5622_v62  ;;  %v1921_v13 = vmul.f32 %v5728_v33, %v5626_v15  ;;  %v5746_v32 = vld [vmem:[%s6871_s3 + $0x8] ss:$0 sm:$0xff] }
 0x1a6   :  { %v2645_v35 = vadd.f32 %v5222_v63, %v2574_v7  ;;  %v2378_v3 = vadd.f32 %v2314_v25, %v2181_v55  ;;  %881 = vst.msk [vmem:[#allocation2 + $0x2b9] sm:$0xff] %vm740_vm1, %v728_v40  ;;  %v2119_v23 = vmul.f32 %v5143_v22, %v5703_v8  ;;  %v2316_v2 = vmul.f32 %v5739_v31, %v5705_v1  ;;  %v6889_v45 = vld [vmem:[#allocation8_spill] sm:$0xff]  ;;  %v6890_v55 = vld [vmem:[#allocation9_spill] sm:$0xff] }
 0x1a7   :  { %v1984_v61 = vadd.f32 %v1920_v28, %v1787_v24  ;;  %v1394_v36 = vadd.f32 %v1330_v37, %v1197_v50  ;;  %v2513_v25 = vmul.f32 %v5746_v32, %v5715_v27  ;;  %v1001_v22 = vmul.f32 %v5647_v53, %v5585_v52 }
 0x1a8   :  { %3818 = vmatmul.mubr.msk.f32.gmra.mrb[34].mxu1 %vm740_vm1, %v2645_v35  ;;  %v2575_v28 = vadd.f32 %v5642_v46, %v2378_v3  ;;  %v1134_v19 = vmul.f32 %v5654_v11, %v5587_v20  ;;  %v1331_v6 = vmul.f32 %v5665_v49, %v5594_v12  ;;  %v1528_v0 = vmul.f32 %v5711_v42, %v5658_v51  ;;  %v5774_v20 = vld [vmem:[%s6871_s3 + $0x6] ss:$0 sm:$0xff] }
 0x1a9   :  { %v2182_v52 = vadd.f32 %v2118_v60, %v1984_v61  ;;  %v1591_v48 = vadd.f32 %v1527_v47, %v1394_v36  ;;  %v1725_v21 = vmul.f32 %v5721_v10, %v5660_v39  ;;  %v1922_v44 = vmul.f32 %v5728_v33, %v5671_v41  ;;  %v5796_v3 = vld [vmem:[#allocation2 + $0x240] sm:$0xff] }
 0x1aa   :  { %v2646_v46 = vadd.f32 %v5222_v63, %v2575_v28  ;;  %v1198_v59 = vadd.f32 %v1134_v19, %v1001_v22  ;;  %v2120_v12 = vmul.f32 %v5774_v20, %v5752_v14  ;;  %v2317_v60 = vmul.f32 %v5739_v31, %v5754_v57  ;;  %v5798_v61 = vld [vmem:[#allocation2 + $0x241] sm:$0xff] }
 0x1ab   :  { %v2379_v9 = vadd.f32 %v2315_v5, %v2182_v52  ;;  %v1788_v30 = vadd.f32 %v1724_v56, %v1591_v48  ;;  %v5782_v54 = vmul.f32 %v5746_v32, %v5764_v18  ;;  %v633_v37 = vadd.f32 %v5690_v26, %v6889_v45  ;;  %v5802_v19 = vld [vmem:[#allocation2 + $0x242] sm:$0xff] }
 0x1ac   :  { %3820 = vmatprep.mubr.msk.f32.mxu1 %vm740_vm1, %v2646_v46  ;;  %v1395_v7 = vadd.f32 %v1331_v6, %v1198_v59  ;;  %v628_v40 = vadd.f32 %v5690_v26, %v6890_v55  ;;  %v1002_v47 = vmul.f32 %v5647_v53, %v5620_v58  ;;  %v1135_v5 = vmul.f32 %v5654_v11, %v5622_v62  ;;  %v5822_v59 = vld [vmem:[#allocation2 + $0x248] sm:$0xff] }
 0x1ad   :  { %v2576_v24 = vadd.f32 %v5685_v16, %v2379_v9  ;;  %v1985_v50 = vadd.f32 %v1921_v13, %v1788_v30  ;;  %v731_v56 = vmax.f32 %v633_v37, 0.0  ;;  %v1332_v35 = vmul.f32 %v5665_v49, %v5626_v15  ;;  %v5824_v9 = vld [vmem:[#allocation2 + $0x249] sm:$0xff] }
 0x1ae   :  { %v1592_v36 = vadd.f32 %v1528_v0, %v1395_v7  ;;  %v730_v22 = vmax.f32 %v628_v40, 0.0  ;;  %v1199_v28 = vadd.f32 %v1135_v5, %v1002_v47  ;;  %v1529_v58 = vmul.f32 %v5711_v42, %v5703_v8  ;;  %v5830_v7 = vld [vmem:[#allocation2 + $0x24a] sm:$0xff] }
 0x1af   :  { %v2647_v62 = vadd.f32 %v5222_v63, %v2576_v24  ;;  %v2183_v16 = vadd.f32 %v2119_v23, %v1985_v50  ;;  %884 = vst.msk [vmem:[#allocation2 + $0x2d9] sm:$0xff] %vm740_vm1, %v731_v56  ;;  %v1726_v15 = vmul.f32 %v5721_v10, %v5705_v1  ;;  %v1923_v13 = vmul.f32 %v5728_v33, %v5715_v27  ;;  %v5843_v24 = vld [vmem:[%s6872_s4] ss:$0 sm:$0xff] }
 0x1b0   :  { %v1789_v6 = vadd.f32 %v1725_v21, %v1592_v36  ;;  %883 = vst.msk [vmem:[#allocation2 + $0x2d1] sm:$0xff] %vm740_vm1, %v730_v22  ;;  %v1396_v0 = vadd.f32 %v1332_v35, %v1199_v28  ;;  %v2121_v52 = vmul.f32 %v5774_v20, %v5796_v3  ;;  %v2318_v48 = vmul.f32 %v5739_v31, %v5798_v61 }
 0x1b1   :  { %3821 = vmatmul.mubr.msk.f32.gmra.mrb[36].mxu1 %vm740_vm1, %v2647_v62  ;;  %v2380_v63 = vadd.f32 %v2316_v2, %v2183_v16  ;;  %v2515_v23 = vmul.f32 %v5746_v32, %v5802_v19  ;;  %v1003_v46 = vmul.f32 %v5647_v53, %v5658_v51  ;;  %v1136_v21 = vmul.f32 %v5654_v11, %v5660_v39 }
 0x1b2   :  { %v1986_v30 = vadd.f32 %v1922_v44, %v1789_v6  ;;  %v1593_v45 = vadd.f32 %v1529_v58, %v1396_v0  ;;  %v1333_v37 = vmul.f32 %v5665_v49, %v5671_v41  ;;  %v1530_v2 = vmul.f32 %v5711_v42, %v5752_v14  ;;  %v5859_v6 = vld [vmem:[#allocation2 + $0x258] sm:$0xff] }
 0x1b3   :  { %v2577_v55 = vadd.f32 %v2513_v25, %v2380_v63  ;;  %v1200_v40 = vadd.f32 %v1136_v21, %v1003_v46  ;;  %v1727_v51 = vmul.f32 %v5721_v10, %v5754_v57  ;;  %v1924_v39 = vmul.f32 %v5728_v33, %v5764_v18  ;;  %v5866_v0 = vld [vmem:[#allocation2 + $0x25a] sm:$0xff] }
 0x1b4   :  { %v2184_v47 = vadd.f32 %v2120_v12, %v1986_v30  ;;  %v1790_v5 = vadd.f32 %v1726_v15, %v1593_v45  ;;  %v2122_v44 = vmul.f32 %v5774_v20, %v5822_v59  ;;  %v2319_v41 = vmul.f32 %v5739_v31, %v5824_v9 }
 0x1b5   :  { %v2648_v25 = vadd.f32 %v5843_v24, %v2577_v55  ;;  %v1397_v50 = vadd.f32 %v1333_v37, %v1200_v40  ;;  %v2516_v56 = vmul.f32 %v5746_v32, %v5830_v7  ;;  %v643_v12 = vadd.f32 %v5690_v26, %v5172_v34  ;;  %v5861_v34 = vld [vmem:[#allocation2 + $0x259] sm:$0xff] }
 0x1b6   :  { %v2381_v35 = vadd.f32 %v2317_v60, %v2184_v47  ;;  %v1987_v36 = vadd.f32 %v1923_v13, %v1790_v5  ;;  %v638_v22 = vadd.f32 %v5690_v26, %v5178_v29  ;;  %v1004_v28 = vmul.f32 %v5647_v53, %v5703_v8  ;;  %v5883_v40 = vld [vmem:[#allocation2 + $0x260] sm:$0xff] }
 0x1b7   :  { %3823 = vmatprep.mubr.msk.f32.mxu1 %vm740_vm1, %v2648_v25  ;;  %v1594_v58 = vadd.f32 %v1530_v2, %v1397_v50  ;;  %v733_v62 = vmax.f32 %v643_v12, 0.0  ;;  %v1137_v16 = vmul.f32 %v5654_v11, %v5705_v1  ;;  %v1334_v15 = vmul.f32 %v5665_v49, %v5715_v27  ;;  %v5894_v25 = vld [vmem:[#allocation2 + $0x262] sm:$0xff] }
 0x1b8   :  { %v2578_v60 = vadd.f32 %v5782_v54, %v2381_v35  ;;  %v2185_v29 = vadd.f32 %v2121_v52, %v1987_v36  ;;  %v732_v13 = vmax.f32 %v638_v22, 0.0  ;;  %v1531_v8 = vmul.f32 %v5711_v42, %v5796_v3 }
 0x1b9   :  { %v1791_v63 = vadd.f32 %v1727_v51, %v1594_v58  ;;  %886 = vst.msk [vmem:[#allocation2 + $0x2f1] sm:$0xff] %vm740_vm1, %v733_v62  ;;  %v1201_v1 = vadd.f32 %v1137_v16, %v1004_v28  ;;  %v1728_v27 = vmul.f32 %v5721_v10, %v5798_v61  ;;  %v1925_v46 = vmul.f32 %v5728_v33, %v5802_v19  ;;  %v5885_v51 = vld [vmem:[#allocation2 + $0x261] sm:$0xff]  ;;  %v6891_v58 = vld [vmem:[#allocation10_spill] sm:$0xff] }
 0x1ba   :  { %v2649_v21 = vadd.f32 %v5843_v24, %v2578_v60  ;;  %v2382_v54 = vadd.f32 %v2318_v48, %v2185_v29  ;;  %885 = vst.msk [vmem:[#allocation2 + $0x2e9] sm:$0xff] %vm740_vm1, %v732_v13  ;;  %v2123_v52 = vmul.f32 %v5774_v20, %v5859_v6  ;;  %v2320_v30 = vmul.f32 %v5739_v31, %v5861_v34 }
 0x1bb   :  { %v1988_v45 = vadd.f32 %v1924_v39, %v1791_v63  ;;  %v1398_v37 = vadd.f32 %v1334_v15, %v1201_v1  ;;  %v2517_v2 = vmul.f32 %v5746_v32, %v5866_v0  ;;  %v1005_v55 = vmul.f32 %v5647_v53, %v5752_v14  ;;  %v5920_v1 = vld [vmem:[#allocation2 + $0x270] sm:$0xff] }
 0x1bc   :  { %3824 = vmatmul.mubr.msk.f32.gmra.mrb[38].mxu1 %vm740_vm1, %v2649_v21  ;;  %v2579_v48 = vadd.f32 %v2515_v23, %v2382_v54  ;;  %v1138_v47 = vmul.f32 %v5654_v11, %v5754_v57  ;;  %v1335_v39 = vmul.f32 %v5665_v49, %v5764_v18  ;;  %v1532_v5 = vmul.f32 %v5711_v42, %v5822_v59 }
 0x1bd   :  { %v2186_v50 = vadd.f32 %v2122_v44, %v1988_v45  ;;  %v1595_v14 = vadd.f32 %v1531_v8, %v1398_v37  ;;  %v1729_v12 = vmul.f32 %v5721_v10, %v5824_v9  ;;  %v1926_v35 = vmul.f32 %v5728_v33, %v5830_v7 }
 0x1be   :  { %v2650_v23 = vadd.f32 %v5843_v24, %v2579_v48  ;;  %v1202_v36 = vadd.f32 %v1138_v47, %v1005_v55  ;;  %v2124_v57 = vmul.f32 %v5774_v20, %v5883_v40  ;;  %v2321_v18 = vmul.f32 %v5739_v31, %v5885_v51 }
 0x1bf   :  { %v2383_v22 = vadd.f32 %v2319_v41, %v2186_v50  ;;  %v1792_v28 = vadd.f32 %v1728_v27, %v1595_v14  ;;  %v5907_v44 = vmul.f32 %v5746_v32, %v5894_v25  ;;  %v653_v62 = vadd.f32 %v5690_v26, %v6891_v58  ;;  %v5922_v27 = vld [vmem:[#allocation2 + $0x271] sm:$0xff] }
 0x1c0   :  { %3826 = vmatprep.mubr.msk.f32.mxu1 %vm740_vm1, %v2650_v23  ;;  %v1399_v16 = vadd.f32 %v1335_v39, %v1202_v36  ;;  %v648_v15 = vadd.f32 %v5690_v26, %v5229_v4  ;;  %v1006_v60 = vmul.f32 %v5647_v53, %v5796_v3  ;;  %v1139_v41 = vmul.f32 %v5654_v11, %v5798_v61  ;;  %v5926_v3 = vld [vmem:[#allocation2 + $0x272] sm:$0xff] }
 0x1c1   :  { %v2580_v29 = vadd.f32 %v2516_v56, %v2383_v22  ;;  %v1989_v13 = vadd.f32 %v1925_v46, %v1792_v28  ;;  %v735_v8 = vmax.f32 %v653_v62, 0.0  ;;  %v1336_v63 = vmul.f32 %v5665_v49, %v5802_v19  ;;  %v5946_v14 = vld [vmem:[#allocation2 + $0x278] sm:$0xff] }
 0x1c2   :  { %v1596_v21 = vadd.f32 %v1532_v5, %v1399_v16  ;;  %v734_v54 = vmax.f32 %v648_v15, 0.0  ;;  %v1203_v45 = vadd.f32 %v1139_v41, %v1006_v60  ;;  %v1533_v4 = vmul.f32 %v5711_v42, %v5859_v6  ;;  %v5954_v28 = vld [vmem:[#allocation2 + $0x27a] sm:$0xff] }
 0x1c3   :  { %v2651_v61 = vadd.f32 %v5843_v24, %v2580_v29  ;;  %v2187_v56 = vadd.f32 %v2123_v52, %v1989_v13  ;;  %888 = vst.msk [vmem:[#allocation2 + $0x309] sm:$0xff] %vm740_vm1, %v735_v8  ;;  %v1730_v19 = vmul.f32 %v5721_v10, %v5861_v34  ;;  %v1927_v46 = vmul.f32 %v5728_v33, %v5866_v0 }
 0x1c4   :  { %v1793_v37 = vadd.f32 %v1729_v12, %v1596_v21  ;;  %887 = vst.msk [vmem:[#allocation2 + $0x301] sm:$0xff] %vm740_vm1, %v734_v54  ;;  %v1400_v55 = vadd.f32 %v1336_v63, %v1203_v45  ;;  %v2125_v48 = vmul.f32 %v5774_v20, %v5920_v1  ;;  %v2322_v47 = vmul.f32 %v5739_v31, %v5922_v27  ;;  %v5948_v12 = vld [vmem:[#allocation2 + $0x279] sm:$0xff] }
 0x1c5   :  { %3827 = vmatmul.mubr.msk.f32.gmra.mrb[40].mxu1 %vm740_vm1, %v2651_v61  ;;  %v2384_v52 = vadd.f32 %v2320_v30, %v2187_v56  ;;  %v2519_v39 = vmul.f32 %v5746_v32, %v5926_v3  ;;  %v1007_v5 = vmul.f32 %v5647_v53, %v5822_v59  ;;  %v1140_v50 = vmul.f32 %v5654_v11, %v5824_v9  ;;  %v6892_v63 = vld [vmem:[#allocation11_spill] sm:$0xff]  ;;  %v5978_v56 = vld [vmem:[#allocation2 + $0x288] sm:$0xff] }
 0x1c6   :  { %v1990_v23 = vadd.f32 %v1926_v35, %v1793_v37  ;;  %v1597_v36 = vadd.f32 %v1533_v4, %v1400_v55  ;;  %v1337_v22 = vmul.f32 %v5665_v49, %v5830_v7  ;;  %v1534_v30 = vmul.f32 %v5711_v42, %v5883_v40  ;;  %v5987_v55 = vld [vmem:[#allocation2 + $0x28a] sm:$0xff] }
 0x1c7   :  { %v2581_v58 = vadd.f32 %v2517_v2, %v2384_v52  ;;  %v1204_v62 = vadd.f32 %v1140_v50, %v1007_v5  ;;  %v1731_v59 = vmul.f32 %v5721_v10, %v5885_v51  ;;  %v1928_v9 = vmul.f32 %v5728_v33, %v5894_v25 }
 0x1c8   :  { %v2188_v16 = vadd.f32 %v2124_v57, %v1990_v23  ;;  %v1794_v15 = vadd.f32 %v1730_v19, %v1597_v36  ;;  %v2126_v35 = vmul.f32 %v5774_v20, %v5946_v14  ;;  %v2323_v7 = vmul.f32 %v5739_v31, %v5948_v12 }
 0x1c9   :  { %v2652_v60 = vadd.f32 %v5843_v24, %v2581_v58  ;;  %v1401_v41 = vadd.f32 %v1337_v22, %v1204_v62  ;;  %v2520_v2 = vmul.f32 %v5746_v32, %v5954_v28  ;;  %v663_v29 = vadd.f32 %v5690_v26, %v5281_v38  ;;  %v5980_v38 = vld [vmem:[#allocation2 + $0x289] sm:$0xff] }
 0x1ca   :  { %v2385_v13 = vadd.f32 %v2321_v18, %v2188_v16  ;;  %v1991_v8 = vadd.f32 %v1927_v46, %v1794_v15  ;;  %v658_v57 = vadd.f32 %v5690_v26, %v6892_v63  ;;  %v1008_v21 = vmul.f32 %v5647_v53, %v5859_v6  ;;  %v6008_v16 = vld [vmem:[#allocation2 + $0x291] sm:$0xff] }
 0x1cb   :  { %3829 = vmatprep.mubr.msk.f32.mxu1 %vm740_vm1, %v2652_v60  ;;  %v1598_v54 = vadd.f32 %v1534_v30, %v1401_v41  ;;  %v737_v45 = vmax.f32 %v663_v29, 0.0  ;;  %v1141_v4 = vmul.f32 %v5654_v11, %v5861_v34  ;;  %v1338_v61 = vmul.f32 %v5665_v49, %v5866_v0  ;;  %v5982_v18 = vpop.f32.mrb[0].mxu1  ;;  %v6017_v41 = vld [vmem:[#allocation2 + $0x292] sm:$0xff] }
 0x1cc   :  { %v2582_v19 = vadd.f32 %v5907_v44, %v2385_v13  ;;  %v2189_v46 = vadd.f32 %v2125_v48, %v1991_v8  ;;  %v736_v6 = vmax.f32 %v658_v57, 0.0  ;;  %v1535_v37 = vmul.f32 %v5711_v42, %v5920_v1  ;;  %v5989_v52 = vpop.f32.mrb[1].mxu1 }
 0x1cd   :  { %v1795_v34 = vadd.f32 %v1731_v59, %v1598_v54  ;;  %890 = vst.msk [vmem:[#allocation2 + $0x321] sm:$0xff] %vm740_vm1, %v737_v45  ;;  %v1205_v0 = vadd.f32 %v1141_v4, %v1008_v21  ;;  %v1732_v5 = vmul.f32 %v5721_v10, %v5922_v27  ;;  %v1929_v50 = vmul.f32 %v5728_v33, %v5926_v3  ;;  %v6006_v59 = vld [vmem:[#allocation2 + $0x290] sm:$0xff] }
 0x1ce   :  { %v2653_v44 = vadd.f32 %v5843_v24, %v2582_v19  ;;  %v2386_v48 = vadd.f32 %v2322_v47, %v2189_v46  ;;  %889 = vst.msk [vmem:[#allocation2 + $0x319] sm:$0xff] %vm740_vm1, %v736_v6  ;;  %v2127_v23 = vmul.f32 %v5774_v20, %v5978_v56  ;;  %v2324_v36 = vmul.f32 %v5739_v31, %v5980_v38 }
 0x1cf   :  { %v1992_v22 = vadd.f32 %v1928_v9, %v1795_v34  ;;  %v1402_v30 = vadd.f32 %v1338_v61, %v1205_v0  ;;  %v2521_v58 = vmul.f32 %v5746_v32, %v5987_v55  ;;  %v1009_v62 = vmul.f32 %v5647_v53, %v5883_v40  ;;  %v6043_v34 = vld [vmem:[#allocation2 + $0x2a0] sm:$0xff] }
 0x1d0   :  { %3830 = vmatmul.mubr.msk.f32.gmra.mrb[42].mxu1 %vm740_vm1, %v2653_v44  ;;  %v2583_v47 = vadd.f32 %v2519_v39, %v2386_v48  ;;  %v1142_v15 = vmul.f32 %v5654_v11, %v5885_v51  ;;  %v1339_v9 = vmul.f32 %v5665_v49, %v5894_v25  ;;  %v1536_v60 = vmul.f32 %v5711_v42, %v5946_v14 }
 0x1d1   :  { %v2190_v29 = vadd.f32 %v2126_v35, %v1992_v22  ;;  %v1599_v40 = vadd.f32 %v1535_v37, %v1402_v30  ;;  %v1733_v13 = vmul.f32 %v5721_v10, %v5948_v12  ;;  %v1930_v8 = vmul.f32 %v5728_v33, %v5954_v28 }
 0x1d2   :  { %v2654_v39 = vadd.f32 %v5843_v24, %v2583_v47  ;;  %v1206_v63 = vadd.f32 %v1142_v15, %v1009_v62  ;;  %v2128_v51 = vmul.f32 %v5774_v20, %v6006_v59  ;;  %v2325_v25 = vmul.f32 %v5739_v31, %v6008_v16 }
 0x1d3   :  { %v2387_v57 = vadd.f32 %v2323_v7, %v2190_v29  ;;  %v1796_v21 = vadd.f32 %v1732_v5, %v1599_v40  ;;  %v6030_v35 = vmul.f32 %v5746_v32, %v6017_v41  ;;  %v673_v54 = vadd.f32 %v5690_v26, %v5349_v43  ;;  %v6045_v43 = vld [vmem:[#allocation2 + $0x2a1] sm:$0xff]  ;;  %v6075_v40 = vld [vmem:[#allocation2 + $0x2a9] sm:$0xff] }
 0x1d4   :  { %3832 = vmatprep.mubr.msk.f32.mxu1 %vm740_vm1, %v2654_v39  ;;  %v1403_v45 = vadd.f32 %v1339_v9, %v1206_v63  ;;  %v668_v4 = vadd.f32 %v5690_v26, %v5356_v17  ;;  %v1010_v61 = vmul.f32 %v5647_v53, %v5920_v1  ;;  %v1143_v7 = vmul.f32 %v5654_v11, %v5922_v27  ;;  %v6049_v26 = vld [vmem:[#allocation2 + $0x2a2] sm:$0xff] }
 0x1d5   :  { %v2584_v19 = vadd.f32 %v2520_v2, %v2387_v57  ;;  %v1993_v46 = vadd.f32 %v1929_v50, %v1796_v21  ;;  %v739_v6 = vmax.f32 %v673_v54, 0.0  ;;  %v1340_v37 = vmul.f32 %v5665_v49, %v5926_v3  ;;  %v6073_v29 = vld [vmem:[#allocation2 + $0x2a8] sm:$0xff] }
 0x1d6   :  { %v1600_v0 = vadd.f32 %v1536_v60, %v1403_v45  ;;  %v738_v5 = vmax.f32 %v668_v4, 0.0  ;;  %v1207_v44 = vadd.f32 %v1143_v7, %v1010_v61  ;;  %v1537_v17 = vmul.f32 %v5711_v42, %v5978_v56  ;;  %v6057_v50 = vpop.f32.mrb[2].mxu1  ;;  %v6081_v57 = vld [vmem:[#allocation2 + $0x2aa] sm:$0xff] }
 0x1d7   :  { %v2655_v1 = vadd.f32 %v5843_v24, %v2584_v19  ;;  %v2191_v27 = vadd.f32 %v2127_v23, %v1993_v46  ;;  %892 = vst.msk [vmem:[#allocation2 + $0x339] sm:$0xff] %vm740_vm1, %v739_v6  ;;  %v1734_v3 = vmul.f32 %v5721_v10, %v5980_v38  ;;  %v1931_v2 = vmul.f32 %v5728_v33, %v5987_v55  ;;  %v6064_v62 = vpop.f32.mrb[3].mxu1  ;;  %v6096_v46 = vld [vmem:[#allocation2 + $0x2b8] sm:$0xff] }
 0x1d8   :  { %v1797_v48 = vadd.f32 %v1733_v13, %v1600_v0  ;;  %891 = vst.msk [vmem:[#allocation2 + $0x331] sm:$0xff] %vm740_vm1, %v738_v5  ;;  %v1404_v22 = vadd.f32 %v1340_v37, %v1207_v44  ;;  %v2129_v30 = vmul.f32 %v5774_v20, %v6043_v34  ;;  %v2326_v23 = vmul.f32 %v5739_v31, %v6045_v43  ;;  %v6102_v5 = vld [vmem:[#allocation2 + $0x2b9] sm:$0xff] }
 0x1d9   :  { %3833 = vmatmul.mubr.msk.f32.gmra.mrb[44].mxu1 %vm740_vm1, %v2655_v1  ;;  %v2388_v47 = vadd.f32 %v2324_v36, %v2191_v27  ;;  %v2523_v15 = vmul.f32 %v5746_v32, %v6049_v26  ;;  %v1011_v9 = vmul.f32 %v5647_v53, %v5946_v14  ;;  %v1144_v60 = vmul.f32 %v5654_v11, %v5948_v12  ;;  %v6104_v44 = vld [vmem:[#allocation2 + $0x2ba] sm:$0xff] }
 0x1da   :  { %v1994_v13 = vadd.f32 %v1930_v8, %v1797_v48  ;;  %v1601_v39 = vadd.f32 %v1537_v17, %v1404_v22  ;;  %v1341_v63 = vmul.f32 %v5665_v49, %v5954_v28  ;;  %v1538_v36 = vmul.f32 %v5711_v42, %v6006_v59 }
 0x1db   :  { %v2585_v21 = vadd.f32 %v2521_v58, %v2388_v47  ;;  %v1208_v54 = vadd.f32 %v1144_v60, %v1011_v9  ;;  %v1735_v14 = vmul.f32 %v5721_v10, %v6008_v16  ;;  %v1932_v12 = vmul.f32 %v5728_v33, %v6017_v41 }
 0x1dc   :  { %v2192_v45 = vadd.f32 %v2128_v51, %v1994_v13  ;;  %v1798_v4 = vadd.f32 %v1734_v3, %v1601_v39  ;;  %v2130_v8 = vmul.f32 %v5774_v20, %v6073_v29  ;;  %v2327_v28 = vmul.f32 %v5739_v31, %v6075_v40  ;;  %v6127_v13 = vld [vmem:[#allocation2 + $0x2c0] sm:$0xff] }
 0x1dd   :  { %v2656_v61 = vadd.f32 %v5843_v24, %v2585_v21  ;;  %v1405_v7 = vadd.f32 %v1341_v63, %v1208_v54  ;;  %v2524_v58 = vmul.f32 %v5746_v32, %v6081_v57  ;;  %v1012_v19 = vmul.f32 %v5647_v53, %v5978_v56  ;;  %v6129_v39 = vld [vmem:[#allocation2 + $0x2c1] sm:$0xff] }
 0x1de   :  { %v2389_v6 = vadd.f32 %v2325_v25, %v2192_v45  ;;  %v1995_v51 = vadd.f32 %v1931_v2, %v1798_v4  ;;  %v1145_v37 = vmul.f32 %v5654_v11, %v5980_v38  ;;  %v1342_v0 = vmul.f32 %v5665_v49, %v5987_v55  ;;  %v6131_v63 = vld [vmem:[#allocation2 + $0x2c2] sm:$0xff] }
 0x1df   :  { %3835 = vmatprep.mubr.msk.f32.mxu1 %vm740_vm1, %v2656_v61  ;;  %v1602_v17 = vadd.f32 %v1538_v36, %v1405_v7  ;;  %v1539_v56 = vmul.f32 %v5711_v42, %v6043_v34  ;;  %v1736_v25 = vmul.f32 %v5721_v10, %v6045_v43  ;;  %v1933_v1 = vmul.f32 %v5728_v33, %v6049_v26 }
 0x1e0   :  { %v2586_v38 = vadd.f32 %v6030_v35, %v2389_v6  ;;  %v2193_v27 = vadd.f32 %v2129_v30, %v1995_v51  ;;  %v1209_v55 = vadd.f32 %v1145_v37, %v1012_v19  ;;  %v2131_v3 = vmul.f32 %v5774_v20, %v6096_v46 }
 0x1e1   :  { %v1799_v2 = vadd.f32 %v1735_v14, %v1602_v17  ;;  %v2328_v48 = vmul.f32 %v5739_v31, %v6102_v5  ;;  %v6120_v22 = vmul.f32 %v5746_v32, %v6104_v44  ;;  %v1013_v47 = vmul.f32 %v5647_v53, %v6006_v59 }
 0x1e2   :  { %v2657_v9 = vadd.f32 %v5843_v24, %v2586_v38  ;;  %v2390_v60 = vadd.f32 %v2326_v23, %v2193_v27  ;;  %v1406_v35 = vadd.f32 %v1342_v0, %v1209_v55  ;;  %v1146_v30 = vmul.f32 %v5654_v11, %v6008_v16  ;;  %v6159_v0 = vld [vmem:[#allocation2 + $0x2d1] sm:$0xff] }
 0x1e3   :  { %v1996_v36 = vadd.f32 %v1932_v12, %v1799_v2  ;;  %v1343_v21 = vmul.f32 %v5665_v49, %v6017_v41  ;;  %v1540_v59 = vmul.f32 %v5711_v42, %v6073_v29  ;;  %v1737_v23 = vmul.f32 %v5721_v10, %v6075_v40  ;;  %v6142_v4 = vpop.f32.mrb[4].mxu1  ;;  %v6167_v55 = vld [vmem:[#allocation2 + $0x2d2] sm:$0xff] }
 0x1e4   :  { %3836 = vmatmul.mubr.msk.f32.gmra.mrb[46].mxu1 %vm740_vm1, %v2657_v9  ;;  %v2587_v54 = vadd.f32 %v2523_v15, %v2390_v60  ;;  %v1603_v16 = vadd.f32 %v1539_v56, %v1406_v35  ;;  %v1210_v14 = vadd.f32 %v1146_v30, %v1013_v47  ;;  %v1934_v45 = vmul.f32 %v5728_v33, %v6081_v57  ;;  %v6152_v19 = vpop.f32.mrb[5].mxu1 }
 0x1e5   :  { %v2194_v12 = vadd.f32 %v2130_v8, %v1996_v36  ;;  %v2132_v41 = vmul.f32 %v5774_v20, %v6127_v13  ;;  %v2329_v61 = vmul.f32 %v5739_v31, %v6129_v39  ;;  %v6150_v7 = vmul.f32 %v5746_v32, %v6131_v63  ;;  %v6157_v8 = vld [vmem:[#allocation2 + $0x2d0] sm:$0xff]  ;;  %v6184_v36 = vld [vmem:[#allocation2 + $0x2d8] sm:$0xff] }
 0x1e6   :  { %v2658_v15 = vadd.f32 %v5843_v24, %v2587_v54  ;;  %v1800_v6 = vadd.f32 %v1736_v25, %v1603_v16  ;;  %v1407_v51 = vadd.f32 %v1343_v21, %v1210_v14  ;;  %v1014_v37 = vmul.f32 %v5647_v53, %v6043_v34 }
 0x1e7   :  { %v2391_v17 = vadd.f32 %v2327_v28, %v2194_v12  ;;  %v1147_v56 = vmul.f32 %v5654_v11, %v6045_v43  ;;  %v1344_v38 = vmul.f32 %v5665_v49, %v6049_v26  ;;  %v1541_v27 = vmul.f32 %v5711_v42, %v6096_v46 }
 0x1e8   :  { %3838 = vmatprep.mubr.msk.f32.mxu1 %vm740_vm1, %v2658_v15  ;;  %v1997_v25 = vadd.f32 %v1933_v1, %v1800_v6  ;;  %v1604_v34 = vadd.f32 %v1540_v59, %v1407_v51  ;;  %v1738_v2 = vmul.f32 %v5721_v10, %v6102_v5  ;;  %v1935_v28 = vmul.f32 %v5728_v33, %v6104_v44 }
 0x1e9   :  { %v2588_v47 = vadd.f32 %v2524_v58, %v2391_v17  ;;  %v1211_v43 = vadd.f32 %v1147_v56, %v1014_v37  ;;  %v2133_v26 = vmul.f32 %v5774_v20, %v6157_v8  ;;  %v2330_v9 = vmul.f32 %v5739_v31, %v6159_v0 }
 0x1ea   :  { %v2195_v60 = vadd.f32 %v2131_v3, %v1997_v25  ;;  %v1801_v35 = vadd.f32 %v1737_v23, %v1604_v34  ;;  %v6180_v1 = vmul.f32 %v5746_v32, %v6167_v55  ;;  %v1015_v30 = vmul.f32 %v5647_v53, %v6073_v29  ;;  %v6191_v3 = vld [vmem:[#allocation2 + $0x2d9] sm:$0xff]  ;;  %v6215_v25 = vld [vmem:[#allocation2 + $0x2e8] sm:$0xff] }
 0x1eb   :  { %v2659_v58 = vadd.f32 %v5843_v24, %v2588_v47  ;;  %v1408_v21 = vadd.f32 %v1344_v38, %v1211_v43  ;;  %v1148_v59 = vmul.f32 %v5654_v11, %v6075_v40  ;;  %v1345_v54 = vmul.f32 %v5665_v49, %v6081_v57  ;;  %v6193_v23 = vld [vmem:[#allocation2 + $0x2da] sm:$0xff]  ;;  %v6217_v34 = vld [vmem:[#allocation2 + $0x2e9] sm:$0xff] }
 0x1ec   :  { %v2392_v16 = vadd.f32 %v2328_v48, %v2195_v60  ;;  %v1998_v14 = vadd.f32 %v1934_v45, %v1801_v35  ;;  %v1542_v29 = vmul.f32 %v5711_v42, %v6127_v13  ;;  %v1739_v12 = vmul.f32 %v5721_v10, %v6129_v39  ;;  %v6226_v60 = vld [vmem:[#allocation2 + $0x2ea] sm:$0xff] }
 0x1ed   :  { %3839 = vmatmul.mubr.msk.f32.gmra.mrb[48].mxu1 %vm740_vm1, %v2659_v58  ;;  %v1605_v15 = vadd.f32 %v1541_v27, %v1408_v21  ;;  %v1212_v6 = vadd.f32 %v1148_v59, %v1015_v30  ;;  %v1936_v40 = vmul.f32 %v5728_v33, %v6131_v63  ;;  %v2134_v57 = vmul.f32 %v5774_v20, %v6184_v36 }
 0x1ee   :  { %v2589_v51 = vadd.f32 %v6120_v22, %v2392_v16  ;;  %v2196_v48 = vadd.f32 %v2132_v41, %v1998_v14  ;;  %v2331_v45 = vmul.f32 %v5739_v31, %v6191_v3  ;;  %v6209_v37 = vmul.f32 %v5746_v32, %v6193_v23  ;;  %v6219_v22 = vpop.f32.mrb[6].mxu1 }
 0x1ef   :  { %v1802_v17 = vadd.f32 %v1738_v2, %v1605_v15  ;;  %v1409_v56 = vadd.f32 %v1345_v54, %v1212_v6  ;;  %v1016_v38 = vmul.f32 %v5647_v53, %v6096_v46  ;;  %v1149_v27 = vmul.f32 %v5654_v11, %v6102_v5  ;;  %v6228_v46 = vpop.f32.mrb[7].mxu1 }
 0x1f0   :  { %v2660_v41 = vadd.f32 %v5843_v24, %v2589_v51  ;;  %v2393_v47 = vadd.f32 %v2329_v61, %v2196_v48  ;;  %v1346_v43 = vmul.f32 %v5665_v49, %v6104_v44  ;;  %v1543_v2 = vmul.f32 %v5711_v42, %v6157_v8  ;;  %v6251_v48 = vld [vmem:[#allocation2 + $0x2f1] sm:$0xff] }
 0x1f1   :  { %v1999_v5 = vadd.f32 %v1935_v28, %v1802_v17  ;;  %v1606_v35 = vadd.f32 %v1542_v29, %v1409_v56  ;;  %v1213_v30 = vadd.f32 %v1149_v27, %v1016_v38  ;;  %v1740_v58 = vmul.f32 %v5721_v10, %v6159_v0  ;;  %v6242_v29 = vld [vmem:[#allocation2 + $0x2f0] sm:$0xff] }
 0x1f2   :  { %3841 = vmatprep.mubr.msk.f32.mxu1 %vm740_vm1, %v2660_v41  ;;  %v2590_v61 = vadd.f32 %v6150_v7, %v2393_v47  ;;  %v1937_v44 = vmul.f32 %v5728_v33, %v6167_v55  ;;  %v2135_v21 = vmul.f32 %v5774_v20, %v6215_v25  ;;  %v2332_v59 = vmul.f32 %v5739_v31, %v6217_v34  ;;  %v6255_v38 = vld [vmem:[#allocation2 + $0x2f2] sm:$0xff] }
 0x1f3   :  { %v2197_v54 = vadd.f32 %v2133_v26, %v1999_v5  ;;  %v1803_v28 = vadd.f32 %v1739_v12, %v1606_v35  ;;  %v1410_v16 = vadd.f32 %v1346_v43, %v1213_v30  ;;  %v2529_v14 = vmul.f32 %v5746_v32, %v6226_v60  ;;  %v6273_v30 = vld [vmem:[#allocation2 + $0x300] sm:$0xff] }
 0x1f4   :  { %v2661_v15 = vadd.f32 %v5843_v24, %v2590_v61  ;;  %v1017_v7 = vmul.f32 %v5647_v53, %v6127_v13  ;;  %v1150_v6 = vmul.f32 %v5654_v11, %v6129_v39  ;;  %v1347_v51 = vmul.f32 %v5665_v49, %v6131_v63 }
 0x1f5   :  { %v2394_v26 = vadd.f32 %v2330_v9, %v2197_v54  ;;  %v2000_v12 = vadd.f32 %v1936_v40, %v1803_v28  ;;  %v1607_v17 = vadd.f32 %v1543_v2, %v1410_v16  ;;  %v1544_v56 = vmul.f32 %v5711_v42, %v6184_v36  ;;  %v6280_v28 = vld [vmem:[#allocation2 + $0x301] sm:$0xff] }
 0x1f6   :  { %3842 = vmatmul.mubr.msk.f32.gmra.mrb[50].mxu1 %vm740_vm1, %v2661_v15  ;;  %v1214_v27 = vadd.f32 %v1150_v6, %v1017_v7  ;;  %v1741_v13 = vmul.f32 %v5721_v10, %v6191_v3  ;;  %v1938_v39 = vmul.f32 %v5728_v33, %v6193_v23  ;;  %v2136_v63 = vmul.f32 %v5774_v20, %v6242_v29  ;;  %v6282_v16 = vld [vmem:[#allocation2 + $0x302] sm:$0xff] }
 0x1f7   :  { %v2591_v9 = vadd.f32 %v6180_v1, %v2394_v26  ;;  %v2198_v40 = vadd.f32 %v2134_v57, %v2000_v12  ;;  %v1804_v41 = vadd.f32 %v1740_v58, %v1607_v17  ;;  %v2333_v47 = vmul.f32 %v5739_v31, %v6251_v48 }
 0x1f8   :  { %v1411_v43 = vadd.f32 %v1347_v51, %v1214_v27  ;;  %v2530_v2 = vmul.f32 %v5746_v32, %v6255_v38  ;;  %v1018_v5 = vmul.f32 %v5647_v53, %v6157_v8  ;;  %v1151_v35 = vmul.f32 %v5654_v11, %v6159_v0  ;;  %v6275_v61 = vpop.f32.mrb[8].mxu1 }
 0x1f9   :  { %v2662_v1 = vadd.f32 %v5843_v24, %v2591_v9  ;;  %v2395_v57 = vadd.f32 %v2331_v45, %v2198_v40  ;;  %v2001_v58 = vadd.f32 %v1937_v44, %v1804_v41  ;;  %v1348_v54 = vmul.f32 %v5665_v49, %v6167_v55  ;;  %v6284_v15 = vpop.f32.mrb[9].mxu1  ;;  %v6305_v40 = vld [vmem:[#allocation2 + $0x308] sm:$0xff] }
 0x1fa   :  { %v1608_v8 = vadd.f32 %v1544_v56, %v1411_v43  ;;  %v1215_v7 = vadd.f32 %v1151_v35, %v1018_v5  ;;  %v1545_v0 = vmul.f32 %v5711_v42, %v6215_v25  ;;  %v1742_v6 = vmul.f32 %v5721_v10, %v6217_v34  ;;  %v6307_v41 = vld [vmem:[#allocation2 + $0x309] sm:$0xff] }
 0x1fb   :  { %3844 = vmatprep.mubr.msk.f32.mxu1 %vm740_vm1, %v2662_v1  ;;  %v2592_v45 = vadd.f32 %v6209_v37, %v2395_v57  ;;  %v2199_v44 = vadd.f32 %v2135_v21, %v2001_v58  ;;  %v1939_v55 = vmul.f32 %v5728_v33, %v6226_v60  ;;  %v2137_v51 = vmul.f32 %v5774_v20, %v6273_v30  ;;  %v6313_v1 = vld [vmem:[#allocation2 + $0x30a] sm:$0xff] }
 0x1fc   :  { %v1805_v26 = vadd.f32 %v1741_v13, %v1608_v8  ;;  %v1412_v12 = vadd.f32 %v1348_v54, %v1215_v7  ;;  %v2334_v17 = vmul.f32 %v5739_v31, %v6280_v28  ;;  %v2531_v56 = vmul.f32 %v5746_v32, %v6282_v16 }
 0x1fd   :  { %v2663_v27 = vadd.f32 %v5843_v24, %v2592_v45  ;;  %v2396_v9 = vadd.f32 %v2332_v59, %v2199_v44  ;;  %v1019_v37 = vmul.f32 %v5647_v53, %v6184_v36  ;;  %v1152_v21 = vmul.f32 %v5654_v11, %v6191_v3  ;;  %v6331_v45 = vld [vmem:[#allocation2 + $0x318] sm:$0xff] }
 0x1fe   :  { %v2002_v13 = vadd.f32 %v1938_v39, %v1805_v26  ;;  %v1609_v43 = vadd.f32 %v1545_v0, %v1412_v12  ;;  %v1349_v5 = vmul.f32 %v5665_v49, %v6193_v23  ;;  %v1546_v35 = vmul.f32 %v5711_v42, %v6242_v29  ;;  %v6337_v12 = vld [vmem:[#allocation2 + $0x319] sm:$0xff] }
 0x1ff   :  { %3845 = vmatmul.mubr.msk.f32.gmra.mrb[52].mxu1 %vm740_vm1, %v2663_v27  ;;  %v2593_v36 = vadd.f32 %v2529_v14, %v2396_v9  ;;  %v1216_v59 = vadd.f32 %v1152_v21, %v1019_v37  ;;  %v1743_v3 = vmul.f32 %v5721_v10, %v6251_v48  ;;  %v1940_v57 = vmul.f32 %v5728_v33, %v6255_v38  ;;  %v6339_v27 = vld [vmem:[#allocation2 + $0x31a] sm:$0xff] }
 0x200   :  { %v2200_v39 = vadd.f32 %v2136_v63, %v2002_v13  ;;  %v1806_v58 = vadd.f32 %v1742_v6, %v1609_v43  ;;  %v2138_v23 = vmul.f32 %v5774_v20, %v6305_v40  ;;  %v2335_v54 = vmul.f32 %v5739_v31, %v6307_v41 }
 0x201   :  { %v2664_v8 = vadd.f32 %v5843_v24, %v2593_v36  ;;  %v1413_v7 = vadd.f32 %v1349_v5, %v1216_v59  ;;  %v6327_v14 = vmul.f32 %v5746_v32, %v6313_v1  ;;  %v1020_v0 = vmul.f32 %v5647_v53, %v6215_v25  ;;  %v6373_v59 = vld [vmem:[%s6871_s3 + $0x1] ss:$0 sm:$0xff] }
 0x202   :  { %v2397_v63 = vadd.f32 %v2333_v47, %v2200_v39  ;;  %v2003_v6 = vadd.f32 %v1939_v55, %v1806_v58  ;;  %v1153_v44 = vmul.f32 %v5654_v11, %v6217_v34  ;;  %v1350_v26 = vmul.f32 %v5665_v49, %v6226_v60  ;;  %v6348_v11 = vpop.f32.mrb[10].mxu1  ;;  %v6377_v39 = vld [vmem:[#allocation2 + $0x320] sm:$0xff] }
 0x203   :  { %3847 = vmatprep.mubr.msk.f32.mxu1 %vm740_vm1, %v2664_v8  ;;  %v1610_v9 = vadd.f32 %v1546_v35, %v1413_v7  ;;  %v1547_v53 = vmul.f32 %v5711_v42, %v6273_v30  ;;  %v1744_v25 = vmul.f32 %v5721_v10, %v6280_v28  ;;  %v1941_v47 = vmul.f32 %v5728_v33, %v6282_v16  ;;  %v6352_v37 = vpop.f32.mrb[11].mxu1  ;;  %v6379_v58 = vld [vmem:[#allocation2 + $0x321] sm:$0xff] }
 0x204   :  { %v2594_v34 = vadd.f32 %v2530_v2, %v2397_v63  ;;  %v2201_v49 = vadd.f32 %v2137_v51, %v2003_v6  ;;  %v1217_v60 = vadd.f32 %v1153_v44, %v1020_v0  ;;  %v2139_v55 = vmul.f32 %v5774_v20, %v6331_v45  ;;  %6893 = vst [vmem:[#allocation3_spill] sm:$0xff] %v6352_v37  ;;  %v6365_v2 = vld [vmem:[%s6871_s3] ss:$0 sm:$0xff]  ;;  %v6381_v8 = vld [vmem:[#allocation2 + $0x322] sm:$0xff]  ;;  %v2075_v37 = vld [vmem:[#allocation2 + $0x350] sm:$0xff] }
 0x205   :  { %v1807_v21 = vadd.f32 %v1743_v3, %v1610_v9  ;;  %v6356_v13 = vmul.f32 %v5739_v31, %v6337_v12  ;;  %v6360_v43 = vmul.f32 %v5746_v32, %v6339_v27  ;;  %v1021_v51 = vmul.f32 %v6365_v2, %v6242_v29  ;;  %v6386_v29 = vld [vmem:[%s6871_s3 + $0x2] ss:$0 sm:$0xff] }
 0x206   :  { %v2665_v5 = vadd.f32 %v5843_v24, %v2594_v34  ;;  %v2398_v35 = vadd.f32 %v2334_v17, %v2201_v49  ;;  %v1414_v36 = vadd.f32 %v1350_v26, %v1217_v60  ;;  %v1154_v3 = vmul.f32 %v6373_v59, %v6251_v48  ;;  %v2072_v49 = vld [vmem:[#allocation2 + $0x330] sm:$0xff] }
 0x207   :  { %v2004_v7 = vadd.f32 %v1940_v57, %v1807_v21  ;;  %v1351_v17 = vmul.f32 %v6386_v29, %v6255_v38  ;;  %v1548_v0 = vmul.f32 %v5711_v42, %v6305_v40  ;;  %v1745_v48 = vmul.f32 %v5721_v10, %v6307_v41  ;;  %v2466_v21 = vld [vmem:[#allocation2 + $0x332] sm:$0xff] }
 0x208   :  { %3848 = vmatmul.mubr.msk.f32.gmra.mrb[54].mxu1 %vm740_vm1, %v2665_v5  ;;  %v2595_v63 = vadd.f32 %v2531_v56, %v2398_v35  ;;  %v1611_v6 = vadd.f32 %v1547_v53, %v1414_v36  ;;  %v1218_v44 = vadd.f32 %v1154_v3, %v1021_v51  ;;  %v1942_v57 = vmul.f32 %v5728_v33, %v6313_v1  ;;  %v2269_v33 = vld [vmem:[#allocation2 + $0x331] sm:$0xff] }
 0x209   :  { %v2202_v26 = vadd.f32 %v2138_v23, %v2004_v7  ;;  %v2140_v9 = vmul.f32 %v5774_v20, %v6377_v39  ;;  %v2337_v38 = vmul.f32 %v5739_v31, %v6379_v58  ;;  %v6403_v42 = vmul.f32 %v5746_v32, %v6381_v8  ;;  %v6415_v32 = vld [vmem:[%s6871_s3 + $0x3] ss:$0 sm:$0xff]  ;;  %v6441_v7 = vld [vmem:[%s6871_s3 + $0x7] ss:$0 sm:$0xff] }
 0x20a   :  { %v2666_v10 = vadd.f32 %v5843_v24, %v2595_v63  ;;  %v1808_v34 = vadd.f32 %v1744_v25, %v1611_v6  ;;  %v1415_v56 = vadd.f32 %v1351_v17, %v1218_v44  ;;  %v1022_v53 = vmul.f32 %v6365_v2, %v6273_v30  ;;  %v6449_v44 = vld [vmem:[%s6871_s3 + $0x8] ss:$0 sm:$0xff] }
 0x20b   :  { %v2399_v23 = vadd.f32 %v2335_v54, %v2202_v26  ;;  %v1155_v60 = vmul.f32 %v6373_v59, %v6280_v28  ;;  %v1352_v31 = vmul.f32 %v6386_v29, %v6282_v16  ;;  %v1549_v25 = vmul.f32 %v6415_v32, %v6331_v45  ;;  %v6423_v28 = vld [vmem:[%s6871_s3 + $0x4] ss:$0 sm:$0xff]  ;;  %v6430_v54 = vld [vmem:[%s6871_s3 + $0x5] ss:$0 sm:$0xff]  ;;  %v2073_v26 = vld [vmem:[#allocation2 + $0x338] sm:$0xff] }
 0x20c   :  { %3850 = vmatprep.mubr.msk.f32.mxu1 %vm740_vm1, %v2666_v10  ;;  %v2005_v30 = vadd.f32 %v1941_v47, %v1808_v34  ;;  %v1612_v51 = vadd.f32 %v1548_v0, %v1415_v56  ;;  %v1746_v16 = vmul.f32 %v6423_v28, %v6337_v12  ;;  %v1943_v5 = vmul.f32 %v6430_v54, %v6339_v27  ;;  %v6434_v35 = vpop.f32.mrb[12].mxu1 }
 0x20d   :  { %6894 = vst [vmem:[#allocation4_spill] sm:$0xff] %v6434_v35  ;;  %v2596_v47 = vadd.f32 %v6327_v14, %v2399_v23  ;;  %v1219_v36 = vadd.f32 %v1155_v60, %v1022_v53  ;;  %v2141_v3 = vmul.f32 %v5774_v20, %v2072_v49  ;;  %v2338_v17 = vmul.f32 %v6441_v7, %v2269_v33  ;;  %v6444_v0 = vpop.f32.mrb[13].mxu1  ;;  %v2467_v53 = vld [vmem:[#allocation2 + $0x33a] sm:$0xff] }
 0x20e   :  { %6895 = vst [vmem:[#allocation5_spill] sm:$0xff] %v6444_v0  ;;  %v2203_v63 = vadd.f32 %v2139_v55, %v2005_v30  ;;  %v1809_v6 = vadd.f32 %v1745_v48, %v1612_v51  ;;  %v6452_v14 = vmul.f32 %v6449_v44, %v2466_v21  ;;  %v1023_v20 = vmul.f32 %v6365_v2, %v6305_v40  ;;  %v2270_v48 = vld [vmem:[#allocation2 + $0x339] sm:$0xff] }
 0x20f   :  { %v2667_v10 = vadd.f32 %v5843_v24, %v2596_v47  ;;  %v1416_v34 = vadd.f32 %v1352_v31, %v1219_v36  ;;  %v1156_v56 = vmul.f32 %v6373_v59, %v6307_v41  ;;  %v1353_v55 = vmul.f32 %v6386_v29, %v6313_v1  ;;  %v3893_v1 = vld [vmem:[%s6871_s3 + $0x6] ss:$0 sm:$0xff] }
 0x210   :  { %v2400_v23 = vadd.f32 %v6356_v13, %v2203_v63  ;;  %v2006_v60 = vadd.f32 %v1942_v57, %v1809_v6  ;;  %v1550_v30 = vmul.f32 %v6415_v32, %v6377_v39  ;;  %v1747_v40 = vmul.f32 %v6423_v28, %v6379_v58 }
 0x211   :  { %3851 = vmatmul.mubr.msk.f32.gmra.mrb[56].mxu1 %vm740_vm1, %v2667_v10  ;;  %v1613_v31 = vadd.f32 %v1549_v25, %v1416_v34  ;;  %v1220_v51 = vadd.f32 %v1156_v56, %v1023_v20  ;;  %v1944_v41 = vmul.f32 %v6430_v54, %v6381_v8  ;;  %v2142_v47 = vmul.f32 %v3893_v1, %v2073_v26  ;;  %v2074_v34 = vld [vmem:[#allocation2 + $0x348] sm:$0xff] }
 0x212   :  { %v2597_v13 = vadd.f32 %v6360_v43, %v2400_v23  ;;  %v2204_v57 = vadd.f32 %v2140_v9, %v2006_v60  ;;  %v2339_v36 = vmul.f32 %v6441_v7, %v2270_v48  ;;  %v6475_v63 = vmul.f32 %v6449_v44, %v2467_v53  ;;  %v2271_v56 = vld [vmem:[#allocation2 + $0x349] sm:$0xff] }
 0x213   :  { %v1810_v6 = vadd.f32 %v1746_v16, %v1613_v31  ;;  %v1417_v10 = vadd.f32 %v1353_v55, %v1220_v51  ;;  %v1024_v25 = vmul.f32 %v6365_v2, %v6331_v45  ;;  %v1157_v20 = vmul.f32 %v6373_v59, %v6337_v12  ;;  %v2468_v23 = vld [vmem:[#allocation2 + $0x34a] sm:$0xff] }
 0x214   :  { %v2668_v0 = vadd.f32 %v5843_v24, %v2597_v13  ;;  %v2401_v35 = vadd.f32 %v2337_v38, %v2204_v57  ;;  %v1354_v43 = vmul.f32 %v6386_v29, %v6339_v27  ;;  %v1551_v9 = vmul.f32 %v6415_v32, %v2072_v49 }
 0x215   :  { %v2007_v60 = vadd.f32 %v1943_v5, %v1810_v6  ;;  %v1614_v16 = vadd.f32 %v1550_v30, %v1417_v10  ;;  %v1221_v55 = vadd.f32 %v1157_v20, %v1024_v25  ;;  %v1748_v31 = vmul.f32 %v6423_v28, %v2269_v33  ;;  %v2469_v25 = vld [vmem:[#allocation2 + $0x352] sm:$0xff] }
 0x216   :  { %3853 = vmatprep.mubr.msk.f32.mxu1 %vm740_vm1, %v2668_v0  ;;  %v2598_v45 = vadd.f32 %v6403_v42, %v2401_v35  ;;  %v1945_v12 = vmul.f32 %v6430_v54, %v2466_v21  ;;  %v2143_v51 = vmul.f32 %v3893_v1, %v2074_v34  ;;  %v2340_v38 = vmul.f32 %v6441_v7, %v2271_v56  ;;  %v2272_v35 = vld [vmem:[#allocation2 + $0x351] sm:$0xff] }
 0x217   :  { %v2205_v13 = vadd.f32 %v2141_v3, %v2007_v60  ;;  %v1811_v57 = vadd.f32 %v1747_v40, %v1614_v16  ;;  %v1418_v27 = vadd.f32 %v1354_v43, %v1221_v55  ;;  %v2537_v49 = vmul.f32 %v6449_v44, %v2468_v23  ;;  %v6491_v5 = vpop.f32.mrb[14].mxu1 }
 0x218   :  { %v2669_v30 = vadd.f32 %v5843_v24, %v2598_v45  ;;  %v1025_v33 = vmul.f32 %v6365_v2, %v6377_v39  ;;  %v1158_v42 = vmul.f32 %v6373_v59, %v6379_v58  ;;  %v1355_v21 = vmul.f32 %v6386_v29, %v6381_v8  ;;  %v6500_v3 = vpop.f32.mrb[15].mxu1  ;;  %v6506_v24 = vld [vmem:[%s6873_s6] ss:$0 sm:$0xff] }
 0x219   :  { %v2402_v0 = vadd.f32 %v2338_v17, %v2205_v13  ;;  %v2008_v40 = vadd.f32 %v1944_v41, %v1811_v57  ;;  %v1615_v6 = vadd.f32 %v1551_v9, %v1418_v27  ;;  %v1552_v10 = vmul.f32 %v6415_v32, %v2073_v26  ;;  %v6896_v13 = vld [vmem:[#allocation3_spill] sm:$0xff] }
 0x21a   :  { %3854 = vmatmul.mubr.msk.f32.gmra.mrb[58].mxu1 %vm740_vm1, %v2669_v30  ;;  %v1222_v2 = vadd.f32 %v1158_v42, %v1025_v33  ;;  %v1749_v59 = vmul.f32 %v6423_v28, %v2270_v48  ;;  %v1946_v39 = vmul.f32 %v6430_v54, %v2467_v53  ;;  %v2144_v58 = vmul.f32 %v3893_v1, %v2075_v37  ;;  %v6523_v37 = vld [vmem:[%s6872_s4] ss:$0 sm:$0xff]  ;;  %v6898_v33 = vld [vmem:[#allocation5_spill] sm:$0xff] }
 0x21b   :  { %v2599_v8 = vadd.f32 %v6452_v14, %v2402_v0  ;;  %v2206_v29 = vadd.f32 %v2142_v47, %v2008_v40  ;;  %v1812_v17 = vadd.f32 %v1748_v31, %v1615_v6  ;;  %v2341_v32 = vmul.f32 %v6441_v7, %v2272_v35 }
 0x21c   :  { %v1419_v26 = vadd.f32 %v1355_v21, %v1222_v2  ;;  %v6514_v41 = vmul.f32 %v6449_v44, %v2469_v25  ;;  %v2950_v20 = vadd.f32 %v5982_v18, %v6506_v24  ;;  %v2945_v34 = vadd.f32 %v6506_v24, %v5989_v52 }
 0x21d   :  { %v2670_v28 = vadd.f32 %v6523_v37, %v2599_v8  ;;  %v2403_v54 = vadd.f32 %v2339_v36, %v2206_v29  ;;  %v2009_v14 = vadd.f32 %v1945_v12, %v1812_v17  ;;  %v2960_v7 = vadd.f32 %v6057_v50, %v6506_v24 }
 0x21e   :  { %v1616_v44 = vadd.f32 %v1552_v10, %v1419_v26  ;;  %v3264_v48 = vmax.f32 %v2950_v20, 0.0  ;;  %v3263_v53 = vmax.f32 %v2945_v34, 0.0  ;;  %v2955_v18 = vadd.f32 %v6506_v24, %v6064_v62 }
 0x21f   :  { %3856 = vmatprep.mubr.msk.f32.mxu1 %vm740_vm1, %v2670_v28  ;;  %v2600_v52 = vadd.f32 %v6475_v63, %v2403_v54  ;;  %v2207_v1 = vadd.f32 %v2143_v51, %v2009_v14  ;;  %v3266_v47 = vmax.f32 %v2960_v7, 0.0  ;;  %v2970_v56 = vadd.f32 %v6142_v4, %v6506_v24 }
 0x220   :  { %v1813_v36 = vadd.f32 %v1749_v59, %v1616_v44  ;;  %3328 = vst.msk [vmem:[%s6874_s7 + $0x8] sm:$0xff] %vm740_vm1, %v3264_v48  ;;  %3327 = vst.msk [vmem:[%s6874_s7] sm:$0xff] %vm740_vm1, %v3263_v53  ;;  %v3265_v50 = vmax.f32 %v2955_v18, 0.0  ;;  %v2965_v62 = vadd.f32 %v6506_v24, %v6152_v19  ;;  %v2980_v63 = vadd.f32 %v6219_v22, %v6506_v24  ;;  %v3792_v43 = vpop.f32.mrb[16].mxu1 }
 0x221   :  { %v2671_v4 = vadd.f32 %v6523_v37, %v2600_v52  ;;  %v2404_v9 = vadd.f32 %v2340_v38, %v2207_v1  ;;  %3330 = vst.msk [vmem:[%s6874_s7 + $0x18] sm:$0xff] %vm740_vm1, %v3266_v47  ;;  %v3268_v23 = vmax.f32 %v2970_v56, 0.0  ;;  %v2975_v60 = vadd.f32 %v6506_v24, %v6228_v46  ;;  %v3024_v16 = vpop.f32.mrb[17].mxu1 }
 0x222   :  { %v2010_v55 = vadd.f32 %v1946_v39, %v1813_v36  ;;  %3329 = vst.msk [vmem:[%s6874_s7 + $0x10] sm:$0xff] %vm740_vm1, %v3265_v50  ;;  %v3267_v19 = vmax.f32 %v2965_v62, 0.0  ;;  %v3270_v22 = vmax.f32 %v2980_v63, 0.0  ;;  %v2990_v31 = vadd.f32 %v6275_v61, %v6506_v24 }
 0x223   :  { %3857 = vmatmul.mubr.msk.f32.gmra.mrb[60].mxu1 %vm740_vm1, %v2671_v4  ;;  %v2601_v45 = vadd.f32 %v2537_v49, %v2404_v9  ;;  %3332 = vst.msk [vmem:[%s6874_s7 + $0x28] sm:$0xff] %vm740_vm1, %v3268_v23  ;;  %v3269_v46 = vmax.f32 %v2975_v60, 0.0  ;;  %v2985_v12 = vadd.f32 %v6506_v24, %v6284_v15  ;;  %v3000_v51 = vadd.f32 %v6348_v11, %v6506_v24  ;;  %v6897_v15 = vld [vmem:[#allocation4_spill] sm:$0xff] }
 0x224   :  { %v2208_v38 = vadd.f32 %v2144_v58, %v2010_v55  ;;  %3331 = vst.msk [vmem:[%s6874_s7 + $0x20] sm:$0xff] %vm740_vm1, %v3267_v19  ;;  %3334 = vst.msk [vmem:[%s6874_s7 + $0x38] sm:$0xff] %vm740_vm1, %v3270_v22  ;;  %v3272_v61 = vmax.f32 %v2990_v31, 0.0  ;;  %v2995_v57 = vadd.f32 %v6506_v24, %v6896_v13  ;;  %v3010_v27 = vadd.f32 %v6897_v15, %v6506_v24 }
 0x225   :  { %v2672_v11 = vadd.f32 %v6523_v37, %v2601_v45  ;;  %3333 = vst.msk [vmem:[%s6874_s7 + $0x30] sm:$0xff] %vm740_vm1, %v3269_v46  ;;  %v3271_v49 = vmax.f32 %v2985_v12, 0.0  ;;  %v3274_v30 = vmax.f32 %v3000_v51, 0.0  ;;  %v3005_v42 = vadd.f32 %v6506_v24, %v6898_v33 }
 0x226   :  { %v2405_v21 = vadd.f32 %v2341_v32, %v2208_v38  ;;  %3336 = vst.msk [vmem:[%s6874_s7 + $0x48] sm:$0xff] %vm740_vm1, %v3272_v61  ;;  %v3273_v35 = vmax.f32 %v2995_v57, 0.0  ;;  %v3276_v0 = vmax.f32 %v3010_v27, 0.0  ;;  %v3020_v40 = vadd.f32 %v6491_v5, %v6506_v24 }
 0x227   :  { %3859 = vmatprep.mubr.msk.f32.mxu1 %vm740_vm1, %v2672_v11  ;;  %3335 = vst.msk [vmem:[%s6874_s7 + $0x40] sm:$0xff] %vm740_vm1, %v3271_v49  ;;  %3338 = vst.msk [vmem:[%s6874_s7 + $0x58] sm:$0xff] %vm740_vm1, %v3274_v30  ;;  %v3275_v6 = vmax.f32 %v3005_v42, 0.0  ;;  %v3015_v10 = vadd.f32 %v6506_v24, %v6500_v3  ;;  %v3030_v25 = vadd.f32 %v3792_v43, %v6506_v24 }
 0x228   :  { %v3025_v5 = vadd.f32 %v6506_v24, %v3024_v16  ;;  %v2602_v2 = vadd.f32 %v6514_v41, %v2405_v21  ;;  %3337 = vst.msk [vmem:[%s6874_s7 + $0x50] sm:$0xff] %vm740_vm1, %v3273_v35  ;;  %3340 = vst.msk [vmem:[%s6874_s7 + $0x68] sm:$0xff] %vm740_vm1, %v3276_v0  ;;  %v3278_v59 = vmax.f32 %v3020_v40, 0.0 }
 0x229   :  { %3339 = vst.msk [vmem:[%s6874_s7 + $0x60] sm:$0xff] %vm740_vm1, %v3275_v6  ;;  %v3277_v3 = vmax.f32 %v3015_v10, 0.0  ;;  %v3280_v39 = vmax.f32 %v3030_v25, 0.0 }
 0x22a   :  { %v3279_v58 = vmax.f32 %v3025_v5, 0.0  ;;  %v2673_v8 = vadd.f32 %v6523_v37, %v2602_v2  ;;  %3342 = vst.msk [vmem:[%s6874_s7 + $0x78] sm:$0xff] %vm740_vm1, %v3278_v59 }
 0x22b   :  { %3341 = vst.msk [vmem:[%s6874_s7 + $0x70] sm:$0xff] %vm740_vm1, %v3277_v3  ;;  %3344 = vst.msk [vmem:[%s6874_s7 + $0x88] sm:$0xff] %vm740_vm1, %v3280_v39  ;;  %v3795_v29 = vpop.f32.mrb[18].mxu1 }
 0x22c   :  { %3343 = vst.msk [vmem:[%s6874_s7 + $0x80] sm:$0xff] %vm740_vm1, %v3279_v58  ;;  %3860 = vmatmul.mubr.msk.f32.gmra.mrb[62].mxu1 %vm740_vm1, %v2673_v8  ;;  %v3040_v17 = vadd.f32 %v3795_v29, %v6506_v24  ;;  %v3034_v32 = vpop.f32.mrb[19].mxu1 }
 0x22d   :  { %v3035_v26 = vadd.f32 %v6506_v24, %v3034_v32 }
 0x22e   :  { %v3282_v41 = vmax.f32 %v3040_v17, 0.0 }
 0x22f   :  { %v3281_v20 = vmax.f32 %v3035_v26, 0.0 }
 0x230   :  { %3346 = vst.msk [vmem:[%s6874_s7 + $0x98] sm:$0xff] %vm740_vm1, %v3282_v41 }
 0x231   :  { %3345 = vst.msk [vmem:[%s6874_s7 + $0x90] sm:$0xff] %vm740_vm1, %v3281_v20 }
 0x234   :  { %v3798_v34 = vpop.f32.mrb[20].mxu1 }
 0x235   :  { %v3050_v37 = vadd.f32 %v3798_v34, %v6506_v24  ;;  %v3044_v28 = vpop.f32.mrb[21].mxu1 }
 0x236   :  { %v3045_v54 = vadd.f32 %v6506_v24, %v3044_v28 }
 0x237   :  { %v3284_v14 = vmax.f32 %v3050_v37, 0.0 }
 0x238   :  { %v3283_v7 = vmax.f32 %v3045_v54, 0.0 }
 0x239   :  { %3348 = vst.msk [vmem:[%s6874_s7 + $0xa8] sm:$0xff] %vm740_vm1, %v3284_v14 }
 0x23a   :  { %3347 = vst.msk [vmem:[%s6874_s7 + $0xa0] sm:$0xff] %vm740_vm1, %v3283_v7 }
 0x23f   :  { %v3801_v44 = vpop.f32.mrb[22].mxu1 }
 0x240   :  { %v3060_v48 = vadd.f32 %v3801_v44, %v6506_v24  ;;  %v3054_v53 = vpop.f32.mrb[23].mxu1 }
 0x241   :  { %v3055_v18 = vadd.f32 %v6506_v24, %v3054_v53 }
 0x242   :  { %v3286_v52 = vmax.f32 %v3060_v48, 0.0 }
 0x243   :  { %v3285_v1 = vmax.f32 %v3055_v18, 0.0 }
 0x244   :  { %3350 = vst.msk [vmem:[%s6874_s7 + $0xb8] sm:$0xff] %vm740_vm1, %v3286_v52 }
 0x245   :  { %3349 = vst.msk [vmem:[%s6874_s7 + $0xb0] sm:$0xff] %vm740_vm1, %v3285_v1 }
 0x248   :  { %v3804_v47 = vpop.f32.mrb[24].mxu1 }
 0x249   :  { %v3070_v56 = vadd.f32 %v3804_v47, %v6506_v24  ;;  %v3064_v36 = vpop.f32.mrb[25].mxu1 }
 0x24a   :  { %v3065_v50 = vadd.f32 %v6506_v24, %v3064_v36 }
 0x24b   :  { %v3288_v62 = vmax.f32 %v3070_v56, 0.0 }
 0x24c   :  { %v3287_v63 = vmax.f32 %v3065_v50, 0.0 }
 0x24d   :  { %3352 = vst.msk [vmem:[%s6874_s7 + $0xc8] sm:$0xff] %vm740_vm1, %v3288_v62 }
 0x24e   :  { %3351 = vst.msk [vmem:[%s6874_s7 + $0xc0] sm:$0xff] %vm740_vm1, %v3287_v63 }
 0x253   :  { %v3807_v43 = vpop.f32.mrb[26].mxu1 }
 0x254   :  { %v3080_v4 = vadd.f32 %v3807_v43, %v6506_v24  ;;  %v3074_v9 = vpop.f32.mrb[27].mxu1 }
 0x255   :  { %v3075_v23 = vadd.f32 %v6506_v24, %v3074_v9 }
 0x256   :  { %v3290_v60 = vmax.f32 %v3080_v4, 0.0 }
 0x257   :  { %v3289_v16 = vmax.f32 %v3075_v23, 0.0 }
 0x258   :  { %3354 = vst.msk [vmem:[%s6874_s7 + $0xd8] sm:$0xff] %vm740_vm1, %v3290_v60 }
 0x259   :  { %3353 = vst.msk [vmem:[%s6874_s7 + $0xd0] sm:$0xff] %vm740_vm1, %v3289_v16 }
 0x25c   :  { %v3810_v55 = vpop.f32.mrb[28].mxu1 }
 0x25d   :  { %v3090_v19 = vadd.f32 %v3810_v55, %v6506_v24  ;;  %v3084_v22 = vpop.f32.mrb[29].mxu1 }
 0x25e   :  { %v3085_v31 = vadd.f32 %v6506_v24, %v3084_v22 }
 0x25f   :  { %v3292_v45 = vmax.f32 %v3090_v19, 0.0 }
 0x260   :  { %v3291_v46 = vmax.f32 %v3085_v31, 0.0 }
 0x261   :  { %3356 = vst.msk [vmem:[%s6874_s7 + $0xe8] sm:$0xff] %vm740_vm1, %v3292_v45 }
 0x262   :  { %3355 = vst.msk [vmem:[%s6874_s7 + $0xe0] sm:$0xff] %vm740_vm1, %v3291_v46 }
 0x267   :  { %v3813_v12 = vpop.f32.mrb[30].mxu1 }
 0x268   :  { %v3100_v51 = vadd.f32 %v3813_v12, %v6506_v24  ;;  %v3094_v38 = vpop.f32.mrb[31].mxu1 }
 0x269   :  { %v3095_v61 = vadd.f32 %v6506_v24, %v3094_v38 }
 0x26a   :  { %v3294_v13 = vmax.f32 %v3100_v51, 0.0 }
 0x26b   :  { %v3293_v57 = vmax.f32 %v3095_v61, 0.0 }
 0x26c   :  { %3358 = vst.msk [vmem:[%s6874_s7 + $0xf8] sm:$0xff] %vm740_vm1, %v3294_v13 }
 0x26d   :  { %3357 = vst.msk [vmem:[%s6874_s7 + $0xf0] sm:$0xff] %vm740_vm1, %v3293_v57 }
 0x270   :  { %v3816_v15 = vpop.f32.mrb[32].mxu1 }
 0x271   :  { %v3110_v27 = vadd.f32 %v3816_v15, %v6506_v24  ;;  %v3104_v11 = vpop.f32.mrb[33].mxu1 }
 0x272   :  { %v3105_v49 = vadd.f32 %v6506_v24, %v3104_v11 }
 0x273   :  { %v3296_v30 = vmax.f32 %v3110_v27, 0.0 }
 0x274   :  { %v3295_v33 = vmax.f32 %v3105_v49, 0.0 }
 0x275   :  { %3360 = vst.msk [vmem:[%s6874_s7 + $0x108] sm:$0xff] %vm740_vm1, %v3296_v30 }
 0x276   :  { %3359 = vst.msk [vmem:[%s6874_s7 + $0x100] sm:$0xff] %vm740_vm1, %v3295_v33 }
 0x27b   :  { %v3819_v42 = vpop.f32.mrb[34].mxu1 }
 0x27c   :  { %v3120_v21 = vadd.f32 %v3819_v42, %v6506_v24  ;;  %v3114_v35 = vpop.f32.mrb[35].mxu1 }
 0x27d   :  { %v3115_v0 = vadd.f32 %v6506_v24, %v3114_v35 }
 0x27e   :  { %v3298_v40 = vmax.f32 %v3120_v21, 0.0 }
 0x27f   :  { %v3297_v6 = vmax.f32 %v3115_v0, 0.0 }
 0x280   :  { %3362 = vst.msk [vmem:[%s6874_s7 + $0x118] sm:$0xff] %vm740_vm1, %v3298_v40 }
 0x281   :  { %3361 = vst.msk [vmem:[%s6874_s7 + $0x110] sm:$0xff] %vm740_vm1, %v3297_v6 }
 0x284   :  { %v3822_v10 = vpop.f32.mrb[36].mxu1 }
 0x285   :  { %v3130_v25 = vadd.f32 %v3822_v10, %v6506_v24  ;;  %v3124_v5 = vpop.f32.mrb[37].mxu1 }
 0x286   :  { %v3125_v2 = vadd.f32 %v6506_v24, %v3124_v5 }
 0x287   :  { %v3300_v59 = vmax.f32 %v3130_v25, 0.0 }
 0x288   :  { %v3299_v3 = vmax.f32 %v3125_v2, 0.0 }
 0x289   :  { %3364 = vst.msk [vmem:[%s6874_s7 + $0x128] sm:$0xff] %vm740_vm1, %v3300_v59 }
 0x28a   :  { %3363 = vst.msk [vmem:[%s6874_s7 + $0x120] sm:$0xff] %vm740_vm1, %v3299_v3 }
 0x28f   :  { %v3825_v39 = vpop.f32.mrb[38].mxu1 }
 0x290   :  { %v3140_v58 = vadd.f32 %v3825_v39, %v6506_v24  ;;  %v3134_v8 = vpop.f32.mrb[39].mxu1 }
 0x291   :  { %v3135_v29 = vadd.f32 %v6506_v24, %v3134_v8 }
 0x292   :  { %v3302_v17 = vmax.f32 %v3140_v58, 0.0 }
 0x293   :  { %v3301_v32 = vmax.f32 %v3135_v29, 0.0 }
 0x294   :  { %3366 = vst.msk [vmem:[%s6874_s7 + $0x138] sm:$0xff] %vm740_vm1, %v3302_v17 }
 0x295   :  { %3365 = vst.msk [vmem:[%s6874_s7 + $0x130] sm:$0xff] %vm740_vm1, %v3301_v32 }
 0x298   :  { %v3828_v26 = vpop.f32.mrb[40].mxu1 }
 0x299   :  { %v3150_v41 = vadd.f32 %v3828_v26, %v6506_v24  ;;  %v3144_v20 = vpop.f32.mrb[41].mxu1 }
 0x29a   :  { %v3145_v34 = vadd.f32 %v6506_v24, %v3144_v20 }
 0x29b   :  { %v3304_v37 = vmax.f32 %v3150_v41, 0.0 }
 0x29c   :  { %v3303_v28 = vmax.f32 %v3145_v34, 0.0 }
 0x29d   :  { %3368 = vst.msk [vmem:[%s6874_s7 + $0x148] sm:$0xff] %vm740_vm1, %v3304_v37 }
 0x29e   :  { %3367 = vst.msk [vmem:[%s6874_s7 + $0x140] sm:$0xff] %vm740_vm1, %v3303_v28 }
 0x2a3   :  { %v3831_v54 = vpop.f32.mrb[42].mxu1 }
 0x2a4   :  { %v3160_v14 = vadd.f32 %v3831_v54, %v6506_v24  ;;  %v3154_v7 = vpop.f32.mrb[43].mxu1 }
 0x2a5   :  { %v3155_v44 = vadd.f32 %v6506_v24, %v3154_v7 }
 0x2a6   :  { %v3306_v48 = vmax.f32 %v3160_v14, 0.0 }
 0x2a7   :  { %v3305_v53 = vmax.f32 %v3155_v44, 0.0 }
 0x2a8   :  { %3370 = vst.msk [vmem:[%s6874_s7 + $0x158] sm:$0xff] %vm740_vm1, %v3306_v48 }
 0x2a9   :  { %3369 = vst.msk [vmem:[%s6874_s7 + $0x150] sm:$0xff] %vm740_vm1, %v3305_v53 }
 0x2ac   :  { %v3834_v18 = vpop.f32.mrb[44].mxu1 }
 0x2ad   :  { %v3170_v52 = vadd.f32 %v3834_v18, %v6506_v24  ;;  %v3164_v1 = vpop.f32.mrb[45].mxu1 }
 0x2ae   :  { %v3165_v47 = vadd.f32 %v6506_v24, %v3164_v1 }
 0x2af   :  { %v3308_v56 = vmax.f32 %v3170_v52, 0.0 }
 0x2b0   :  { %v3307_v36 = vmax.f32 %v3165_v47, 0.0 }
 0x2b1   :  { %3372 = vst.msk [vmem:[%s6874_s7 + $0x168] sm:$0xff] %vm740_vm1, %v3308_v56 }
 0x2b2   :  { %3371 = vst.msk [vmem:[%s6874_s7 + $0x160] sm:$0xff] %vm740_vm1, %v3307_v36 }
 0x2b7   :  { %v3837_v50 = vpop.f32.mrb[46].mxu1 }
 0x2b8   :  { %v3180_v62 = vadd.f32 %v3837_v50, %v6506_v24  ;;  %v3174_v63 = vpop.f32.mrb[47].mxu1 }
 0x2b9   :  { %v3175_v43 = vadd.f32 %v6506_v24, %v3174_v63 }
 0x2ba   :  { %v3310_v4 = vmax.f32 %v3180_v62, 0.0 }
 0x2bb   :  { %v3309_v9 = vmax.f32 %v3175_v43, 0.0 }
 0x2bc   :  { %3374 = vst.msk [vmem:[%s6874_s7 + $0x178] sm:$0xff] %vm740_vm1, %v3310_v4 }
 0x2bd   :  { %3373 = vst.msk [vmem:[%s6874_s7 + $0x170] sm:$0xff] %vm740_vm1, %v3309_v9 }
 0x2c0   :  { %v3840_v23 = vpop.f32.mrb[48].mxu1 }
 0x2c1   :  { %v3190_v60 = vadd.f32 %v3840_v23, %v6506_v24  ;;  %v3184_v16 = vpop.f32.mrb[49].mxu1 }
 0x2c2   :  { %v3185_v55 = vadd.f32 %v6506_v24, %v3184_v16 }
 0x2c3   :  { %v3312_v19 = vmax.f32 %v3190_v60, 0.0 }
 0x2c4   :  { %v3311_v22 = vmax.f32 %v3185_v55, 0.0 }
 0x2c5   :  { %3376 = vst.msk [vmem:[%s6874_s7 + $0x188] sm:$0xff] %vm740_vm1, %v3312_v19 }
 0x2c6   :  { %3375 = vst.msk [vmem:[%s6874_s7 + $0x180] sm:$0xff] %vm740_vm1, %v3311_v22 }
 0x2c9   :  { %v3843_v31 = vpop.f32.mrb[50].mxu1 }
 0x2ca   :  { %v3200_v45 = vadd.f32 %v3843_v31, %v6506_v24  ;;  %v3194_v46 = vpop.f32.mrb[51].mxu1 }
 0x2cb   :  { %v3195_v12 = vadd.f32 %v6506_v24, %v3194_v46 }
 0x2cc   :  { %v3314_v51 = vmax.f32 %v3200_v45, 0.0 }
 0x2cd   :  { %v3313_v38 = vmax.f32 %v3195_v12, 0.0 }
 0x2ce   :  { %3378 = vst.msk [vmem:[%s6874_s7 + $0x198] sm:$0xff] %vm740_vm1, %v3314_v51 }
 0x2cf   :  { %3377 = vst.msk [vmem:[%s6874_s7 + $0x190] sm:$0xff] %vm740_vm1, %v3313_v38 }
 0x2d2   :  { %v3846_v61 = vpop.f32.mrb[52].mxu1 }
 0x2d3   :  { %v3210_v13 = vadd.f32 %v3846_v61, %v6506_v24  ;;  %v3204_v57 = vpop.f32.mrb[53].mxu1 }
 0x2d4   :  { %v3205_v15 = vadd.f32 %v6506_v24, %v3204_v57 }
 0x2d5   :  { %v3316_v27 = vmax.f32 %v3210_v13, 0.0 }
 0x2d6   :  { %v3315_v11 = vmax.f32 %v3205_v15, 0.0 }
 0x2d7   :  { %3380 = vst.msk [vmem:[%s6874_s7 + $0x1a8] sm:$0xff] %vm740_vm1, %v3316_v27 }
 0x2d8   :  { %3379 = vst.msk [vmem:[%s6874_s7 + $0x1a0] sm:$0xff] %vm740_vm1, %v3315_v11 }
 0x2db   :  { %v3849_v49 = vpop.f32.mrb[54].mxu1 }
 0x2dc   :  { %v3220_v30 = vadd.f32 %v3849_v49, %v6506_v24  ;;  %v3214_v33 = vpop.f32.mrb[55].mxu1 }
 0x2dd   :  { %v3215_v42 = vadd.f32 %v6506_v24, %v3214_v33 }
 0x2de   :  { %v3318_v21 = vmax.f32 %v3220_v30, 0.0 }
 0x2df   :  { %v3317_v35 = vmax.f32 %v3215_v42, 0.0 }
 0x2e0   :  { %3382 = vst.msk [vmem:[%s6874_s7 + $0x1b8] sm:$0xff] %vm740_vm1, %v3318_v21 }
 0x2e1   :  { %3381 = vst.msk [vmem:[%s6874_s7 + $0x1b0] sm:$0xff] %vm740_vm1, %v3317_v35 }
 0x2e4   :  { %v3852_v0 = vpop.f32.mrb[56].mxu1 }
 0x2e5   :  { %v3230_v40 = vadd.f32 %v3852_v0, %v6506_v24  ;;  %v3224_v6 = vpop.f32.mrb[57].mxu1 }
 0x2e6   :  { %v3225_v10 = vadd.f32 %v6506_v24, %v3224_v6 }
 0x2e7   :  { %v3320_v25 = vmax.f32 %v3230_v40, 0.0 }
 0x2e8   :  { %v3319_v5 = vmax.f32 %v3225_v10, 0.0 }
 0x2e9   :  { %3384 = vst.msk [vmem:[%s6874_s7 + $0x1c8] sm:$0xff] %vm740_vm1, %v3320_v25 }
 0x2ea   :  { %3383 = vst.msk [vmem:[%s6874_s7 + $0x1c0] sm:$0xff] %vm740_vm1, %v3319_v5 }
 0x2ed   :  { %v3855_v2 = vpop.f32.mrb[58].mxu1 }
 0x2ee   :  { %v3240_v59 = vadd.f32 %v3855_v2, %v6506_v24  ;;  %v3234_v3 = vpop.f32.mrb[59].mxu1 }
 0x2ef   :  { %v3235_v39 = vadd.f32 %v6506_v24, %v3234_v3 }
 0x2f0   :  { %v3322_v58 = vmax.f32 %v3240_v59, 0.0 }
 0x2f1   :  { %v3321_v8 = vmax.f32 %v3235_v39, 0.0 }
 0x2f2   :  { %3386 = vst.msk [vmem:[%s6874_s7 + $0x1d8] sm:$0xff] %vm740_vm1, %v3322_v58 }
 0x2f3   :  { %3385 = vst.msk [vmem:[%s6874_s7 + $0x1d0] sm:$0xff] %vm740_vm1, %v3321_v8 }
 0x2f6   :  { %v3858_v29 = vpop.f32.mrb[60].mxu1 }
 0x2f7   :  { %v3250_v17 = vadd.f32 %v3858_v29, %v6506_v24  ;;  %v3244_v32 = vpop.f32.mrb[61].mxu1 }
 0x2f8   :  { %v3245_v26 = vadd.f32 %v6506_v24, %v3244_v32 }
 0x2f9   :  { %v3324_v41 = vmax.f32 %v3250_v17, 0.0 }
 0x2fa   :  { %v3323_v20 = vmax.f32 %v3245_v26, 0.0 }
 0x2fb   :  { %3388 = vst.msk [vmem:[%s6874_s7 + $0x1e8] sm:$0xff] %vm740_vm1, %v3324_v41 }
 0x2fc   :  { %3387 = vst.msk [vmem:[%s6874_s7 + $0x1e0] sm:$0xff] %vm740_vm1, %v3323_v20 }
 0x2ff   :  { %v3861_v34 = vpop.f32.mrb[62].mxu1 }
 0x300   :  { %v3260_v37 = vadd.f32 %v3861_v34, %v6506_v24  ;;  %v3254_v28 = vpop.f32.mrb[63].mxu1 }
 0x301   :  { %v3255_v54 = vadd.f32 %v6506_v24, %v3254_v28 }
 0x302   :  { %v3326_v14 = vmax.f32 %v3260_v37, 0.0 }
 0x303   :  { %v3325_v7 = vmax.f32 %v3255_v54, 0.0 }
 0x304   :  { %3390 = vst.msk [vmem:[%s6874_s7 + $0x1f8] sm:$0xff] %vm740_vm1, %v3326_v14 }
 0x305   :  { %3389 = vst.msk [vmem:[%s6874_s7 + $0x1f0] sm:$0xff] %vm740_vm1, %v3325_v7 }

</bundles_post_ra>
